<compile_context>
chip_gen: v7x
topology: tpu7x:2x2x1
jax: 0.10.0
libtpu: 0.0.40
codegen_flags: <defaults>
</compile_context>

<pallas_src>
import functools

import jax
import jax.numpy as jnp
from jax import lax
from jax.experimental import pallas as pl
from jax.experimental.pallas import tpu as pltpu


# ---------------------------------------------------------------------------
# Tile-size helpers
# ---------------------------------------------------------------------------

def _tile_lane(dim, target):
    """Largest multiple-of-128 divisor of `dim` that is <= target, else the full dim."""
    if dim <= target:
        return dim
    t = (target // 128) * 128
    while t >= 128:
        if dim % t == 0:
            return t
        t -= 128
    return dim


def _tile_sublane(dim, target):
    """Largest multiple-of-8 divisor of `dim` that is <= target, else the full dim."""
    if dim <= target:
        return dim
    t = (target // 8) * 8
    while t >= 8:
        if dim % t == 0:
            return t
        t -= 8
    return dim


def _pick_batch_tile(B, cap):
    """Batch tile under `cap`, forcing >=2 batch tiles when possible (v7x megacore)."""
    cap = max(8, cap)
    if B >= 16:
        cap = min(cap, max(8, (B // 2) // 8 * 8))
    return _tile_sublane(B, cap)


# ---------------------------------------------------------------------------
# Kernels
# ---------------------------------------------------------------------------

def _encode_topk_kernel(x_ref, w_ref, pre_b_ref, lat_b_ref, s_ref, acc_ref, *, k, strip):
    """grid = (batch tiles, M-reduction tiles). acc_ref: (tb, N) f32 accumulator."""
    j = pl.program_id(1)

    @pl.when(j == 0)
    def _():
        acc_ref[...] = jnp.zeros_like(acc_ref)

    # bf16 operands, f32 accumulation; W is pre-transposed (M, N) -> natural MXU shape.
    xc = (x_ref[...] - pre_b_ref[...]).astype(jnp.bfloat16)          # (tb, tk)
    acc_ref[...] += jnp.dot(xc, w_ref[...], preferred_element_type=jnp.float32)

    @pl.when(j == pl.num_programs(1) - 1)
    def _():
        lat = lat_b_ref[...]                                          # (1, N), loaded once
        tb = acc_ref.shape[0]
        n_strips = tb // strip

        def per_strip(r, carry):
            r0 = pl.multiple_of(r * strip, strip)
            s_pre = acc_ref[pl.ds(r0, strip), :] + lat                # (strip, N) f32

            # Monotone int32 key: signed-int order of `keys` == float order of s_pre.
            keys = pltpu.bitcast(s_pre, jnp.int32)
            keys = keys ^ ((keys >> 31) & jnp.int32(0x7FFFFFFF))

            # Fixed 32-step bisection over the full int32 key range (exact, O(1) in k).
            # Invariant: count(keys >= lo) >= k  and  count(keys >= hi) < k.
            lo = jnp.full((strip, 1), -(2 ** 31), jnp.int32)
            hi = jnp.full((strip, 1), 2 ** 31 - 1, jnp.int32)

            def bisect(_, lh):
                lo, hi = lh
                mid = (lo >> 1) + (hi >> 1) + (lo & hi & 1)           # overflow-free midpoint
                cnt = jnp.sum((keys >= mid).astype(jnp.int32), axis=-1, keepdims=True)
                ge = cnt >= k
                return jnp.where(ge, mid, lo), jnp.where(ge, hi, mid)

            lo, _ = lax.fori_loop(0, 32, bisect, (lo, hi))            # lo == k-th largest key

            # TODO(synk): like the threshold form, exact float ties at the k-th value keep
            # every tied entry (torch.topk keeps exactly k); measure-zero for real data.
            keep = keys >= lo
            s_ref[pl.ds(r0, strip), :] = jnp.where(
                keep, jnp.maximum(s_pre, 0.0), 0.0).astype(s_ref.dtype)
            return carry

        lax.fori_loop(0, n_strips, per_strip, 0)


def _decode_kernel(s_ref, d_ref, pre_b_ref, o_ref, acc_ref):
    """X_recon = S @ D + pre_bias (row-norm already folded into D). grid = (b, M, N-red)."""
    kk = pl.program_id(2)

    @pl.when(kk == 0)
    def _():
        acc_ref[...] = jnp.zeros_like(acc_ref)

    acc_ref[...] += jnp.dot(s_ref[...].astype(jnp.bfloat16), d_ref[...],
                            preferred_element_type=jnp.float32)

    @pl.when(kk == pl.num_programs(2) - 1)
    def _():
        o_ref[...] = (acc_ref[...] + pre_b_ref[...]).astype(o_ref.dtype)


# ---------------------------------------------------------------------------
# Wrappers
# ---------------------------------------------------------------------------

def encode_topk(x, w_t_bf16, pre_bias, latent_bias, k, *,
                block_b=256, block_m=512, strip=8):
    B, M = x.shape
    M2, N = w_t_bf16.shape
    assert M == M2 and 1 <= k <= N

    # Contraction tile: keep the double-buffered bf16 weight block <= ~8 MiB even for wide N.
    bm_cap = max(128, ((8 << 20) // (2 * N)) // 128 * 128)
    tk = _tile_lane(M, min(block_m, bm_cap))

    # Batch tile: keep f32 accumulator + S output within a conservative VMEM budget
    # (v7x has 64 MiB total) and give the parallel batch axis >= 2 tiles.
    vmem_budget = 32 << 20
    tb_cap = min(block_b, max(8, (vmem_budget // (3 * 4 * N)) // 8 * 8))
    tb = _pick_batch_tile(B, tb_cap)
    strip = min(strip, tb)
    if tb % strip != 0:
        strip = tb

    grid = (B // tb, M // tk)
    pre2 = pre_bias.reshape(1, M).astype(jnp.float32)
    lat2 = latent_bias.reshape(1, N).astype(jnp.float32)
    cost = pl.CostEstimate(
        flops=2 * B * N * M,
        transcendentals=0,
        bytes_accessed=4 * B * M + 2 * N * M * (B // tb) + 4 * B * N + 4 * (M + N))
    return pl.pallas_call(
        functools.partial(_encode_topk_kernel, k=k, strip=strip),
        out_shape=jax.ShapeDtypeStruct((B, N), jnp.float32),
        grid_spec=pltpu.PrefetchScalarGridSpec(
            num_scalar_prefetch=0,
            grid=grid,
            in_specs=[
                pl.BlockSpec((tb, tk), lambda i, j: (i, j)),   # X
                pl.BlockSpec((tk, N), lambda i, j: (j, 0)),    # W_enc.T (M, N), bf16
                pl.BlockSpec((1, tk), lambda i, j: (0, j)),    # pre_bias
                pl.BlockSpec((1, N), lambda i, j: (0, 0)),     # latent_bias
            ],
            out_specs=pl.BlockSpec((tb, N), lambda i, j: (i, 0)),
            scratch_shapes=[pltpu.VMEM((tb, N), jnp.float32)],
        ),
        compiler_params=pltpu.CompilerParams(
            dimension_semantics=("parallel", "arbitrary"),
            vmem_limit_bytes=48 << 20),
        cost_estimate=cost,
    )(x, w_t_bf16, pre2, lat2)


def decode(s, d_bf16, pre_bias, *, block_b=256, block_m=1024, block_n=2048):
    B, N = s.shape
    N2, M = d_bf16.shape
    assert N == N2
    tb = _pick_batch_tile(B, block_b)
    tm = _tile_lane(M, block_m)
    tn = _tile_lane(N, block_n)
    grid = (B // tb, M // tm, N // tn)
    pre2 = pre_bias.reshape(1, M).astype(jnp.float32)
    cost = pl.CostEstimate(
        flops=2 * B * N * M,
        transcendentals=0,
        bytes_accessed=4 * B * N * (M // tm) + 2 * N * M * (B // tb) + 4 * B * M + 4 * M)
    return pl.pallas_call(
        _decode_kernel,
        out_shape=jax.ShapeDtypeStruct((B, M), jnp.float32),
        grid_spec=pltpu.PrefetchScalarGridSpec(
            num_scalar_prefetch=0,
            grid=grid,
            in_specs=[
                pl.BlockSpec((tb, tn), lambda i, j, kk: (i, kk)),  # S
                pl.BlockSpec((tn, tm), lambda i, j, kk: (kk, j)),  # D (norm folded), bf16
                pl.BlockSpec((1, tm), lambda i, j, kk: (0, j)),    # pre_bias
            ],
            out_specs=pl.BlockSpec((tb, tm), lambda i, j, kk: (i, j)),
            scratch_shapes=[pltpu.VMEM((tb, tm), jnp.float32)],
        ),
        compiler_params=pltpu.CompilerParams(
            dimension_semantics=("parallel", "parallel", "arbitrary"),
            vmem_limit_bytes=48 << 20),
        cost_estimate=cost,
    )(s, d_bf16, pre2)


# ---------------------------------------------------------------------------
# Module
# ---------------------------------------------------------------------------

class TopKSAEPallas:
    """Pallas port of the PyTorch TopKSAE forward pass (TopK with ReLU post-activation)."""

    def __init__(self, D, learn_D, k, seed=20240625):
        self.learn_D = learn_D
        self.k = k
        N, M = D.shape
        key = jax.random.PRNGKey(seed + 42)
        if learn_D:
            D_ = jax.random.normal(key, (N, M), jnp.float32)
        else:
            D_ = jnp.asarray(D, jnp.float32)
        D_ = D_ / jnp.linalg.norm(D_, axis=1, keepdims=True)
        self.D_ = D_                                  # (N, M), rows unit norm
        self.pre_bias = jnp.zeros((M,), jnp.float32)
        self.latent_bias = jnp.zeros((N,), jnp.float32)
        self.refresh_weights()

    def refresh_weights(self):
        """Derive kernel-side weights from self.D_ (norm folded, pre-transposed, bf16).

        The forward-time renormalization in the PyTorch module is the identity on
        already-normalized rows, so it is folded in here once.
        TODO(synk): if D_ is ever trained, call refresh_weights() after each update.
        """
        Dn = self.D_ / jnp.linalg.norm(self.D_, axis=1, keepdims=True)
        self.W_enc_T_bf16 = jnp.transpose(Dn).astype(jnp.bfloat16)   # (M, N)
        self.D_bf16 = Dn.astype(jnp.bfloat16)                        # (N, M)

    def __call__(self, X):
        S = encode_topk(X, self.W_enc_T_bf16, self.pre_bias, self.latent_bias, self.k)
        # TODO(synk): fuse encode+decode (S stays in VMEM) and gather-decode the k hot
        #             D rows per sample instead of the dense (B,N)@(N,M).
        X_recon = decode(S, self.D_bf16, self.pre_bias)
        return S, X_recon


# ---------------------------------------------------------------------------
# Demo / correctness check
# ---------------------------------------------------------------------------

if __name__ == "__main__":
    key = jax.random.PRNGKey(0)
    B, N, M, k = 16, 2048, 1024, 64              # batch, latents, features, top-k
    k_d, k_x, k_pb, k_lb = jax.random.split(key, 4)
    D0 = jax.random.normal(k_d, (N, M), jnp.float32)
    X = jax.random.normal(k_x, (B, M), jnp.float32)
    pre_b = 0.1 * jax.random.normal(k_pb, (M,), jnp.float32)
    lat_b = 0.1 * jax.random.normal(k_lb, (N,), jnp.float32)

    for learn_D in (True, False):
        model = TopKSAEPallas(D0, learn_D=learn_D, k=k, seed=20240625)
        # spec initializes biases to zero; use non-zero values to exercise the bias paths
        model.pre_bias = pre_b
        model.latent_bias = lat_b

        S, X_recon = model(X)
        S = jax.block_until_ready(S)
        X_recon = jax.block_until_ready(X_recon)
        assert S.shape == (B, N) and X_recon.shape == (B, M)

        # ---- encode check: reference built from the same bf16 operands ----
        Xc_bf16 = (X - model.pre_bias).astype(jnp.bfloat16)
        S_pre = (jnp.dot(Xc_bf16, model.W_enc_T_bf16, preferred_element_type=jnp.float32)
                 + model.latent_bias)
        thresh = lax.top_k(S_pre, k)[0][:, k - 1:k]               # k-th largest per row
        S_ref = jnp.where(S_pre >= thresh, jnp.maximum(S_pre, 0.0), 0.0)
        # entries within eps of the row threshold may legitimately flip between kernel
        # and reference (f32 accumulation-order noise); exclude them from the check
        eps = 1e-3
        unambiguous = jnp.abs(S_pre - thresh) > eps
        s_err = float(jnp.max(jnp.where(unambiguous, jnp.abs(S - S_ref), 0.0)))
        assert s_err < 1e-2, s_err
        assert int(jnp.max(jnp.sum(S > 0.0, axis=-1))) <= k

        # ---- decode check: recon of the kernel's own S through the same bf16 D ----
        X_check = (jnp.dot(S.astype(jnp.bfloat16), model.D_bf16,
                           preferred_element_type=jnp.float32) + model.pre_bias)
        assert jnp.allclose(X_recon, X_check, atol=1e-2, rtol=1e-2), \
            float(jnp.max(jnp.abs(X_recon - X_check)))

    print("KERNEL_OK")
</pallas_src>

<mosaic_0001>
module attributes {stable_mosaic.version = 11 : i64} {
  func.func @_encode_topk_kernel(%arg0: i32, %arg1: i32, %arg2: memref<8x512xf32, #tpu.memory_space<vmem>>, %arg3: memref<512x2048xbf16, #tpu.memory_space<vmem>>, %arg4: memref<1x512xf32, #tpu.memory_space<vmem>>, %arg5: memref<1x2048xf32, #tpu.memory_space<vmem>>, %arg6: memref<8x2048xf32, #tpu.memory_space<vmem>>, %arg7: memref<8x2048xf32, #tpu.memory_space<vmem>>) attributes {dimension_semantics = [#tpu.dimension_semantics<parallel>, #tpu.dimension_semantics<arbitrary>], iteration_bounds = array<i64: 2, 2>, scalar_prefetch = 0 : i64, scratch_operands = 1 : i64, tpu.core_type = #tpu.core_type<tc>, window_params = [{transform_indices = @transform_0, window_bounds = array<i64: 8, 512>}, {transform_indices = @transform_1, window_bounds = array<i64: 512, 2048>}, {transform_indices = @transform_2, window_bounds = array<i64: 1, 512>}, {pipeline_mode = #tpu.pipeline_mode<synchronous>, transform_indices = @transform_3, window_bounds = array<i64: 1, 2048>}, {transform_indices = @transform_4, window_bounds = array<i64: 8, 2048>}]} {
    %c0_i32 = arith.constant 0 : i32
    %0 = arith.cmpi eq, %arg1, %c0_i32 : i32
    %1 = arith.extui %0 : i1 to i32
    %c0_i32_0 = arith.constant 0 : i32
    %2 = arith.cmpi ne, %1, %c0_i32_0 : i32
    scf.if %2 {
      %cst_11 = arith.constant 0.000000e+00 : f32
      %16 = vector.broadcast %cst_11 : f32 to vector<8x2048xf32>
      %c0_12 = arith.constant 0 : index
      %c0_13 = arith.constant 0 : index
      %17 = vector.load %arg7[%c0_12, %c0_13] : memref<8x2048xf32, #tpu.memory_space<vmem>>, vector<8x2048xf32>
      tpu.vector_store %arg7[%c0_12, %c0_13], %16 {strides = array<i32>} : memref<8x2048xf32, #tpu.memory_space<vmem>>, vector<8x2048xf32>,
    } else {
    }
    %c0 = arith.constant 0 : index
    %c0_1 = arith.constant 0 : index
    %3 = vector.load %arg2[%c0, %c0_1] : memref<8x512xf32, #tpu.memory_space<vmem>>, vector<8x512xf32>
    %c0_2 = arith.constant 0 : index
    %c0_3 = arith.constant 0 : index
    %4 = vector.load %arg4[%c0_2, %c0_3] : memref<1x512xf32, #tpu.memory_space<vmem>>, vector<1x512xf32>
    %5 = vector.broadcast %4 : vector<1x512xf32> to vector<8x512xf32>
    %6 = arith.subf %3, %5 : vector<8x512xf32>
    %7 = arith.truncf %6 : vector<8x512xf32> to vector<8x512xbf16>
    %c0_4 = arith.constant 0 : index
    %c0_5 = arith.constant 0 : index
    %8 = vector.load %arg7[%c0_4, %c0_5] : memref<8x2048xf32, #tpu.memory_space<vmem>>, vector<8x2048xf32>
    %c0_6 = arith.constant 0 : index
    %c0_7 = arith.constant 0 : index
    %9 = vector.load %arg3[%c0_6, %c0_7] : memref<512x2048xbf16, #tpu.memory_space<vmem>>, vector<512x2048xbf16>
    %cst = arith.constant dense<0.000000e+00> : vector<8x2048xf32>
    %10 = tpu.matmul %7, %9, %cst {dimension_numbers = #tpu.dot_dimension_numbers<[1], [0], [0], [1], [0, 0, 1, 1], [], []>} : vector<8x512xbf16>, vector<512x2048xbf16>, vector<8x2048xf32> -> vector<8x2048xf32>
    %11 = arith.addf %8, %10 : vector<8x2048xf32>
    %c0_8 = arith.constant 0 : index
    %c0_9 = arith.constant 0 : index
    %12 = vector.load %arg7[%c0_8, %c0_9] : memref<8x2048xf32, #tpu.memory_space<vmem>>, vector<8x2048xf32>
    tpu.vector_store %arg7[%c0_8, %c0_9], %11 {strides = array<i32>} : memref<8x2048xf32, #tpu.memory_space<vmem>>, vector<8x2048xf32>,
    %c1_i32 = arith.constant 1 : i32
    %13 = arith.cmpi eq, %arg1, %c1_i32 : i32
    %14 = arith.extui %13 : i1 to i32
    %c0_i32_10 = arith.constant 0 : i32
    %15 = arith.cmpi ne, %14, %c0_i32_10 : i32
    scf.if %15 {
      %c0_11 = arith.constant 0 : index
      %c0_12 = arith.constant 0 : index
      %16 = vector.load %arg5[%c0_11, %c0_12] : memref<1x2048xf32, #tpu.memory_space<vmem>>, vector<1x2048xf32>
      %c0_i32_13 = arith.constant 0 : i32
      %c8_i32 = arith.constant 8 : i32
      %17 = arith.muli %c0_i32_13, %c8_i32 : i32
      %18 = tpu.assume_multiple %17, 8 : i32
      %19 = arith.index_cast %18 : i32 to index
      %c0_14 = arith.constant 0 : index
      %20 = vector.load %arg7[%19, %c0_14] : memref<8x2048xf32, #tpu.memory_space<vmem>>, vector<8x2048xf32>
      %21 = vector.broadcast %16 : vector<1x2048xf32> to vector<8x2048xf32>
      %22 = arith.addf %20, %21 : vector<8x2048xf32>
      %23 = tpu.bitcast %22 : vector<8x2048xf32> -> vector<8x2048xi32>
      %c31_i32 = arith.constant 31 : i32
      %24 = vector.broadcast %c31_i32 : i32 to vector<8x2048xi32>
      %25 = arith.shrsi %23, %24 : vector<8x2048xi32>
      %c2147483647_i32 = arith.constant 2147483647 : i32
      %26 = vector.broadcast %c2147483647_i32 : i32 to vector<8x2048xi32>
      %27 = arith.andi %25, %26 : vector<8x2048xi32>
      %28 = arith.xori %23, %27 : vector<8x2048xi32>
      %c-2147483648_i32 = arith.constant -2147483648 : i32
      %29 = vector.broadcast %c-2147483648_i32 : i32 to vector<8x1xi32>
      %c2147483647_i32_15 = arith.constant 2147483647 : i32
      %30 = vector.broadcast %c2147483647_i32_15 : i32 to vector<8x1xi32>
      %c0_i32_16 = arith.constant 0 : i32
      %c32_i32 = arith.constant 32 : i32
      %31 = arith.addi %c0_i32_16, %c32_i32 : i32
      %c1_i32_17 = arith.constant 1 : i32
      %32:2 = scf.for %arg8 = %c0_i32_16 to %31 step %c1_i32_17 iter_args(%arg9 = %29, %arg10 = %30) -> (vector<8x1xi32>, vector<8x1xi32>)  : i32 {
        %c1_i32_22 = arith.constant 1 : i32
        %41 = vector.broadcast %c1_i32_22 : i32 to vector<8x1xi32>
        %42 = arith.shrsi %arg9, %41 : vector<8x1xi32>
        %c1_i32_23 = arith.constant 1 : i32
        %43 = vector.broadcast %c1_i32_23 : i32 to vector<8x1xi32>
        %44 = arith.shrsi %arg10, %43 : vector<8x1xi32>
        %45 = arith.addi %42, %44 : vector<8x1xi32>
        %46 = arith.andi %arg9, %arg10 : vector<8x1xi32>
        %c1_i32_24 = arith.constant 1 : i32
        %47 = vector.broadcast %c1_i32_24 : i32 to vector<8x1xi32>
        %48 = arith.andi %46, %47 : vector<8x1xi32>
        %49 = arith.addi %45, %48 : vector<8x1xi32>
        %50 = vector.broadcast %49 : vector<8x1xi32> to vector<8x2048xi32>
        %51 = arith.cmpi sge, %28, %50 : vector<8x2048xi32>
        %52 = arith.extui %51 : vector<8x2048xi1> to vector<8x2048xi32>
        %cst_25 = arith.constant dense<0> : vector<8xi32>
        %53 = vector.multi_reduction <add>, %52, %cst_25 [1] : vector<8x2048xi32> to vector<8xi32>
        %54 = vector.shape_cast %53 : vector<8xi32> to vector<8x1xi32>
        %c64_i32 = arith.constant 64 : i32
        %55 = vector.broadcast %c64_i32 : i32 to vector<8x1xi32>
        %56 = arith.cmpi sge, %54, %55 : vector<8x1xi32>
        %57 = arith.select %56, %49, %arg9 : vector<8x1xi1>, vector<8x1xi32>
        %58 = arith.select %56, %arg10, %49 : vector<8x1xi1>, vector<8x1xi32>
        scf.yield %57, %58 : vector<8x1xi32>, vector<8x1xi32>
      }
      %33 = vector.broadcast %32#0 : vector<8x1xi32> to vector<8x2048xi32>
      %34 = arith.cmpi sge, %28, %33 : vector<8x2048xi32>
      %cst_18 = arith.constant 0.000000e+00 : f32
      %35 = vector.broadcast %cst_18 : f32 to vector<8x2048xf32>
      %36 = arith.maximumf %22, %35 : vector<8x2048xf32>
      %cst_19 = arith.constant 0.000000e+00 : f32
      %37 = vector.broadcast %cst_19 : f32 to vector<8x2048xf32>
      %38 = arith.select %34, %36, %37 : vector<8x2048xi1>, vector<8x2048xf32>
      %39 = arith.index_cast %18 : i32 to index
      %c0_20 = arith.constant 0 : index
      %40 = vector.load %arg6[%39, %c0_20] : memref<8x2048xf32, #tpu.memory_space<vmem>>, vector<8x2048xf32>
      tpu.vector_store %arg6[%39, %c0_20], %38 {strides = array<i32>} : memref<8x2048xf32, #tpu.memory_space<vmem>>, vector<8x2048xf32>,
      %c1_i32_21 = arith.constant 1 : i32
    } else {
    }
    return
  }
  func.func @transform_0(%arg0: i32, %arg1: i32) -> (i32, i32) {
    %c0_i32 = arith.constant 0 : i32
    return %arg0, %arg1 : i32, i32
  }
  func.func @transform_1(%arg0: i32, %arg1: i32) -> (i32, i32) {
    %c0_i32 = arith.constant 0 : i32
    %c0_i32_0 = arith.constant 0 : i32
    return %arg1, %c0_i32 : i32, i32
  }
  func.func @transform_2(%arg0: i32, %arg1: i32) -> (i32, i32) {
    %c0_i32 = arith.constant 0 : i32
    %c0_i32_0 = arith.constant 0 : i32
    return %c0_i32, %arg1 : i32, i32
  }
  func.func @transform_3(%arg0: i32, %arg1: i32) -> (i32, i32) {
    %c0_i32 = arith.constant 0 : i32
    %c0_i32_0 = arith.constant 0 : i32
    %c0_i32_1 = arith.constant 0 : i32
    return %c0_i32, %c0_i32_0 : i32, i32
  }
  func.func @transform_4(%arg0: i32, %arg1: i32) -> (i32, i32) {
    %c0_i32 = arith.constant 0 : i32
    %c0_i32_0 = arith.constant 0 : i32
    return %arg0, %c0_i32 : i32, i32
  }
}

</mosaic_0001>

<bundles_post_ra>
// kernel: tpu_custom_call.1
= control target key start
LH: loop header
LB: loop body
LE: loop exit
PB: predicated region body
PF: predicated region fallthrough
CT: control target
= control target key end

     0   :  { %s6943_s0 = inlined_call_operand.hbm [shape: f32[16,1024], index: 0, kind: input, shape index: {}]   ;;  %s6944_s1 = inlined_call_operand.hbm [shape: bf16[1024,2048], index: 1, kind: input, shape index: {}]   ;;  %s6945_s2 = inlined_call_operand.hbm [shape: f32[1,1024], index: 2, kind: input, shape index: {}]   ;;  %s6946_s3 = inlined_call_operand.hbm [shape: f32[1,2048], index: 3, kind: input, shape index: {}]   ;;  %s6947_s4 = inlined_call_operand.hbm [shape: f32[16,2048], index: 4, kind: output, shape index: {}]  }
   0x1   :  { %6978 = sst [smem:[#allocation32_spill]] %s6944_s1 }
   0x2   :  { %6979 = sst [smem:[#allocation33_spill]] %s6946_s3 }
   0x3   :  { %6980 = sst [smem:[#allocation34_spill]] %s6947_s4 }
   0x4   :  { %9 = vsyncpa [#allocation4], 0 }
   0x5   :  { %11 = vsyncpa [#allocation4 + $0x1], 0 }
   0x6   :  { %12 = vsyncpa [#allocation7], 0 }
   0x7   :  { %14 = vsyncpa [#allocation7 + $0x1], 0 }
   0x8   :  { %15 = vsyncpa [#allocation10], 0 }
   0x9   :  { %16 = vsyncpa [#allocation5], 0 }
   0xa   :  { %18 = vsyncpa [#allocation5 + $0x1], 0  ;;  %s5696_s15 = smov 0   ;;  %s5698_s16 = smov 0  }
   0xb   :  { %s5700_s17 = smov 0   ;;  %s5702_s18 = smov 0  }
   0xc   :  { %s5704_s19 = smov 0   ;;  %s5706_s20 = smov 0  }
   0xd   :  { %s5708_s21 = smov 0   ;;  %s5710_s22 = smov 0  }
   0xe   :  { %s5712_s23 = smov 0   ;;  %s5714_s24 = smov 0  }
   0xf   :  { %s5716_s25 = smov 0   ;;  %s5718_s26 = smov 0  }
  0x10   :  { %s5720_s27 = smov 0   ;;  %s5722_s28 = smov 0  }
  0x11 LB: > { %6981 = sst [smem:[#allocation16_spill]] %s5596_s15  ;;  %p6952_p0 = scmp.eq.s32.totalorder %s5648_s28, 0  ;;  %s5648_s28 = sphi %s5722_s28, %s24_s28   ;;  %s5644_s27 = sphi %s5720_s27, %s7061_s27   ;;  %s5640_s26 = sphi %s5718_s26, %s7060_s26   ;;  %s5636_s25 = sphi %s5716_s25, %s7059_s25   ;;  %s5632_s24 = sphi %s5714_s24, %s7058_s24   ;;  %s5628_s23 = sphi %s5712_s23, %s7057_s23   ;;  %s5624_s22 = sphi %s5710_s22, %s7056_s22   ;;  %s5620_s21 = sphi %s5708_s21, %s7055_s21   ;;  %s5616_s20 = sphi %s5706_s20, %s7054_s20   ;;  %s5612_s19 = sphi %s5704_s19, %s7053_s19   ;;  %s5608_s18 = sphi %s5702_s18, %s7048_s18   ;;  %s5604_s17 = sphi %s5700_s17, %s7052_s17   ;;  %s5600_s16 = sphi %s5698_s16, %s7051_s16   ;;  %s5596_s15 = sphi %s5696_s15, %s7047_s15  }
  0x12   : > { %6982 = sst [smem:[#allocation17_spill]] %s5600_s16  ;;  %p78_p1 = scmp.ne.s32.totalorder %s5616_s20, %s5612_s19 }
  0x13   : > { %6983 = sst [smem:[#allocation18_spill]] %s5612_s19  ;;  %p6950_p2 = scmp.lt.s32.totalorder %s5648_s28, 4 }
  0x14   : > { %6984 = sst [smem:[#allocation19_spill]] %s5632_s24  ;;  %s213_s30 = sand.u32 1, %s5648_s28  }
  0x15   : > { %6985 = sst [smem:[#allocation20_spill]] %s5636_s25  ;;  %p80_p3 = por %p78_p1, %p6952_p0 }
  0x16   : > { %s6948_s5 = sand.u32 1, %s5616_s20   ;;  %s5186_s6 = sshll.u32 %s5640_s26, 16 }
  0x17   : > { %s4653_s7 = sshll.u32 %s6948_s5, 12  ;;  %s6986_s1 = sld [smem:[#allocation32_spill]] }
  0x18   : > { %p5785_p4 = pnand %p6950_p2, %p80_p3  ;;  %s217_s12 = scalar_lea.vmem [#allocation6], %s4653_s7 }
  0x19   : > { %s225_s13 = sshll.u32 %s217_s12, 4  ;;  %s5791_s14 = scalar_lea.sflag [#allocation7], %s213_s30  ;;  %s5789_s13 = int_to_ptr.vmem [resolvable:$true] %s225_s13 }
  0x1a   : > { %s6987_s11 = scalar_select %p5785_p4, 1, 0 }
  0x1b   : > { %p6951_p6 = pneg %p5785_p4 }
  0x1d   : > { %s5781_s10 = scalar_lea.hbm %s6986_s1, %s5186_s6  ;;  %s5369_s5 = scalar_lea.hbm %s6986_s1, 131072 }
  0x1e   : > { %s5364_s8 = scalar_lea.hbm %s5781_s10, 65536  ;;  %p5370_p9 = scmp.lt.u32.totalorder %s5781_s10, %s6986_s1 }
  0x1f   : > { %p5365_p5 = scmp.ne.s32.totalorder %s5781_s10, %s5364_s8  ;;  %p5371_p10 = scmp.lt.u32.totalorder %s5369_s5, %s5364_s8 }
  0x20   : > { %p5373_p12 = scmp.lt.u32.totalorder %s5364_s8, %s5781_s10 }
  0x21   : > { %p5367_p7 = pnand %p6951_p6, %p5365_p5  ;;  %p5372_p11 = por %p5371_p10, %p5370_p9 }
  0x23   : > { %p5368_p8 = pneg %p5367_p7  ;;  %p5374_p13 = por %p5373_p12, %p5372_p11 }
  0x25   : > { %p5375_p1 = pnand %p5374_p13, %p5368_p8 }
  0x27   : > { %5378 = shalt.err (!%p5375_p1)
}
  0x28   : > { %s5379_s30 = scalar_lea.vmem %s5789_s13, 65536  ;;  %s5662_s7 = smov [#allocation6]  }
  0x29   : > { %p5380_p3 = scmp.ne.s32.totalorder %s5789_s13, %s5379_s30  ;;  %s5384_s12 = sshll.u32 %s5662_s7, 4  ;;  %s5385_s12 = int_to_ptr.vmem [resolvable:$false] %s5384_s12 }
  0x2a   : > { %s5386_s4 = scalar_lea.vmem %s5385_s12, 131072  ;;  %p5387_p2 = scmp.lt.s32.totalorder %s5789_s13, %s5385_s12 }
  0x2b   : > { %p5382_p5 = pnand %p5380_p3, %p6951_p6  ;;  %p5388_p9 = scmp.lt.s32.totalorder %s5386_s4, %s5379_s30 }
  0x2d   : > { %p5383_p7 = pneg %p5382_p5  ;;  %p5389_p10 = por %p5388_p9, %p5387_p2 }
  0x2f   : > { %p5390_p11 = pnand %p5389_p10, %p5383_p7 }
  0x31   : > { %5393 = shalt.err (!%p5390_p11)
}
  0x32   : > { %s5663_s29 = smov 1024   ;;  %s5664_s5 = smov 64  }
  0x33   : > { %5211 = dma.hbm_to_vmem [thread:$0]  (!%p5785_p4), %s5781_s10, 65536, %s5789_s13, %s5791_s14, %s5663_s29, %s5663_s29, %s5664_s5  }
  0x34   : > { %s5820_s8 = sadd.s32 4294967295, %s5648_s28   ;;  %s4645_s6 = sadd.s32 4294967294, %s5648_s28  }
  0x35   : > { %6988 = sst [smem:[#allocation21_spill]] %s5820_s8  ;;  %p58_p2 = scmp.ne.s32.totalorder %s5624_s22, %s5620_s21 }
  0x36   : > { %p6957_p8 = scmp.eq.s32.totalorder %s5820_s8, 0  ;;  %p84_p12 = scmp.ne.s32.totalorder %s5612_s19, %s5608_s18 }
  0x37   : > { %p154_p13 = scmp.ne.s32.totalorder %s5604_s17, %s5600_s16  ;;  %p155_p5 = scmp.eq.s32.totalorder %s5820_s8, 3 }
  0x38   : > { %p5833_p1 = por %p6957_p8, %p58_p2  ;;  %p5839_p3 = por %p84_p12, %p6957_p8 }
  0x39   : > { %p160_p7 = scmp.ne.s32.totalorder %s5600_s16, %s5596_s15  ;;  %p161_p9 = scmp.eq.s32.totalorder %s4645_s6, 3 }
  0x3a   : > { %s6989_s30 = scalar_select %p5833_p1, 1, 0 }
  0x3b   : > { %s6991_s10 = scalar_select %p5839_p3, 1, 0 }
  0x3c   : > { %6990 = sst [smem:[#allocation22_spill]] %s6989_s30  ;;  %p4646_p10 = scmp.ge.s32.totalorder %s5648_s28, 1 }
  0x3d   : > { %6992 = sst [smem:[#allocation23_spill]] %s6991_s10  ;;  %p5847_p11 = por %p155_p5, %p154_p13 }
  0x3e   : > { %p168_p6 = scmp.lt.s32.totalorder %s5648_s28, 5  ;;  %p5852_p0 = por %p161_p9, %p160_p7 }
  0x3f   : > { %s6993_s18 = scalar_select %p5847_p11, 1, 0 }
  0x40   : > { %s6995_s21 = scalar_select %p5852_p0, 1, 0 }
  0x41   : > { %6994 = sst [smem:[#allocation24_spill]] %s6993_s18  ;;  %p5856_p2 = pnand %p4646_p10, %p168_p6 }
  0x42   : > { %6996 = sst [smem:[#allocation25_spill]] %s6995_s21  ;;  %s5665_s7 = smov [#allocation9]  }
  0x43   : > { %s6997_s13 = scalar_select %p5856_p2, 1, 0 }
  0x44   : > { %s181_s12 = sshll.u32 %s5665_s7, 4  ;;  %p5201_p12 = pneg %p5856_p2  ;;  %s182_s12 = int_to_ptr.vmem [resolvable:$true] %s181_s12 }
  0x45   : > { %s33_s29 = sadd.s32 1, %s5640_s26  ;;  %s36_s5 = sadd.s32 1, %s5644_s27 }
  0x46   : > { %p5864_p13 = pnand %p5201_p12, %p6957_p8  ;;  %p5870_p5 = scmp.ge.s32.totalorder %s33_s29, 2 }
  0x47   : > { %s7000_s3 = sld [smem:[#allocation33_spill]] }
  0x48   : > { %s6999_s6 = scalar_select %p5870_p5, 1, 0 }
  0x49   : > { %p5396_p7 = pneg %p5864_p13 }
  0x4d   : > { %s5394_s21 = scalar_lea.hbm %s7000_s3, 256 }
  0x4e   : > { %p5395_p6 = scmp.ne.s32.totalorder %s7000_s3, %s5394_s21  ;;  %p5401_p12 = scmp.lt.u32.totalorder %s5394_s21, %s7000_s3 }
  0x50   : > { %p5397_p9 = pnand %p5396_p7, %p5395_p6 }
  0x52   : > { %p5398_p10 = pneg %p5397_p9 }
  0x54   : > { %p5403_p8 = pnand %p5401_p12, %p5398_p10 }
  0x56   : > { %5406 = shalt.err (!%p5403_p8)
}
  0x57   : > { %s5407_s24 = scalar_lea.vmem %s182_s12, 256  ;;  %p5415_p1 = scmp.lt.s32.totalorder %s182_s12, %s182_s12 }
  0x58   : > { %p5408_p0 = scmp.ne.s32.totalorder %s182_s12, %s5407_s24  ;;  %p5416_p2 = scmp.lt.s32.totalorder %s5407_s24, %s5407_s24 }
  0x5a   : > { %p5410_p11 = pnand %p5408_p0, %p5396_p7  ;;  %p5417_p4 = por %p5416_p2, %p5415_p1 }
  0x5c   : > { %p5411_p3 = pneg %p5410_p11 }
  0x5e   : > { %p5418_p5 = pnand %p5417_p4, %p5411_p3 }
  0x60   : > { %5421 = shalt.err (!%p5418_p5)
}
  0x61   : > { %5204 = dma.hbm_to_vmem [thread:$0]  (!%p5864_p13), %s7000_s3, 256, %s182_s12, [#allocation10]  }
  0x62   : > { %p7001_p0 = scmp.ne.s32.totalorder %s6999_s6, 0  ;;  %s45_s25 = sadd.s32 1, %s5628_s23 }
  0x63   : > { %p52_p8 = scmp.ne.s32.totalorder %s5628_s23, %s5624_s22  ;;  %s192_s9 = sand.u32 1, %s5628_s23  }
  0x64   : > { %s7063_s29 = smov (%p7001_p0, %s33_s29), 0  ;;  %s7065_s5 = smov (!%p7001_p0, %s36_s5), %s5644_s27 }
  0x65   : > { %7002 = sst [smem:[#allocation26_spill]] %s7063_s29  ;;  %s41_s24 = ssub.s32 %s5640_s26, %s7063_s29 }
  0x66   : > { %p38_p4 = scmp.ge.s32.totalorder %s7065_s5, 2  ;;  %p69_p1 = scmp.eq.s32.totalorder %s41_s24, 0 }
  0x67   : > { %p7004_p3 = scmp.eq.s32.totalorder %s5648_s28, 0  ;;  %s4649_s12 = sshll.u32 %s192_s9, 5 }
  0x68   : > { %s7067_s5 = smov (%p38_p4, %s7065_s5), 0  ;;  %s7006_s6 = sadd.s32 1, %s5616_s20 }
  0x69   : > { %7003 = sst [smem:[#allocation27_spill]] %s7067_s5  ;;  %p5907_p11 = por %p7004_p3, %p52_p8 }
  0x6a   : > { %s40_s21 = ssub.s32 %s5644_s27, %s7067_s5  ;;  %s7007_s15 = sadd.s32 1, %s5604_s17 }
  0x6b   : > { %s42_s4 = sor.u32 %s41_s24, %s40_s21  ;;  %p142_p2 = scmp.eq.s32.totalorder %s40_s21, 0 }
  0x6c   : > { %p43_p13 = scmp.eq.s32.totalorder %s42_s4, 0  ;;  %s4650_s29 = sshll.u32 %s5640_s26, 2 }
  0x6d   : > { %s5916_s7 = scalar_select %p69_p1, %s5616_s20, %s7006_s6  }
  0x6e   : > { %s5919_s1 = scalar_select %p43_p13, %s5628_s23, %s45_s25  }
  0x6f   : > { %s5924_s3 = scalar_select %p142_p2, %s5604_s17, %s7007_s15  }
  0x70   : > { %s4651_s16 = sshll.u32 %s5644_s27, 3  ;;  %s196_s5 = scalar_lea.vmem [#allocation3], %s4649_s12 }
  0x71   : > { %s202_s10 = sadd.s32 %s4651_s16, %s4650_s29  ;;  %s206_s19 = sshll.u32 %s196_s5, 4  ;;  %s5928_s19 = int_to_ptr.vmem [resolvable:$true] %s206_s19 }
  0x72   : > { %s4652_s8 = sshll.u32 %s202_s10, 7  ;;  %p7008_p5 = scmp.lt.s32.totalorder %s5648_s28, 4 }
  0x73   : > { %s5933_s21 = scalar_lea.hbm %s6943_s0, %s4652_s8  ;;  %s7010_s16 = sand.u32 1, %s5616_s20  }
  0x74   : > { %p5939_p6 = pnand %p7008_p5, %p5907_p11  ;;  %s5945_s10 = sshll.u32 %s7010_s16, 2 }
  0x75   : > { %s5187_s29 = sshll.u32 %s5640_s26, 6  ;;  %s193_s5 = scalar_lea.sflag [#allocation4], %s192_s9 }
  0x76   : > { %s5422_s30 = scalar_lea.hbm %s5933_s21, 512  ;;  %p5424_p9 = pneg %p5939_p6 }
  0x77   : > { %p5423_p7 = scmp.ne.s32.totalorder %s5933_s21, %s5422_s30  ;;  %s5427_s12 = scalar_lea.hbm %s6943_s0, 2048 }
  0x78   : > { %p5428_p0 = scmp.lt.u32.totalorder %s5933_s21, %s6943_s0  ;;  %p5429_p4 = scmp.lt.u32.totalorder %s5427_s12, %s5422_s30 }
  0x79   : > { %p5425_p10 = pnand %p5424_p9, %p5423_p7  ;;  %p5431_p1 = scmp.lt.u32.totalorder %s5422_s30, %s5933_s21 }
  0x7a   : > { %p5430_p8 = por %p5429_p4, %p5428_p0 }
  0x7b   : > { %p5426_p12 = pneg %p5425_p10 }
  0x7c   : > { %p5432_p3 = por %p5431_p1, %p5430_p8 }
  0x7e   : > { %p5433_p11 = pnand %p5432_p3, %p5426_p12 }
  0x80   : > { %5436 = shalt.err (!%p5433_p11)
}
  0x81   : > { %s5437_s9 = scalar_lea.vmem %s5928_s19, 512  ;;  %s5666_s15 = smov [#allocation3]  }
  0x82   : > { %p5438_p2 = scmp.ne.s32.totalorder %s5928_s19, %s5437_s9  ;;  %s5442_s24 = sshll.u32 %s5666_s15, 4  ;;  %s5443_s24 = int_to_ptr.vmem [resolvable:$false] %s5442_s24 }
  0x83   : > { %s5444_s16 = scalar_lea.vmem %s5443_s24, 1024  ;;  %p5445_p7 = scmp.lt.s32.totalorder %s5928_s19, %s5443_s24 }
  0x84   : > { %p5440_p13 = pnand %p5438_p2, %p5424_p9  ;;  %p5446_p10 = scmp.lt.s32.totalorder %s5444_s16, %s5437_s9 }
  0x86   : > { %p5441_p5 = pneg %p5440_p13  ;;  %p5447_p0 = por %p5446_p10, %p5445_p7 }
  0x88   : > { %p5448_p4 = pnand %p5447_p0, %p5441_p5 }
  0x8a   : > { %5451 = shalt.err (!%p5448_p4)
}
  0x8b   : > { %5208 = dma.hbm_to_vmem [thread:$0]  (!%p5939_p6), %s5933_s21, 512, %s5928_s19, %s193_s5  }
  0x8c   : > { %s5978_s18 = scalar_lea.hbm %s6945_s2, %s5187_s29  ;;  %s239_s12 = scalar_lea.vmem [#allocation8], %s5945_s10 }
  0x8d   : > { %s247_s4 = sshll.u32 %s239_s12, 4  ;;  %s5452_s25 = scalar_lea.hbm %s5978_s18, 64  ;;  %s248_s4 = int_to_ptr.vmem [resolvable:$true] %s247_s4 }
  0x8e   : > { %p5453_p9 = scmp.ne.s32.totalorder %s5978_s18, %s5452_s25  ;;  %p7011_p12 = scmp.ne.s32.totalorder %s6987_s11, 0 }
  0x8f   : > { %s5457_s5 = scalar_lea.hbm %s6945_s2, 128  ;;  %p5458_p6 = scmp.lt.u32.totalorder %s5978_s18, %s6945_s2 }
  0x90   : > { %p7012_p8 = pneg %p7011_p12  ;;  %p5459_p11 = scmp.lt.u32.totalorder %s5457_s5, %s5452_s25 }
  0x91   : > { %p5461_p13 = scmp.lt.u32.totalorder %s5452_s25, %s5978_s18 }
  0x92   : > { %p5455_p1 = pnand %p5453_p9, %p7012_p8  ;;  %p5460_p2 = por %p5459_p11, %p5458_p6 }
  0x94   : > { %p5456_p3 = pneg %p5455_p1  ;;  %p5462_p5 = por %p5461_p13, %p5460_p2 }
  0x96   : > { %p5463_p7 = pnand %p5462_p5, %p5456_p3 }
  0x98   : > { %5466 = shalt.err (!%p5463_p7)
}
  0x99   : > { %s5467_s10 = scalar_lea.vmem %s248_s4, 64  ;;  %p7013_p0 = pmov %p7012_p8 }
  0x9a   : > { %p5468_p10 = scmp.ne.s32.totalorder %s248_s4, %s5467_s10  ;;  %s5667_s9 = smov [#allocation8]  }
  0x9b   : > { %s5472_s15 = sshll.u32 %s5667_s9, 4  ;;  %s5473_s15 = int_to_ptr.vmem [resolvable:$false] %s5472_s15 }
  0x9c   : > { %p5470_p4 = pnand %p5468_p10, %p7013_p0  ;;  %s5474_s24 = scalar_lea.vmem %s5473_s15, 128 }
  0x9d   : > { %p5475_p8 = scmp.lt.s32.totalorder %s248_s4, %s5473_s15  ;;  %p5476_p1 = scmp.lt.s32.totalorder %s5474_s24, %s5467_s10 }
  0x9e   : > { %p5471_p9 = pneg %p5470_p4 }
  0x9f   : > { %p5477_p6 = por %p5476_p1, %p5475_p8 }
  0xa1   : > { %p5478_p11 = pnand %p5477_p6, %p5471_p9 }
  0xa3   : > { %5481 = shalt.err (!%p5478_p11)
}
  0xa4   : > { %5214 = dma.hbm_to_vmem [thread:$0]  (!%p7011_p12), %s5978_s18, 64, %s248_s4, %s5791_s14  }
  0xa5   : > { %p7014_p3 = scmp.ne.s32.totalorder %s6997_s13, 0 }
  0xa6   : > { %s7015_s16 = sld [smem:[#allocation22_spill]] (!%p7014_p3)  ;;  %s258_s30 = sand.u32 (!%p7014_p3), 1, %s5624_s22  }
  0xa7   : > { %256 = sbr.rel (%p7014_p3) target bundleno = 1186 (0x4a2), region = 36  ;;  %s4661_s8 = sshll.u32 (!%p7014_p3), %s258_s30, 5 }
  0xa8   : > { %s259_s12 = scalar_lea.sflag (!%p7014_p3), [#allocation4], %s258_s30  ;;  %s6004_s25 = scalar_lea.vmem (!%p7014_p3), [#allocation3], %s4661_s8 }
  0xac   : > { %p7016_p2 = scmp.ne.s32.totalorder (!%p7014_p3), %s7015_s16, 0 }
  0xae   : > { %5579 = dma.done.wait (%p7016_p2), %s259_s12, 512  }
  0xaf   : > { %5581 = vsyncadd (%p7016_p2), %s259_s12, 4294966784  ;;  %s7017_s19 = sld [smem:[#allocation21_spill]]  ;;  %s7018_s11 = sld [smem:[#allocation18_spill]] }
  0xb0   : > { %s7019_s21 = sld [smem:[#allocation23_spill]] }
  0xb5   : > { %s267_s5 = sand.u32 1, %s7017_s19   ;;  %s269_s14 = sand.u32 1, %s7018_s11  }
  0xb6   : > { %s4662_s18 = sshll.u32 %s269_s14, 12  ;;  %s268_s13 = scalar_lea.sflag [#allocation7], %s267_s5 }
  0xb7   : > { %s6012_s4 = scalar_lea.vmem [#allocation6], %s4662_s18  ;;  %p7020_p12 = scmp.ne.s32.totalorder %s7019_s21, 0 }
  0xb9   : > { %5583 = dma.done.wait (%p7020_p12), %s268_s13, 65600  }
  0xba   : > { %5585 = vsyncadd (%p7020_p12), %s268_s13, 4294901696  ;;  %s6018_s6 = sshll.u32 %s269_s14, 2  ;;  %p7021_p13 = scmp.eq.s32.totalorder %s7017_s19, 0 }
  0xbb   : > { %s280_s29 = scalar_lea.vmem [#allocation8], %s6018_s6 }
  0xbc   : > { %5587 = dma.done.wait (%p7021_p13), [#allocation10], 256   ;;  %p7022_p5 = pmov %p7021_p13 }
  0xbd   : > { %s7023_s10 = sld [smem:[#allocation17_spill]]  ;;  %s7024_s16 = sld [smem:[#allocation19_spill]] }
  0xbe   : > { %5589 = vsyncadd (%p7022_p5), [#allocation10], 4294967040 }
  0xc3   : > { %s316_s9 = sand.u32 1, %s7023_s10   ;;  %p4666_p7 = scmp.ne.s32.totalorder %s7024_s16, 0 }
  0xc4   : > { %s4665_s15 = sshll.u32 %s316_s9, 7  ;;  %v5668_v0 = vmov (!%p4666_p7), 0.0  }
  0xc5   : > { %s6028_s24 = scalar_lea.vmem [#allocation11], %s4665_s15  ;;  %325 = sbr.rel (%p4666_p7) target bundleno = 205 (0xcd), region = 56  ;;  %326 = vst [vmem:[#allocation2] sm:$0xff] (!%p4666_p7), %v5668_v0  ;;  %327 = vst [vmem:[#allocation2 + $0x8] sm:$0xff] (!%p4666_p7), %v5668_v0 }
  0xc6   : > { %328 = vst [vmem:[#allocation2 + $0x10] sm:$0xff] (!%p4666_p7), %v5668_v0  ;;  %329 = vst [vmem:[#allocation2 + $0x18] sm:$0xff] (!%p4666_p7), %v5668_v0 }
  0xc7   : > { %330 = vst [vmem:[#allocation2 + $0x20] sm:$0xff] (!%p4666_p7), %v5668_v0  ;;  %331 = vst [vmem:[#allocation2 + $0x28] sm:$0xff] (!%p4666_p7), %v5668_v0 }
  0xc8   : > { %332 = vst [vmem:[#allocation2 + $0x30] sm:$0xff] (!%p4666_p7), %v5668_v0  ;;  %333 = vst [vmem:[#allocation2 + $0x38] sm:$0xff] (!%p4666_p7), %v5668_v0 }
  0xc9   : > { %334 = vst [vmem:[#allocation2 + $0x40] sm:$0xff] (!%p4666_p7), %v5668_v0  ;;  %335 = vst [vmem:[#allocation2 + $0x48] sm:$0xff] (!%p4666_p7), %v5668_v0 }
  0xca   : > { %336 = vst [vmem:[#allocation2 + $0x50] sm:$0xff] (!%p4666_p7), %v5668_v0  ;;  %337 = vst [vmem:[#allocation2 + $0x58] sm:$0xff] (!%p4666_p7), %v5668_v0 }
  0xcb   : > { %338 = vst [vmem:[#allocation2 + $0x60] sm:$0xff] (!%p4666_p7), %v5668_v0  ;;  %339 = vst [vmem:[#allocation2 + $0x68] sm:$0xff] (!%p4666_p7), %v5668_v0 }
  0xcc   : > { %340 = vst [vmem:[#allocation2 + $0x70] sm:$0xff] %v5668_v0  ;;  %341 = vst [vmem:[#allocation2 + $0x78] sm:$0xff] %v5668_v0 }
  0xcd PF: > { %v392_v1 = vld [vmem:[%s6012_s4] sm:$0xff]  ;;  %v348_v33 = vlaneseq  ;;  %v343_v58 = vld [vmem:[%s6004_s25 + $0x8] sm:$0xff]  ;;  %v345_v0 = vld [vmem:[%s6004_s25 + $0x18] sm:$0xff]  ;;  %s7025_s30 = sld [smem:[#allocation19_spill]] }
  0xce   : > { %v400_v2 = vld [vmem:[%s6012_s4 + $0x40] sm:$0xff] }
  0xcf   : > { %v648_v3 = vld [vmem:[%s6012_s4 + $0x800] sm:$0xff]  ;;  %v4668_v4 = vcombine.high %v392_v1, %v400_v2  ;;  %v4667_v6 = vcombine.low %v392_v1, %v400_v2  ;;  %v6053_v42 = vshrl.u32 %v348_v33, 7 }
  0xd0   : > { %v656_v5 = vld [vmem:[%s6012_s4 + $0x840] sm:$0xff] }
  0xd1   : > { %v408_v7 = vld [vmem:[%s6012_s4 + $0x80] sm:$0xff]  ;;  %v4924_v9 = vcombine.high %v648_v3, %v656_v5  ;;  %v4923_v10 = vcombine.low %v648_v3, %v656_v5  ;;  %3464 = vmatprep.subr.bf16.mxu0 %v4668_v4  ;;  %v6060_v51 = vsub.s32 1, %v6053_v42  ;;  %v6063_v52 = vsub.s32 3, %v6053_v42 }
  0xd2   : > { %v416_v8 = vld [vmem:[%s6012_s4 + $0xc0] sm:$0xff]  ;;  %3465 = vmatpush1.bf16.msra.mxu0 %v4667_v6 }
  0xd3   : > { %v4684_v11 = vcombine.high %v408_v7, %v416_v8  ;;  %v664_v12 = vld [vmem:[%s6012_s4 + $0x880] sm:$0xff]  ;;  %3505 = vmatprep.subr.bf16.mxu1 %v4924_v9  ;;  %v4683_v19 = vcombine.low %v408_v7, %v416_v8  ;;  %p5179_p10 = scmp.ne.s32.totalorder %s7025_s30, 1 }
  0xd4   : > { %v672_v13 = vld [vmem:[%s6012_s4 + $0x8c0] sm:$0xff]  ;;  %3506 = vmatpush1.bf16.msra.mxu1 %v4923_v10 }
  0xd5   : > { %v424_v14 = vld [vmem:[%s6012_s4 + $0x100] sm:$0xff]  ;;  %v4940_v15 = vcombine.high %v664_v12, %v672_v13  ;;  %3466 = vmatprep.subr.bf16.mxu0 %v4684_v11  ;;  %v4939_v20 = vcombine.low %v664_v12, %v672_v13 }
  0xd6   : > { %v432_v16 = vld [vmem:[%s6012_s4 + $0x140] sm:$0xff]  ;;  %3467 = vmatpush1.bf16.msra.mxu0 %v4683_v19 }
  0xd7   : > { %v680_v17 = vld [vmem:[%s6012_s4 + $0x900] sm:$0xff]  ;;  %v4700_v21 = vcombine.high %v424_v14, %v432_v16  ;;  %3507 = vmatprep.subr.bf16.mxu1 %v4940_v15  ;;  %v4699_v27 = vcombine.low %v424_v14, %v432_v16 }
  0xd8   : > { %v688_v18 = vld [vmem:[%s6012_s4 + $0x940] sm:$0xff]  ;;  %3508 = vmatpush1.bf16.msra.mxu1 %v4939_v20 }
  0xd9   : > { %v4956_v22 = vcombine.high %v680_v17, %v688_v18  ;;  %v440_v23 = vld [vmem:[%s6012_s4 + $0x180] sm:$0xff]  ;;  %3468 = vmatprep.subr.bf16.mxu0 %v4700_v21  ;;  %v4955_v28 = vcombine.low %v680_v17, %v688_v18 }
  0xda   : > { %v448_v24 = vld [vmem:[%s6012_s4 + $0x1c0] sm:$0xff]  ;;  %3469 = vmatpush1.bf16.msra.mxu0 %v4699_v27 }
  0xdb   : > { %v696_v25 = vld [vmem:[%s6012_s4 + $0x980] sm:$0xff]  ;;  %v4716_v29 = vcombine.high %v440_v23, %v448_v24  ;;  %3509 = vmatprep.subr.bf16.mxu1 %v4956_v22  ;;  %v4715_v36 = vcombine.low %v440_v23, %v448_v24 }
  0xdc   : > { %v704_v26 = vld [vmem:[%s6012_s4 + $0x9c0] sm:$0xff]  ;;  %3510 = vmatpush1.bf16.msra.mxu1 %v4955_v28 }
  0xdd   : > { %v4972_v30 = vcombine.high %v696_v25, %v704_v26  ;;  %v456_v31 = vld [vmem:[%s6012_s4 + $0x200] sm:$0xff]  ;;  %3470 = vmatprep.subr.bf16.mxu0 %v4716_v29  ;;  %v4971_v37 = vcombine.low %v696_v25, %v704_v26 }
  0xde   : > { %v464_v32 = vld [vmem:[%s6012_s4 + $0x240] sm:$0xff]  ;;  %3471 = vmatpush1.bf16.msra.mxu0 %v4715_v36 }
  0xdf   : > { %v712_v34 = vld [vmem:[%s6012_s4 + $0xa00] sm:$0xff]  ;;  %v4732_v38 = vcombine.high %v456_v31, %v464_v32  ;;  %3511 = vmatprep.subr.bf16.mxu1 %v4972_v30  ;;  %v4731_v45 = vcombine.low %v456_v31, %v464_v32 }
  0xe0   : > { %v720_v35 = vld [vmem:[%s6012_s4 + $0xa40] sm:$0xff]  ;;  %3512 = vmatpush1.bf16.msra.mxu1 %v4971_v37 }
  0xe1   : > { %v4988_v39 = vcombine.high %v712_v34, %v720_v35  ;;  %v472_v40 = vld [vmem:[%s6012_s4 + $0x280] sm:$0xff]  ;;  %3472 = vmatprep.subr.bf16.mxu0 %v4732_v38  ;;  %v4987_v46 = vcombine.low %v712_v34, %v720_v35 }
  0xe2   : > { %v480_v41 = vld [vmem:[%s6012_s4 + $0x2c0] sm:$0xff]  ;;  %3473 = vmatpush1.bf16.msra.mxu0 %v4731_v45 }
  0xe3   : > { %v728_v43 = vld [vmem:[%s6012_s4 + $0xa80] sm:$0xff]  ;;  %v4748_v47 = vcombine.high %v472_v40, %v480_v41  ;;  %3513 = vmatprep.subr.bf16.mxu1 %v4988_v39  ;;  %v4747_v55 = vcombine.low %v472_v40, %v480_v41 }
  0xe4   : > { %v736_v44 = vld [vmem:[%s6012_s4 + $0xac0] sm:$0xff]  ;;  %3514 = vmatpush1.bf16.msra.mxu1 %v4987_v46 }
  0xe5   : > { %v5004_v48 = vcombine.high %v728_v43, %v736_v44  ;;  %v488_v49 = vld [vmem:[%s6012_s4 + $0x300] sm:$0xff]  ;;  %3474 = vmatprep.subr.bf16.mxu0 %v4748_v47  ;;  %v5003_v56 = vcombine.low %v728_v43, %v736_v44 }
  0xe6   : > { %v496_v50 = vld [vmem:[%s6012_s4 + $0x340] sm:$0xff]  ;;  %3475 = vmatpush1.bf16.msra.mxu0 %v4747_v55 }
  0xe7   : > { %v744_v53 = vld [vmem:[%s6012_s4 + $0xb00] sm:$0xff]  ;;  %v4764_v57 = vcombine.high %v488_v49, %v496_v50  ;;  %3515 = vmatprep.subr.bf16.mxu1 %v5004_v48  ;;  %v4763_v4 = vcombine.low %v488_v49, %v496_v50 }
  0xe8   : > { %v752_v54 = vld [vmem:[%s6012_s4 + $0xb40] sm:$0xff]  ;;  %3516 = vmatpush1.bf16.msra.mxu1 %v5003_v56 }
  0xe9   : > { %v6070_v59 = vld [vmem:[%s280_s29] sm:$0xf]  ;;  %v5020_v60 = vcombine.high %v744_v53, %v752_v54  ;;  %3476 = vmatprep.subr.bf16.mxu0 %v4764_v57  ;;  %v5019_v7 = vcombine.low %v744_v53, %v752_v54 }
  0xea   : > { %v504_v61 = vld [vmem:[%s6012_s4 + $0x380] sm:$0xff]  ;;  %v355_v63 = vrot.slane %v6070_v59, %v6060_v51  ;;  %v363_v1 = vrot.slane %v6070_v59, %v6063_v52  ;;  %3477 = vmatpush1.bf16.msra.mxu0 %v4763_v4  ;;  %v6116_v4 = vsub.s32 0, %v6053_v42 }
  0xeb   : > { %v512_v62 = vld [vmem:[%s6012_s4 + $0x3c0] sm:$0xff]  ;;  %3517 = vmatprep.subr.bf16.mxu1 %v5020_v60 }
  0xec   : > { %v760_v2 = vld [vmem:[%s6012_s4 + $0xb80] sm:$0xff]  ;;  %v369_v5 = vsub.f32 %v343_v58, %v355_v63  ;;  %v371_v6 = vsub.f32 %v345_v0, %v363_v1  ;;  %v4780_v8 = vcombine.high %v504_v61, %v512_v62  ;;  %v4779_v16 = vcombine.low %v504_v61, %v512_v62  ;;  %3518 = vmatpush1.bf16.msra.mxu1 %v5019_v7 }
  0xed   : > { %v768_v3 = vld [vmem:[%s6012_s4 + $0xbc0] sm:$0xff] }
  0xee   : > { %v5036_v9 = vcombine.high %v760_v2, %v768_v3  ;;  %v520_v10 = vld [vmem:[%s6012_s4 + $0x400] sm:$0xff]  ;;  %v6083_v12 = vpack.c.bf16 %v369_v5, %v369_v5  ;;  %v6085_v13 = vpack.c.bf16 %v371_v6, %v371_v6  ;;  %3478 = vmatprep.subr.bf16.mxu0 %v4780_v8  ;;  %v5035_v17 = vcombine.low %v760_v2, %v768_v3 }
  0xef   : > { %v528_v11 = vld [vmem:[%s6012_s4 + $0x440] sm:$0xff]  ;;  %3479 = vmatpush1.bf16.msra.mxu0 %v4779_v16  ;;  %v6119_v6 = vsub.s32 2, %v6053_v42  ;;  %v351_v16 = vrot.slane %v6070_v59, %v6116_v4 }
  0xf0   : > { %v776_v14 = vld [vmem:[%s6012_s4 + $0xc00] sm:$0xff]  ;;  %3496 = vmatprep.mubr.bf16.mxu0 %v6083_v12  ;;  %v4796_v18 = vcombine.high %v520_v10, %v528_v11  ;;  %3519 = vmatprep.subr.bf16.mxu1 %v5036_v9  ;;  %v4795_v24 = vcombine.low %v520_v10, %v528_v11 }
  0xf1   : > { %v784_v15 = vld [vmem:[%s6012_s4 + $0xc40] sm:$0xff]  ;;  %3537 = vmatprep.mubr.bf16.mxu1 %v6085_v13  ;;  %3520 = vmatpush1.bf16.msra.mxu1 %v5035_v17 }
  0xf2   : > { %v5052_v19 = vcombine.high %v776_v14, %v784_v15  ;;  %v536_v20 = vld [vmem:[%s6012_s4 + $0x480] sm:$0xff]  ;;  %3480 = vmatprep.subr.bf16.mxu0 %v4796_v18  ;;  %v5051_v25 = vcombine.low %v776_v14, %v784_v15 }
  0xf3   : > { %v544_v21 = vld [vmem:[%s6012_s4 + $0x4c0] sm:$0xff]  ;;  %3481 = vmatpush1.bf16.msra.mxu0 %v4795_v24  ;;  %v393_v24 = vld [vmem:[%s6012_s4 + $0x8] sm:$0xff] }
  0xf4   : > { %v792_v22 = vld [vmem:[%s6012_s4 + $0xc80] sm:$0xff]  ;;  %v4812_v26 = vcombine.high %v536_v20, %v544_v21  ;;  %3521 = vmatprep.subr.bf16.mxu1 %v5052_v19  ;;  %v4811_v32 = vcombine.low %v536_v20, %v544_v21  ;;  %v359_v19 = vrot.slane %v6070_v59, %v6119_v6 }
  0xf5   : > { %v800_v23 = vld [vmem:[%s6012_s4 + $0xcc0] sm:$0xff]  ;;  %3522 = vmatpush1.bf16.msra.mxu1 %v5051_v25  ;;  %v401_v25 = vld [vmem:[%s6012_s4 + $0x48] sm:$0xff] }
  0xf6   : > { %v5068_v27 = vcombine.high %v792_v22, %v800_v23  ;;  %v552_v28 = vld [vmem:[%s6012_s4 + $0x500] sm:$0xff]  ;;  %3482 = vmatprep.subr.bf16.mxu0 %v4812_v26  ;;  %v5067_v33 = vcombine.low %v792_v22, %v800_v23  ;;  %v344_v22 = vld [vmem:[%s6004_s25 + $0x10] sm:$0xff] }
  0xf7   : > { %v560_v29 = vld [vmem:[%s6012_s4 + $0x540] sm:$0xff]  ;;  %3483 = vmatpush1.bf16.msra.mxu0 %v4811_v32 }
  0xf8   : > { %v808_v30 = vld [vmem:[%s6012_s4 + $0xd00] sm:$0xff]  ;;  %v4828_v34 = vcombine.high %v552_v28, %v560_v29  ;;  %3523 = vmatprep.subr.bf16.mxu1 %v5068_v27  ;;  %v4827_v40 = vcombine.low %v552_v28, %v560_v29  ;;  %v649_v27 = vld [vmem:[%s6012_s4 + $0x808] sm:$0xff] }
  0xf9   : > { %v816_v31 = vld [vmem:[%s6012_s4 + $0xd40] sm:$0xff]  ;;  %3524 = vmatpush1.bf16.msra.mxu1 %v5067_v33  ;;  %v657_v28 = vld [vmem:[%s6012_s4 + $0x848] sm:$0xff] }
  0xfa   : > { %v5084_v35 = vcombine.high %v808_v30, %v816_v31  ;;  %v568_v36 = vld [vmem:[%s6012_s4 + $0x580] sm:$0xff]  ;;  %3484 = vmatprep.subr.bf16.mxu0 %v4828_v34  ;;  %v5083_v41 = vcombine.low %v808_v30, %v816_v31  ;;  %v370_v30 = vsub.f32 %v344_v22, %v359_v19  ;;  %v4670_v31 = vcombine.high %v393_v24, %v401_v25  ;;  %v409_v33 = vld [vmem:[%s6012_s4 + $0x88] sm:$0xff] }
  0xfb   : > { %v576_v37 = vld [vmem:[%s6012_s4 + $0x5c0] sm:$0xff]  ;;  %3485 = vmatpush1.bf16.msra.mxu0 %v4827_v40  ;;  %v4926_v32 = vcombine.high %v649_v27, %v657_v28  ;;  %v417_v34 = vld [vmem:[%s6012_s4 + $0xc8] sm:$0xff]  ;;  %v4925_v40 = vcombine.low %v649_v27, %v657_v28 }
  0xfc   : > { %v824_v38 = vld [vmem:[%s6012_s4 + $0xd80] sm:$0xff]  ;;  %v4844_v43 = vcombine.high %v568_v36, %v576_v37  ;;  %3525 = vmatprep.subr.bf16.mxu1 %v5084_v35  ;;  %v4843_v49 = vcombine.low %v568_v36, %v576_v37  ;;  %v665_v36 = vld [vmem:[%s6012_s4 + $0x888] sm:$0xff] }
  0xfd   : > { %v832_v39 = vld [vmem:[%s6012_s4 + $0xdc0] sm:$0xff]  ;;  %3526 = vmatpush1.bf16.msra.mxu1 %v5083_v41  ;;  %v673_v37 = vld [vmem:[%s6012_s4 + $0x8c8] sm:$0xff]  ;;  %v4686_v41 = vcombine.high %v409_v33, %v417_v34 }
  0xfe   : > { %v5100_v44 = vcombine.high %v824_v38, %v832_v39  ;;  %v584_v45 = vld [vmem:[%s6012_s4 + $0x600] sm:$0xff]  ;;  %3486 = vmatprep.subr.bf16.mxu0 %v4844_v43  ;;  %v5099_v50 = vcombine.low %v824_v38, %v832_v39  ;;  %v6141_v38 = vpack.c.bf16 %v370_v30, %v370_v30  ;;  %v4669_v39 = vcombine.low %v393_v24, %v401_v25  ;;  %v489_v19 = vld [vmem:[%s6012_s4 + $0x308] sm:$0xff] }
  0xff   : > { %v592_v46 = vld [vmem:[%s6012_s4 + $0x640] sm:$0xff]  ;;  %3487 = vmatpush1.bf16.msra.mxu0 %v4843_v49  ;;  %v4942_v43 = vcombine.high %v665_v36, %v673_v37  ;;  %v4941_v49 = vcombine.low %v665_v36, %v673_v37  ;;  %v753_v22 = vld [vmem:[%s6012_s4 + $0xb48] sm:$0xff] }
 0x100   : > { %v840_v47 = vld [vmem:[%s6012_s4 + $0xe00] sm:$0xff]  ;;  %v4860_v53 = vcombine.high %v584_v45, %v592_v46  ;;  %3527 = vmatprep.subr.bf16.mxu1 %v5100_v44  ;;  %v4859_v60 = vcombine.low %v584_v45, %v592_v46  ;;  %v425_v44 = vld [vmem:[%s6012_s4 + $0x108] sm:$0xff] }
 0x101   : > { %v848_v48 = vld [vmem:[%s6012_s4 + $0xe40] sm:$0xff]  ;;  %3528 = vmatpush1.bf16.msra.mxu1 %v5099_v50  ;;  %v433_v45 = vld [vmem:[%s6012_s4 + $0x148] sm:$0xff] }
 0x102   : > { %v5116_v54 = vcombine.high %v840_v47, %v848_v48  ;;  %v600_v55 = vld [vmem:[%s6012_s4 + $0x680] sm:$0xff]  ;;  %3488 = vmatprep.subr.bf16.mxu0 %v4860_v53  ;;  %v5115_v61 = vcombine.low %v840_v47, %v848_v48  ;;  %v681_v46 = vld [vmem:[%s6012_s4 + $0x908] sm:$0xff]  ;;  %v4685_v48 = vcombine.low %v409_v33, %v417_v34  ;;  %v4702_v50 = vcombine.high %v425_v44, %v433_v45 }
 0x103   : > { %v608_v56 = vld [vmem:[%s6012_s4 + $0x6c0] sm:$0xff]  ;;  %3489 = vmatpush1.bf16.msra.mxu0 %v4859_v60  ;;  %v689_v47 = vld [vmem:[%s6012_s4 + $0x948] sm:$0xff] }
 0x104   : > { %v856_v57 = vld [vmem:[%s6012_s4 + $0xe80] sm:$0xff]  ;;  %v4876_v62 = vcombine.high %v600_v55, %v608_v56  ;;  %3529 = vmatprep.subr.bf16.mxu1 %v5116_v54  ;;  %v4875_v5 = vcombine.low %v600_v55, %v608_v56  ;;  %v4958_v53 = vcombine.high %v681_v46, %v689_v47  ;;  %v441_v54 = vld [vmem:[%s6012_s4 + $0x188] sm:$0xff]  ;;  %v4957_v60 = vcombine.low %v681_v46, %v689_v47 }
 0x105   : > { %v864_v58 = vld [vmem:[%s6012_s4 + $0xec0] sm:$0xff]  ;;  %3530 = vmatpush1.bf16.msra.mxu1 %v5115_v61  ;;  %v449_v55 = vld [vmem:[%s6012_s4 + $0x1c8] sm:$0xff] }
 0x106   : > { %v5132_v63 = vcombine.high %v856_v57, %v864_v58  ;;  %v616_v0 = vld [vmem:[%s6012_s4 + $0x700] sm:$0xff]  ;;  %3490 = vmatprep.subr.bf16.mxu0 %v4876_v62  ;;  %v5131_v7 = vcombine.low %v856_v57, %v864_v58  ;;  %v697_v56 = vld [vmem:[%s6012_s4 + $0x988] sm:$0xff]  ;;  %v4701_v58 = vcombine.low %v425_v44, %v433_v45  ;;  %v4718_v61 = vcombine.high %v441_v54, %v449_v55 }
 0x107   : > { %v624_v1 = vld [vmem:[%s6012_s4 + $0x740] sm:$0xff]  ;;  %3491 = vmatpush1.bf16.msra.mxu0 %v4875_v5  ;;  %v705_v57 = vld [vmem:[%s6012_s4 + $0x9c8] sm:$0xff] }
 0x108   : > { %v872_v2 = vld [vmem:[%s6012_s4 + $0xf00] sm:$0xff]  ;;  %v4892_v8 = vcombine.high %v616_v0, %v624_v1  ;;  %3531 = vmatprep.subr.bf16.mxu1 %v5132_v63  ;;  %v4891_v17 = vcombine.low %v616_v0, %v624_v1  ;;  %v4974_v62 = vcombine.high %v697_v56, %v705_v57  ;;  %v457_v63 = vld [vmem:[%s6012_s4 + $0x208] sm:$0xff]  ;;  %v4973_v5 = vcombine.low %v697_v56, %v705_v57 }
 0x109   : > { %v880_v3 = vld [vmem:[%s6012_s4 + $0xf40] sm:$0xff]  ;;  %3532 = vmatpush1.bf16.msra.mxu1 %v5131_v7  ;;  %v465_v0 = vld [vmem:[%s6012_s4 + $0x248] sm:$0xff] }
 0x10a   : > { %v5148_v9 = vcombine.high %v872_v2, %v880_v3  ;;  %v632_v10 = vld [vmem:[%s6012_s4 + $0x780] sm:$0xff]  ;;  %3492 = vmatprep.subr.bf16.mxu0 %v4892_v8  ;;  %v5147_v20 = vcombine.low %v872_v2, %v880_v3  ;;  %v713_v1 = vld [vmem:[%s6012_s4 + $0xa08] sm:$0xff]  ;;  %v4717_v3 = vcombine.low %v441_v54, %v449_v55  ;;  %v4734_v7 = vcombine.high %v457_v63, %v465_v0 }
 0x10b   : > { %v640_v11 = vld [vmem:[%s6012_s4 + $0x7c0] sm:$0xff]  ;;  %3493 = vmatpush1.bf16.msra.mxu0 %v4891_v17  ;;  %v721_v2 = vld [vmem:[%s6012_s4 + $0xa48] sm:$0xff] }
 0x10c   : > { %v888_v14 = vld [vmem:[%s6012_s4 + $0xf80] sm:$0xff]  ;;  %v4908_v21 = vcombine.high %v632_v10, %v640_v11  ;;  %3533 = vmatprep.subr.bf16.mxu1 %v5148_v9  ;;  %v4907_v29 = vcombine.low %v632_v10, %v640_v11  ;;  %v4990_v8 = vcombine.high %v713_v1, %v721_v2  ;;  %v473_v9 = vld [vmem:[%s6012_s4 + $0x288] sm:$0xff] }
 0x10d   : > { %v896_v15 = vld [vmem:[%s6012_s4 + $0xfc0] sm:$0xff]  ;;  %3534 = vmatpush1.bf16.msra.mxu1 %v5147_v20  ;;  %v481_v10 = vld [vmem:[%s6012_s4 + $0x2c8] sm:$0xff] }
 0x10e   : > { %v342_v18 = vld [vmem:[%s6004_s25] sm:$0xff]  ;;  %v5164_v23 = vcombine.high %v888_v14, %v896_v15  ;;  %3494 = vmatprep.subr.bf16.mxu0 %v4908_v21  ;;  %v5163_v59 = vcombine.low %v888_v14, %v896_v15  ;;  %v729_v11 = vld [vmem:[%s6012_s4 + $0xa88] sm:$0xff]  ;;  %v4733_v15 = vcombine.low %v457_v63, %v465_v0  ;;  %v4750_v17 = vcombine.high %v473_v9, %v481_v10 }
 0x10f   : > { %v368_v26 = vsub.f32 %v342_v18, %v351_v16  ;;  %3495 = vmatpush1.bf16.msra.mxu0 %v4907_v29  ;;  %v737_v14 = vld [vmem:[%s6012_s4 + $0xac8] sm:$0xff]  ;;  %v4989_v16 = vcombine.low %v713_v1, %v721_v2 }
 0x110   : > { %3535 = vmatprep.subr.bf16.mxu1 %v5164_v23  ;;  %3546 = vmatprep.subr.bf16.mxu0 %v4670_v31  ;;  %v5006_v18 = vcombine.high %v729_v11, %v737_v14  ;;  %v497_v20 = vld [vmem:[%s6012_s4 + $0x348] sm:$0xff]  ;;  %v4749_v23 = vcombine.low %v473_v9, %v481_v10  ;;  %v5005_v24 = vcombine.low %v729_v11, %v737_v14 }
 0x111   : > { %v6137_v35 = vpack.c.bf16 %v368_v26, %v368_v26  ;;  %3536 = vmatpush1.bf16.msra.mxu1 %v5163_v59  ;;  %v745_v21 = vld [vmem:[%s6012_s4 + $0xb08] sm:$0xff]  ;;  %v4766_v25 = vcombine.high %v489_v19, %v497_v20  ;;  %v4765_v59 = vcombine.low %v489_v19, %v497_v20 }
 0x112   : > { %3587 = vmatprep.subr.bf16.mxu1 %v4926_v32  ;;  %v5022_v26 = vcombine.high %v745_v21, %v753_v22  ;;  %v505_v27 = vld [vmem:[%s6012_s4 + $0x388] sm:$0xff]  ;;  %v5021_v31 = vcombine.low %v745_v21, %v753_v22 }
 0x113   : > { %3497 = vmatmul.mubr.bf16.vlgmr.msra.gmra.mrb[0].mxu0 %v6137_v35  ;;  %v513_v28 = vld [vmem:[%s6012_s4 + $0x3c8] sm:$0xff] }
 0x114   : > { %3538 = vmatmul.mubr.bf16.vlgmr.msra.gmra.mrb[0].mxu1 %v6141_v38  ;;  %3547 = vmatpush1.bf16.msra.mxu0 %v4669_v39  ;;  %v761_v29 = vld [vmem:[%s6012_s4 + $0xb88] sm:$0xff]  ;;  %v4782_v32 = vcombine.high %v505_v27, %v513_v28 }
 0x115   : > { %3588 = vmatpush1.bf16.msra.mxu1 %v4925_v40  ;;  %3548 = vmatprep.subr.bf16.mxu0 %v4686_v41  ;;  %v769_v30 = vld [vmem:[%s6012_s4 + $0xbc8] sm:$0xff]  ;;  %v4781_v40 = vcombine.low %v505_v27, %v513_v28 }
 0x116   : > { %3589 = vmatprep.subr.bf16.mxu1 %v4942_v43  ;;  %3578 = vmatprep.mubr.bf16.mxu0 %v6083_v12  ;;  %v5038_v33 = vcombine.high %v761_v29, %v769_v30  ;;  %v521_v34 = vld [vmem:[%s6012_s4 + $0x408] sm:$0xff]  ;;  %v5037_v41 = vcombine.low %v761_v29, %v769_v30 }
 0x117   : > { %3619 = vmatprep.mubr.bf16.mxu1 %v6085_v13  ;;  %v529_v36 = vld [vmem:[%s6012_s4 + $0x448] sm:$0xff] }
 0x118   : > { %3549 = vmatpush1.bf16.msra.mxu0 %v4685_v48  ;;  %v777_v37 = vld [vmem:[%s6012_s4 + $0xc08] sm:$0xff]  ;;  %v4798_v43 = vcombine.high %v521_v34, %v529_v36 }
 0x119   : > { %3590 = vmatpush1.bf16.msra.mxu1 %v4941_v49  ;;  %3550 = vmatprep.subr.bf16.mxu0 %v4702_v50  ;;  %v785_v39 = vld [vmem:[%s6012_s4 + $0xc48] sm:$0xff]  ;;  %v4797_v49 = vcombine.low %v521_v34, %v529_v36 }
 0x11a   : > { %3591 = vmatprep.subr.bf16.mxu1 %v4958_v53  ;;  %v5054_v44 = vcombine.high %v777_v37, %v785_v39  ;;  %v537_v45 = vld [vmem:[%s6012_s4 + $0x488] sm:$0xff]  ;;  %v5053_v50 = vcombine.low %v777_v37, %v785_v39 }
 0x11b   : > { %v545_v46 = vld [vmem:[%s6012_s4 + $0x4c8] sm:$0xff] }
 0x11c   : > { %3551 = vmatpush1.bf16.msra.mxu0 %v4701_v58  ;;  %v793_v47 = vld [vmem:[%s6012_s4 + $0xc88] sm:$0xff]  ;;  %v4814_v53 = vcombine.high %v537_v45, %v545_v46 }
 0x11d   : > { %3592 = vmatpush1.bf16.msra.mxu1 %v4957_v60  ;;  %3552 = vmatprep.subr.bf16.mxu0 %v4718_v61  ;;  %v801_v48 = vld [vmem:[%s6012_s4 + $0xcc8] sm:$0xff]  ;;  %v4813_v60 = vcombine.low %v537_v45, %v545_v46  ;;  %v394_v46 = vld [vmem:[%s6012_s4 + $0x10] sm:$0xff] }
 0x11e   : > { %3593 = vmatprep.subr.bf16.mxu1 %v4974_v62  ;;  %v5070_v54 = vcombine.high %v793_v47, %v801_v48  ;;  %v553_v55 = vld [vmem:[%s6012_s4 + $0x508] sm:$0xff]  ;;  %v5069_v61 = vcombine.low %v793_v47, %v801_v48  ;;  %v402_v47 = vld [vmem:[%s6012_s4 + $0x50] sm:$0xff] }
 0x11f   : > { %v561_v56 = vld [vmem:[%s6012_s4 + $0x548] sm:$0xff]  ;;  %v650_v48 = vld [vmem:[%s6012_s4 + $0x810] sm:$0xff] }
 0x120   : > { %3553 = vmatpush1.bf16.msra.mxu0 %v4717_v3  ;;  %v809_v57 = vld [vmem:[%s6012_s4 + $0xd08] sm:$0xff]  ;;  %v4830_v62 = vcombine.high %v553_v55, %v561_v56 }
 0x121   : > { %3594 = vmatpush1.bf16.msra.mxu1 %v4973_v5  ;;  %3554 = vmatprep.subr.bf16.mxu0 %v4734_v7  ;;  %v817_v58 = vld [vmem:[%s6012_s4 + $0xd48] sm:$0xff]  ;;  %v4829_v5 = vcombine.low %v553_v55, %v561_v56  ;;  %v410_v56 = vld [vmem:[%s6012_s4 + $0x90] sm:$0xff] }
 0x122   : > { %3595 = vmatprep.subr.bf16.mxu1 %v4990_v8  ;;  %v5086_v63 = vcombine.high %v809_v57, %v817_v58  ;;  %v569_v0 = vld [vmem:[%s6012_s4 + $0x588] sm:$0xff]  ;;  %v5085_v7 = vcombine.low %v809_v57, %v817_v58  ;;  %v418_v57 = vld [vmem:[%s6012_s4 + $0xd0] sm:$0xff] }
 0x123   : > { %v577_v1 = vld [vmem:[%s6012_s4 + $0x5c8] sm:$0xff]  ;;  %v666_v58 = vld [vmem:[%s6012_s4 + $0x890] sm:$0xff] }
 0x124   : > { %3555 = vmatpush1.bf16.msra.mxu0 %v4733_v15  ;;  %v825_v2 = vld [vmem:[%s6012_s4 + $0xd88] sm:$0xff]  ;;  %v4846_v8 = vcombine.high %v569_v0, %v577_v1 }
 0x125   : > { %3596 = vmatpush1.bf16.msra.mxu1 %v4989_v16  ;;  %3556 = vmatprep.subr.bf16.mxu0 %v4750_v17  ;;  %v833_v3 = vld [vmem:[%s6012_s4 + $0xdc8] sm:$0xff]  ;;  %v4845_v16 = vcombine.low %v569_v0, %v577_v1  ;;  %v426_v1 = vld [vmem:[%s6012_s4 + $0x110] sm:$0xff] }
 0x126   : > { %3597 = vmatprep.subr.bf16.mxu1 %v5006_v18  ;;  %v5102_v9 = vcombine.high %v825_v2, %v833_v3  ;;  %v585_v10 = vld [vmem:[%s6012_s4 + $0x608] sm:$0xff]  ;;  %v5101_v17 = vcombine.low %v825_v2, %v833_v3  ;;  %v434_v2 = vld [vmem:[%s6012_s4 + $0x150] sm:$0xff] }
 0x127   : > { %v593_v11 = vld [vmem:[%s6012_s4 + $0x648] sm:$0xff]  ;;  %v682_v3 = vld [vmem:[%s6012_s4 + $0x910] sm:$0xff] }
 0x128   : > { %3557 = vmatpush1.bf16.msra.mxu0 %v4749_v23  ;;  %v841_v14 = vld [vmem:[%s6012_s4 + $0xe08] sm:$0xff]  ;;  %v4862_v18 = vcombine.high %v585_v10, %v593_v11 }
 0x129   : > { %3598 = vmatpush1.bf16.msra.mxu1 %v5005_v24  ;;  %3558 = vmatprep.subr.bf16.mxu0 %v4766_v25  ;;  %v849_v15 = vld [vmem:[%s6012_s4 + $0xe48] sm:$0xff]  ;;  %v4861_v24 = vcombine.low %v585_v10, %v593_v11  ;;  %v442_v11 = vld [vmem:[%s6012_s4 + $0x190] sm:$0xff] }
 0x12a   : > { %3599 = vmatprep.subr.bf16.mxu1 %v5022_v26  ;;  %v5118_v19 = vcombine.high %v841_v14, %v849_v15  ;;  %v601_v20 = vld [vmem:[%s6012_s4 + $0x688] sm:$0xff]  ;;  %v5117_v25 = vcombine.low %v841_v14, %v849_v15  ;;  %v450_v14 = vld [vmem:[%s6012_s4 + $0x1d0] sm:$0xff] }
 0x12b   : > { %v609_v21 = vld [vmem:[%s6012_s4 + $0x6c8] sm:$0xff]  ;;  %v698_v15 = vld [vmem:[%s6012_s4 + $0x990] sm:$0xff] }
 0x12c   : > { %3559 = vmatpush1.bf16.msra.mxu0 %v4765_v59  ;;  %v857_v22 = vld [vmem:[%s6012_s4 + $0xe88] sm:$0xff]  ;;  %v4878_v26 = vcombine.high %v601_v20, %v609_v21 }
 0x12d   : > { %3600 = vmatpush1.bf16.msra.mxu1 %v5021_v31  ;;  %3560 = vmatprep.subr.bf16.mxu0 %v4782_v32  ;;  %v865_v23 = vld [vmem:[%s6012_s4 + $0xec8] sm:$0xff]  ;;  %v4877_v31 = vcombine.low %v601_v20, %v609_v21  ;;  %v458_v21 = vld [vmem:[%s6012_s4 + $0x210] sm:$0xff] }
 0x12e   : > { %3601 = vmatprep.subr.bf16.mxu1 %v5038_v33  ;;  %v5134_v27 = vcombine.high %v857_v22, %v865_v23  ;;  %v617_v28 = vld [vmem:[%s6012_s4 + $0x708] sm:$0xff]  ;;  %v5133_v32 = vcombine.low %v857_v22, %v865_v23  ;;  %v466_v22 = vld [vmem:[%s6012_s4 + $0x250] sm:$0xff] }
 0x12f   : > { %v625_v29 = vld [vmem:[%s6012_s4 + $0x748] sm:$0xff]  ;;  %v714_v23 = vld [vmem:[%s6012_s4 + $0xa10] sm:$0xff] }
 0x130   : > { %3561 = vmatpush1.bf16.msra.mxu0 %v4781_v40  ;;  %v873_v30 = vld [vmem:[%s6012_s4 + $0xf08] sm:$0xff]  ;;  %v4894_v33 = vcombine.high %v617_v28, %v625_v29 }
 0x131   : > { %3602 = vmatpush1.bf16.msra.mxu1 %v5037_v41  ;;  %3562 = vmatprep.subr.bf16.mxu0 %v4798_v43  ;;  %v881_v59 = vld [vmem:[%s6012_s4 + $0xf48] sm:$0xff]  ;;  %v4893_v41 = vcombine.low %v617_v28, %v625_v29  ;;  %v474_v29 = vld [vmem:[%s6012_s4 + $0x290] sm:$0xff] }
 0x132   : > { %3603 = vmatprep.subr.bf16.mxu1 %v5054_v44  ;;  %v5150_v34 = vcombine.high %v873_v30, %v881_v59  ;;  %v633_v36 = vld [vmem:[%s6012_s4 + $0x788] sm:$0xff]  ;;  %v5149_v43 = vcombine.low %v873_v30, %v881_v59  ;;  %v482_v30 = vld [vmem:[%s6012_s4 + $0x2d0] sm:$0xff] }
 0x133   : > { %v641_v37 = vld [vmem:[%s6012_s4 + $0x7c8] sm:$0xff]  ;;  %v730_v59 = vld [vmem:[%s6012_s4 + $0xa90] sm:$0xff] }
 0x134   : > { %3563 = vmatpush1.bf16.msra.mxu0 %v4797_v49  ;;  %v889_v39 = vld [vmem:[%s6012_s4 + $0xf88] sm:$0xff]  ;;  %v4910_v44 = vcombine.high %v633_v36, %v641_v37  ;;  %v658_v49 = vld [vmem:[%s6012_s4 + $0x850] sm:$0xff] }
 0x135   : > { %3604 = vmatpush1.bf16.msra.mxu1 %v5053_v50  ;;  %3564 = vmatprep.subr.bf16.mxu0 %v4814_v53  ;;  %v897_v40 = vld [vmem:[%s6012_s4 + $0xfc8] sm:$0xff]  ;;  %v4909_v50 = vcombine.low %v633_v36, %v641_v37  ;;  %v4928_v55 = vcombine.high %v650_v48, %v658_v49  ;;  %v490_v37 = vld [vmem:[%s6012_s4 + $0x310] sm:$0xff] }
 0x136   : > { %3605 = vmatprep.subr.bf16.mxu1 %v5070_v54  ;;  %v5166_v45 = vcombine.high %v889_v39, %v897_v40  ;;  %v5165_v53 = vcombine.low %v889_v39, %v897_v40  ;;  %v4672_v54 = vcombine.high %v394_v46, %v402_v47  ;;  %v498_v39 = vld [vmem:[%s6012_s4 + $0x350] sm:$0xff] }
 0x137   : > { %v746_v40 = vld [vmem:[%s6012_s4 + $0xb10] sm:$0xff] }
 0x138   : > { %3565 = vmatpush1.bf16.msra.mxu0 %v4813_v60  ;;  %v674_v60 = vld [vmem:[%s6012_s4 + $0x8d0] sm:$0xff] }
 0x139   : > { %3606 = vmatpush1.bf16.msra.mxu1 %v5069_v61  ;;  %3566 = vmatprep.subr.bf16.mxu0 %v4830_v62  ;;  %v4671_v61 = vcombine.low %v394_v46, %v402_v47  ;;  %v4927_v62 = vcombine.low %v650_v48, %v658_v49  ;;  %v4944_v0 = vcombine.high %v666_v58, %v674_v60  ;;  %v506_v47 = vld [vmem:[%s6012_s4 + $0x390] sm:$0xff] }
 0x13a   : > { %3607 = vmatprep.subr.bf16.mxu1 %v5086_v63  ;;  %v4688_v63 = vcombine.high %v410_v56, %v418_v57  ;;  %v514_v48 = vld [vmem:[%s6012_s4 + $0x3d0] sm:$0xff] }
 0x13b   : > { %v762_v49 = vld [vmem:[%s6012_s4 + $0xb90] sm:$0xff] }
 0x13c   : > { %3567 = vmatpush1.bf16.msra.mxu0 %v4829_v5  ;;  %v690_v5 = vld [vmem:[%s6012_s4 + $0x950] sm:$0xff] }
 0x13d   : > { %3608 = vmatpush1.bf16.msra.mxu1 %v5085_v7  ;;  %3568 = vmatprep.subr.bf16.mxu0 %v4846_v8  ;;  %v4687_v7 = vcombine.low %v410_v56, %v418_v57  ;;  %v4943_v8 = vcombine.low %v666_v58, %v674_v60  ;;  %v4960_v10 = vcombine.high %v682_v3, %v690_v5  ;;  %v522_v57 = vld [vmem:[%s6012_s4 + $0x410] sm:$0xff] }
 0x13e   : > { %3609 = vmatprep.subr.bf16.mxu1 %v5102_v9  ;;  %v4704_v9 = vcombine.high %v426_v1, %v434_v2  ;;  %v530_v58 = vld [vmem:[%s6012_s4 + $0x450] sm:$0xff] }
 0x13f   : > { %v778_v60 = vld [vmem:[%s6012_s4 + $0xc10] sm:$0xff] }
 0x140   : > { %3569 = vmatpush1.bf16.msra.mxu0 %v4845_v16  ;;  %v706_v16 = vld [vmem:[%s6012_s4 + $0x9d0] sm:$0xff] }
 0x141   : > { %3610 = vmatpush1.bf16.msra.mxu1 %v5101_v17  ;;  %3570 = vmatprep.subr.bf16.mxu0 %v4862_v18  ;;  %v4703_v17 = vcombine.low %v426_v1, %v434_v2  ;;  %v4959_v18 = vcombine.low %v682_v3, %v690_v5  ;;  %v4976_v20 = vcombine.high %v698_v15, %v706_v16  ;;  %v538_v2 = vld [vmem:[%s6012_s4 + $0x490] sm:$0xff] }
 0x142   : > { %3611 = vmatprep.subr.bf16.mxu1 %v5118_v19  ;;  %v4720_v19 = vcombine.high %v442_v11, %v450_v14  ;;  %v546_v3 = vld [vmem:[%s6012_s4 + $0x4d0] sm:$0xff] }
 0x143   : > { %v794_v5 = vld [vmem:[%s6012_s4 + $0xc90] sm:$0xff] }
 0x144   : > { %3571 = vmatpush1.bf16.msra.mxu0 %v4861_v24  ;;  %v722_v24 = vld [vmem:[%s6012_s4 + $0xa50] sm:$0xff] }
 0x145   : > { %3612 = vmatpush1.bf16.msra.mxu1 %v5117_v25  ;;  %3572 = vmatprep.subr.bf16.mxu0 %v4878_v26  ;;  %v4719_v25 = vcombine.low %v442_v11, %v450_v14  ;;  %v4975_v26 = vcombine.low %v698_v15, %v706_v16  ;;  %v4992_v28 = vcombine.high %v714_v23, %v722_v24  ;;  %v554_v14 = vld [vmem:[%s6012_s4 + $0x510] sm:$0xff] }
 0x146   : > { %3613 = vmatprep.subr.bf16.mxu1 %v5134_v27  ;;  %v4736_v27 = vcombine.high %v458_v21, %v466_v22  ;;  %v562_v15 = vld [vmem:[%s6012_s4 + $0x550] sm:$0xff] }
 0x147   : > { %v810_v16 = vld [vmem:[%s6012_s4 + $0xd10] sm:$0xff] }
 0x148   : > { %3573 = vmatpush1.bf16.msra.mxu0 %v4877_v31  ;;  %v738_v31 = vld [vmem:[%s6012_s4 + $0xad0] sm:$0xff] }
 0x149   : > { %3614 = vmatpush1.bf16.msra.mxu1 %v5133_v32  ;;  %3574 = vmatprep.subr.bf16.mxu0 %v4894_v33  ;;  %v4735_v32 = vcombine.low %v458_v21, %v466_v22  ;;  %v4991_v33 = vcombine.low %v714_v23, %v722_v24  ;;  %v5008_v36 = vcombine.high %v730_v59, %v738_v31  ;;  %v570_v22 = vld [vmem:[%s6012_s4 + $0x590] sm:$0xff] }
 0x14a   : > { %3615 = vmatprep.subr.bf16.mxu1 %v5150_v34  ;;  %v4752_v34 = vcombine.high %v474_v29, %v482_v30  ;;  %v578_v23 = vld [vmem:[%s6012_s4 + $0x5d0] sm:$0xff] }
 0x14b   : > { %v826_v24 = vld [vmem:[%s6012_s4 + $0xd90] sm:$0xff] }
 0x14c   : > { %3575 = vmatpush1.bf16.msra.mxu0 %v4893_v41  ;;  %v754_v41 = vld [vmem:[%s6012_s4 + $0xb50] sm:$0xff] }
 0x14d   : > { %3616 = vmatpush1.bf16.msra.mxu1 %v5149_v43  ;;  %3576 = vmatprep.subr.bf16.mxu0 %v4910_v44  ;;  %v4751_v43 = vcombine.low %v474_v29, %v482_v30  ;;  %v5007_v44 = vcombine.low %v730_v59, %v738_v31  ;;  %v5024_v46 = vcombine.high %v746_v40, %v754_v41  ;;  %v586_v30 = vld [vmem:[%s6012_s4 + $0x610] sm:$0xff] }
 0x14e   : > { %3617 = vmatprep.subr.bf16.mxu1 %v5166_v45  ;;  %v4768_v45 = vcombine.high %v490_v37, %v498_v39  ;;  %v594_v59 = vld [vmem:[%s6012_s4 + $0x650] sm:$0xff] }
 0x14f   : > { %v842_v31 = vld [vmem:[%s6012_s4 + $0xe10] sm:$0xff] }
 0x150   : > { %3577 = vmatpush1.bf16.msra.mxu0 %v4909_v50  ;;  %v770_v50 = vld [vmem:[%s6012_s4 + $0xbd0] sm:$0xff] }
 0x151   : > { %3618 = vmatpush1.bf16.msra.mxu1 %v5165_v53  ;;  %3628 = vmatprep.subr.bf16.mxu0 %v4672_v54  ;;  %v4767_v53 = vcombine.low %v490_v37, %v498_v39  ;;  %v5023_v54 = vcombine.low %v746_v40, %v754_v41  ;;  %v5040_v56 = vcombine.high %v762_v49, %v770_v50  ;;  %v602_v39 = vld [vmem:[%s6012_s4 + $0x690] sm:$0xff] }
 0x152   : > { %3669 = vmatprep.subr.bf16.mxu1 %v4928_v55  ;;  %v4784_v55 = vcombine.high %v506_v47, %v514_v48  ;;  %v610_v40 = vld [vmem:[%s6012_s4 + $0x6d0] sm:$0xff] }
 0x153   : > { %3579 = vmatmul.mubr.bf16.vlgmr.msra.gmra.mrb[4].mxu0 %v6137_v35  ;;  %v858_v41 = vld [vmem:[%s6012_s4 + $0xe90] sm:$0xff] }
 0x154   : > { %3620 = vmatmul.mubr.bf16.vlgmr.msra.gmra.mrb[4].mxu1 %v6141_v38  ;;  %3629 = vmatpush1.bf16.msra.mxu0 %v4671_v61  ;;  %v786_v61 = vld [vmem:[%s6012_s4 + $0xc50] sm:$0xff] }
 0x155   : > { %3670 = vmatpush1.bf16.msra.mxu1 %v4927_v62  ;;  %3630 = vmatprep.subr.bf16.mxu0 %v4688_v63  ;;  %v4783_v62 = vcombine.low %v506_v47, %v514_v48  ;;  %v5039_v63 = vcombine.low %v762_v49, %v770_v50  ;;  %v5056_v1 = vcombine.high %v778_v60, %v786_v61  ;;  %v618_v48 = vld [vmem:[%s6012_s4 + $0x710] sm:$0xff] }
 0x156   : > { %3671 = vmatprep.subr.bf16.mxu1 %v4944_v0  ;;  %3660 = vmatprep.mubr.bf16.mxu0 %v6083_v12  ;;  %v4800_v0 = vcombine.high %v522_v57, %v530_v58  ;;  %v626_v49 = vld [vmem:[%s6012_s4 + $0x750] sm:$0xff] }
 0x157   : > { %3701 = vmatprep.mubr.bf16.mxu1 %v6085_v13  ;;  %v874_v50 = vld [vmem:[%s6012_s4 + $0xf10] sm:$0xff] }
 0x158   : > { %3631 = vmatpush1.bf16.msra.mxu0 %v4687_v7  ;;  %v802_v7 = vld [vmem:[%s6012_s4 + $0xcd0] sm:$0xff] }
 0x159   : > { %3672 = vmatpush1.bf16.msra.mxu1 %v4943_v8  ;;  %3632 = vmatprep.subr.bf16.mxu0 %v4704_v9  ;;  %v4799_v8 = vcombine.low %v522_v57, %v530_v58  ;;  %v5055_v9 = vcombine.low %v778_v60, %v786_v61  ;;  %v5072_v11 = vcombine.high %v794_v5, %v802_v7  ;;  %v634_v58 = vld [vmem:[%s6012_s4 + $0x790] sm:$0xff] }
 0x15a   : > { %3673 = vmatprep.subr.bf16.mxu1 %v4960_v10  ;;  %v4816_v10 = vcombine.high %v538_v2, %v546_v3  ;;  %v642_v60 = vld [vmem:[%s6012_s4 + $0x7d0] sm:$0xff] }
 0x15b   : > { %v890_v61 = vld [vmem:[%s6012_s4 + $0xf90] sm:$0xff] }
 0x15c   : > { %3633 = vmatpush1.bf16.msra.mxu0 %v4703_v17  ;;  %v818_v17 = vld [vmem:[%s6012_s4 + $0xd50] sm:$0xff] }
 0x15d   : > { %3674 = vmatpush1.bf16.msra.mxu1 %v4959_v18  ;;  %3634 = vmatprep.subr.bf16.mxu0 %v4720_v19  ;;  %v4815_v18 = vcombine.low %v538_v2, %v546_v3  ;;  %v5071_v19 = vcombine.low %v794_v5, %v802_v7  ;;  %v5088_v21 = vcombine.high %v810_v16, %v818_v17  ;;  %v395_v3 = vld [vmem:[%s6012_s4 + $0x18] sm:$0xff] }
 0x15e   : > { %3675 = vmatprep.subr.bf16.mxu1 %v4976_v20  ;;  %v4832_v20 = vcombine.high %v554_v14, %v562_v15  ;;  %v403_v5 = vld [vmem:[%s6012_s4 + $0x58] sm:$0xff] }
 0x15f   : > { %v651_v7 = vld [vmem:[%s6012_s4 + $0x818] sm:$0xff] }
 0x160   : > { %3635 = vmatpush1.bf16.msra.mxu0 %v4719_v25  ;;  %v834_v25 = vld [vmem:[%s6012_s4 + $0xdd0] sm:$0xff] }
 0x161   : > { %3676 = vmatpush1.bf16.msra.mxu1 %v4975_v26  ;;  %3636 = vmatprep.subr.bf16.mxu0 %v4736_v27  ;;  %v4831_v26 = vcombine.low %v554_v14, %v562_v15  ;;  %v5087_v27 = vcombine.low %v810_v16, %v818_v17  ;;  %v5104_v29 = vcombine.high %v826_v24, %v834_v25  ;;  %v411_v15 = vld [vmem:[%s6012_s4 + $0x98] sm:$0xff] }
 0x162   : > { %3677 = vmatprep.subr.bf16.mxu1 %v4992_v28  ;;  %v4848_v28 = vcombine.high %v570_v22, %v578_v23  ;;  %v419_v16 = vld [vmem:[%s6012_s4 + $0xd8] sm:$0xff] }
 0x163   : > { %v667_v17 = vld [vmem:[%s6012_s4 + $0x898] sm:$0xff] }
 0x164   : > { %3637 = vmatpush1.bf16.msra.mxu0 %v4735_v32  ;;  %v850_v32 = vld [vmem:[%s6012_s4 + $0xe50] sm:$0xff] }
 0x165   : > { %3678 = vmatpush1.bf16.msra.mxu1 %v4991_v33  ;;  %3638 = vmatprep.subr.bf16.mxu0 %v4752_v34  ;;  %v4847_v33 = vcombine.low %v570_v22, %v578_v23  ;;  %v5103_v34 = vcombine.low %v826_v24, %v834_v25  ;;  %v5120_v37 = vcombine.high %v842_v31, %v850_v32  ;;  %v427_v23 = vld [vmem:[%s6012_s4 + $0x118] sm:$0xff] }
 0x166   : > { %3679 = vmatprep.subr.bf16.mxu1 %v5008_v36  ;;  %v4864_v36 = vcombine.high %v586_v30, %v594_v59  ;;  %v435_v24 = vld [vmem:[%s6012_s4 + $0x158] sm:$0xff] }
 0x167   : > { %v683_v25 = vld [vmem:[%s6012_s4 + $0x918] sm:$0xff] }
 0x168   : > { %3639 = vmatpush1.bf16.msra.mxu0 %v4751_v43  ;;  %v866_v43 = vld [vmem:[%s6012_s4 + $0xed0] sm:$0xff] }
 0x169   : > { %3680 = vmatpush1.bf16.msra.mxu1 %v5007_v44  ;;  %3640 = vmatprep.subr.bf16.mxu0 %v4768_v45  ;;  %v4863_v44 = vcombine.low %v586_v30, %v594_v59  ;;  %v5119_v45 = vcombine.low %v842_v31, %v850_v32  ;;  %v5136_v47 = vcombine.high %v858_v41, %v866_v43  ;;  %v443_v59 = vld [vmem:[%s6012_s4 + $0x198] sm:$0xff] }
 0x16a   : > { %3681 = vmatprep.subr.bf16.mxu1 %v5024_v46  ;;  %v4880_v46 = vcombine.high %v602_v39, %v610_v40  ;;  %v451_v31 = vld [vmem:[%s6012_s4 + $0x1d8] sm:$0xff] }
 0x16b   : > { %v699_v32 = vld [vmem:[%s6012_s4 + $0x998] sm:$0xff] }
 0x16c   : > { %3641 = vmatpush1.bf16.msra.mxu0 %v4767_v53  ;;  %v882_v53 = vld [vmem:[%s6012_s4 + $0xf50] sm:$0xff] }
 0x16d   : > { %3682 = vmatpush1.bf16.msra.mxu1 %v5023_v54  ;;  %3642 = vmatprep.subr.bf16.mxu0 %v4784_v55  ;;  %v4879_v54 = vcombine.low %v602_v39, %v610_v40  ;;  %v5135_v55 = vcombine.low %v858_v41, %v866_v43  ;;  %v5152_v57 = vcombine.high %v874_v50, %v882_v53  ;;  %v459_v40 = vld [vmem:[%s6012_s4 + $0x218] sm:$0xff] }
 0x16e   : > { %3683 = vmatprep.subr.bf16.mxu1 %v5040_v56  ;;  %v4896_v56 = vcombine.high %v618_v48, %v626_v49  ;;  %v467_v41 = vld [vmem:[%s6012_s4 + $0x258] sm:$0xff] }
 0x16f   : > { %v715_v43 = vld [vmem:[%s6012_s4 + $0xa18] sm:$0xff] }
 0x170   : > { %3643 = vmatpush1.bf16.msra.mxu0 %v4783_v62  ;;  %v898_v62 = vld [vmem:[%s6012_s4 + $0xfd0] sm:$0xff] }
 0x171   : > { %3684 = vmatpush1.bf16.msra.mxu1 %v5039_v63  ;;  %3644 = vmatprep.subr.bf16.mxu0 %v4800_v0  ;;  %v4895_v63 = vcombine.low %v618_v48, %v626_v49  ;;  %v5151_v0 = vcombine.low %v874_v50, %v882_v53  ;;  %v5168_v2 = vcombine.high %v890_v61, %v898_v62  ;;  %v475_v49 = vld [vmem:[%s6012_s4 + $0x298] sm:$0xff] }
 0x172   : > { %3685 = vmatprep.subr.bf16.mxu1 %v5056_v1  ;;  %v4912_v1 = vcombine.high %v634_v58, %v642_v60  ;;  %v483_v50 = vld [vmem:[%s6012_s4 + $0x2d8] sm:$0xff] }
 0x173   : > { %v731_v53 = vld [vmem:[%s6012_s4 + $0xa98] sm:$0xff] }
 0x174   : > { %3645 = vmatpush1.bf16.msra.mxu0 %v4799_v8  ;;  %v659_v8 = vld [vmem:[%s6012_s4 + $0x858] sm:$0xff] }
 0x175   : > { %3686 = vmatpush1.bf16.msra.mxu1 %v5055_v9  ;;  %3646 = vmatprep.subr.bf16.mxu0 %v4816_v10  ;;  %v4911_v9 = vcombine.low %v634_v58, %v642_v60  ;;  %v5167_v10 = vcombine.low %v890_v61, %v898_v62  ;;  %v4930_v14 = vcombine.high %v651_v7, %v659_v8  ;;  %v491_v60 = vld [vmem:[%s6012_s4 + $0x318] sm:$0xff] }
 0x176   : > { %3687 = vmatprep.subr.bf16.mxu1 %v5072_v11  ;;  %v4674_v11 = vcombine.high %v395_v3, %v403_v5  ;;  %v499_v61 = vld [vmem:[%s6012_s4 + $0x358] sm:$0xff] }
 0x177   : > { %v747_v62 = vld [vmem:[%s6012_s4 + $0xb18] sm:$0xff] }
 0x178   : > { %3647 = vmatpush1.bf16.msra.mxu0 %v4815_v18  ;;  %v675_v18 = vld [vmem:[%s6012_s4 + $0x8d8] sm:$0xff] }
 0x179   : > { %3688 = vmatpush1.bf16.msra.mxu1 %v5071_v19  ;;  %3648 = vmatprep.subr.bf16.mxu0 %v4832_v20  ;;  %v4673_v19 = vcombine.low %v395_v3, %v403_v5  ;;  %v4929_v20 = vcombine.low %v651_v7, %v659_v8  ;;  %v4946_v22 = vcombine.high %v667_v17, %v675_v18  ;;  %v507_v5 = vld [vmem:[%s6012_s4 + $0x398] sm:$0xff] }
 0x17a   : > { %3689 = vmatprep.subr.bf16.mxu1 %v5088_v21  ;;  %v4690_v21 = vcombine.high %v411_v15, %v419_v16  ;;  %v515_v7 = vld [vmem:[%s6012_s4 + $0x3d8] sm:$0xff] }
 0x17b   : > { %v763_v8 = vld [vmem:[%s6012_s4 + $0xb98] sm:$0xff] }
 0x17c   : > { %3649 = vmatpush1.bf16.msra.mxu0 %v4831_v26  ;;  %v691_v26 = vld [vmem:[%s6012_s4 + $0x958] sm:$0xff] }
 0x17d   : > { %3690 = vmatpush1.bf16.msra.mxu1 %v5087_v27  ;;  %3650 = vmatprep.subr.bf16.mxu0 %v4848_v28  ;;  %v4689_v27 = vcombine.low %v411_v15, %v419_v16  ;;  %v4945_v28 = vcombine.low %v667_v17, %v675_v18  ;;  %v4962_v30 = vcombine.high %v683_v25, %v691_v26  ;;  %v523_v16 = vld [vmem:[%s6012_s4 + $0x418] sm:$0xff] }
 0x17e   : > { %3691 = vmatprep.subr.bf16.mxu1 %v5104_v29  ;;  %v4706_v29 = vcombine.high %v427_v23, %v435_v24  ;;  %v531_v17 = vld [vmem:[%s6012_s4 + $0x458] sm:$0xff] }
 0x17f   : > { %v779_v18 = vld [vmem:[%s6012_s4 + $0xc18] sm:$0xff] }
 0x180   : > { %3651 = vmatpush1.bf16.msra.mxu0 %v4847_v33  ;;  %v707_v33 = vld [vmem:[%s6012_s4 + $0x9d8] sm:$0xff] }
 0x181   : > { %3692 = vmatpush1.bf16.msra.mxu1 %v5103_v34  ;;  %3652 = vmatprep.subr.bf16.mxu0 %v4864_v36  ;;  %v4705_v34 = vcombine.low %v427_v23, %v435_v24  ;;  %v4961_v36 = vcombine.low %v683_v25, %v691_v26  ;;  %v4978_v39 = vcombine.high %v699_v32, %v707_v33  ;;  %v539_v24 = vld [vmem:[%s6012_s4 + $0x498] sm:$0xff] }
 0x182   : > { %3693 = vmatprep.subr.bf16.mxu1 %v5120_v37  ;;  %v4722_v37 = vcombine.high %v443_v59, %v451_v31  ;;  %v547_v25 = vld [vmem:[%s6012_s4 + $0x4d8] sm:$0xff] }
 0x183   : > { %v795_v26 = vld [vmem:[%s6012_s4 + $0xc98] sm:$0xff] }
 0x184   : > { %3653 = vmatpush1.bf16.msra.mxu0 %v4863_v44  ;;  %v723_v44 = vld [vmem:[%s6012_s4 + $0xa58] sm:$0xff] }
 0x185   : > { %3694 = vmatpush1.bf16.msra.mxu1 %v5119_v45  ;;  %3654 = vmatprep.subr.bf16.mxu0 %v4880_v46  ;;  %v4721_v45 = vcombine.low %v443_v59, %v451_v31  ;;  %v4977_v46 = vcombine.low %v699_v32, %v707_v33  ;;  %v4994_v48 = vcombine.high %v715_v43, %v723_v44  ;;  %v555_v31 = vld [vmem:[%s6012_s4 + $0x518] sm:$0xff] }
 0x186   : > { %3695 = vmatprep.subr.bf16.mxu1 %v5136_v47  ;;  %v4738_v47 = vcombine.high %v459_v40, %v467_v41  ;;  %v563_v32 = vld [vmem:[%s6012_s4 + $0x558] sm:$0xff] }
 0x187   : > { %v811_v33 = vld [vmem:[%s6012_s4 + $0xd18] sm:$0xff] }
 0x188   : > { %3655 = vmatpush1.bf16.msra.mxu0 %v4879_v54  ;;  %v739_v54 = vld [vmem:[%s6012_s4 + $0xad8] sm:$0xff] }
 0x189   : > { %3696 = vmatpush1.bf16.msra.mxu1 %v5135_v55  ;;  %3656 = vmatprep.subr.bf16.mxu0 %v4896_v56  ;;  %v4737_v55 = vcombine.low %v459_v40, %v467_v41  ;;  %v4993_v56 = vcombine.low %v715_v43, %v723_v44  ;;  %v5010_v58 = vcombine.high %v731_v53, %v739_v54  ;;  %v571_v41 = vld [vmem:[%s6012_s4 + $0x598] sm:$0xff] }
 0x18a   : > { %3697 = vmatprep.subr.bf16.mxu1 %v5152_v57  ;;  %v4754_v57 = vcombine.high %v475_v49, %v483_v50  ;;  %v579_v43 = vld [vmem:[%s6012_s4 + $0x5d8] sm:$0xff] }
 0x18b   : > { %v827_v44 = vld [vmem:[%s6012_s4 + $0xd98] sm:$0xff] }
 0x18c   : > { %3657 = vmatpush1.bf16.msra.mxu0 %v4895_v63  ;;  %v755_v63 = vld [vmem:[%s6012_s4 + $0xb58] sm:$0xff] }
 0x18d   : > { %3698 = vmatpush1.bf16.msra.mxu1 %v5151_v0  ;;  %3658 = vmatprep.subr.bf16.mxu0 %v4912_v1  ;;  %v4753_v0 = vcombine.low %v475_v49, %v483_v50  ;;  %v5009_v1 = vcombine.low %v731_v53, %v739_v54  ;;  %v5026_v3 = vcombine.high %v747_v62, %v755_v63  ;;  %v587_v50 = vld [vmem:[%s6012_s4 + $0x618] sm:$0xff] }
 0x18e   : > { %3699 = vmatprep.subr.bf16.mxu1 %v5168_v2  ;;  %v4770_v2 = vcombine.high %v491_v60, %v499_v61  ;;  %v595_v53 = vld [vmem:[%s6012_s4 + $0x658] sm:$0xff] }
 0x18f   : > { %v843_v54 = vld [vmem:[%s6012_s4 + $0xe18] sm:$0xff] }
 0x190   : > { %3659 = vmatpush1.bf16.msra.mxu0 %v4911_v9  ;;  %v771_v9 = vld [vmem:[%s6012_s4 + $0xbd8] sm:$0xff] }
 0x191   : > { %3700 = vmatpush1.bf16.msra.mxu1 %v5167_v10  ;;  %3710 = vmatprep.subr.bf16.mxu0 %v4674_v11  ;;  %v4769_v10 = vcombine.low %v491_v60, %v499_v61  ;;  %v5025_v11 = vcombine.low %v747_v62, %v755_v63  ;;  %v5042_v15 = vcombine.high %v763_v8, %v771_v9  ;;  %v603_v61 = vld [vmem:[%s6012_s4 + $0x698] sm:$0xff] }
 0x192   : > { %3751 = vmatprep.subr.bf16.mxu1 %v4930_v14  ;;  %v4786_v14 = vcombine.high %v507_v5, %v515_v7  ;;  %v611_v62 = vld [vmem:[%s6012_s4 + $0x6d8] sm:$0xff] }
 0x193   : > { %3661 = vmatmul.mubr.bf16.vlgmr.msra.gmra.mrb[8].mxu0 %v6137_v35  ;;  %v859_v63 = vld [vmem:[%s6012_s4 + $0xe98] sm:$0xff] }
 0x194   : > { %3702 = vmatmul.mubr.bf16.vlgmr.msra.gmra.mrb[8].mxu1 %v6141_v38  ;;  %3711 = vmatpush1.bf16.msra.mxu0 %v4673_v19  ;;  %v787_v19 = vld [vmem:[%s6012_s4 + $0xc58] sm:$0xff] }
 0x195   : > { %3752 = vmatpush1.bf16.msra.mxu1 %v4929_v20  ;;  %3712 = vmatprep.subr.bf16.mxu0 %v4690_v21  ;;  %v4785_v20 = vcombine.low %v507_v5, %v515_v7  ;;  %v5041_v21 = vcombine.low %v763_v8, %v771_v9  ;;  %v5058_v23 = vcombine.high %v779_v18, %v787_v19  ;;  %v619_v7 = vld [vmem:[%s6012_s4 + $0x718] sm:$0xff] }
 0x196   : > { %3753 = vmatprep.subr.bf16.mxu1 %v4946_v22  ;;  %3742 = vmatprep.mubr.bf16.mxu0 %v6083_v12  ;;  %v4802_v22 = vcombine.high %v523_v16, %v531_v17  ;;  %v627_v8 = vld [vmem:[%s6012_s4 + $0x758] sm:$0xff] }
 0x197   : > { %3783 = vmatprep.mubr.bf16.mxu1 %v6085_v13  ;;  %v875_v9 = vld [vmem:[%s6012_s4 + $0xf18] sm:$0xff] }
 0x198   : > { %3713 = vmatpush1.bf16.msra.mxu0 %v4689_v27  ;;  %v803_v27 = vld [vmem:[%s6012_s4 + $0xcd8] sm:$0xff] }
 0x199   : > { %3754 = vmatpush1.bf16.msra.mxu1 %v4945_v28  ;;  %3714 = vmatprep.subr.bf16.mxu0 %v4706_v29  ;;  %v4801_v28 = vcombine.low %v523_v16, %v531_v17  ;;  %v5057_v29 = vcombine.low %v779_v18, %v787_v19  ;;  %v5074_v59 = vcombine.high %v795_v26, %v803_v27  ;;  %v635_v17 = vld [vmem:[%s6012_s4 + $0x798] sm:$0xff] }
 0x19a   : > { %3755 = vmatprep.subr.bf16.mxu1 %v4962_v30  ;;  %v4818_v30 = vcombine.high %v539_v24, %v547_v25  ;;  %v643_v18 = vld [vmem:[%s6012_s4 + $0x7d8] sm:$0xff] }
 0x19b   : > { %v891_v19 = vld [vmem:[%s6012_s4 + $0xf98] sm:$0xff] }
 0x19c   : > { %3715 = vmatpush1.bf16.msra.mxu0 %v4705_v34  ;;  %v819_v34 = vld [vmem:[%s6012_s4 + $0xd58] sm:$0xff] }
 0x19d   : > { %3756 = vmatpush1.bf16.msra.mxu1 %v4961_v36  ;;  %3716 = vmatprep.subr.bf16.mxu0 %v4722_v37  ;;  %v4817_v36 = vcombine.low %v539_v24, %v547_v25  ;;  %v5073_v37 = vcombine.low %v795_v26, %v803_v27  ;;  %v5090_v40 = vcombine.high %v811_v33, %v819_v34  ;;  %v396_v25 = vld [vmem:[%s6012_s4 + $0x20] sm:$0xff] }
 0x19e   : > { %3757 = vmatprep.subr.bf16.mxu1 %v4978_v39  ;;  %v4834_v39 = vcombine.high %v555_v31, %v563_v32  ;;  %v404_v26 = vld [vmem:[%s6012_s4 + $0x60] sm:$0xff] }
 0x19f   : > { %v652_v27 = vld [vmem:[%s6012_s4 + $0x820] sm:$0xff] }
 0x1a0   : > { %3717 = vmatpush1.bf16.msra.mxu0 %v4721_v45  ;;  %v835_v45 = vld [vmem:[%s6012_s4 + $0xdd8] sm:$0xff] }
 0x1a1   : > { %3758 = vmatpush1.bf16.msra.mxu1 %v4977_v46  ;;  %3718 = vmatprep.subr.bf16.mxu0 %v4738_v47  ;;  %v4833_v46 = vcombine.low %v555_v31, %v563_v32  ;;  %v5089_v47 = vcombine.low %v811_v33, %v819_v34  ;;  %v5106_v49 = vcombine.high %v827_v44, %v835_v45  ;;  %v412_v32 = vld [vmem:[%s6012_s4 + $0xa0] sm:$0xff] }
 0x1a2   : > { %3759 = vmatprep.subr.bf16.mxu1 %v4994_v48  ;;  %v4850_v48 = vcombine.high %v571_v41, %v579_v43  ;;  %v420_v33 = vld [vmem:[%s6012_s4 + $0xe0] sm:$0xff] }
 0x1a3   : > { %v668_v34 = vld [vmem:[%s6012_s4 + $0x8a0] sm:$0xff] }
 0x1a4   : > { %3719 = vmatpush1.bf16.msra.mxu0 %v4737_v55  ;;  %v851_v55 = vld [vmem:[%s6012_s4 + $0xe58] sm:$0xff] }
 0x1a5   : > { %3760 = vmatpush1.bf16.msra.mxu1 %v4993_v56  ;;  %3720 = vmatprep.subr.bf16.mxu0 %v4754_v57  ;;  %v4849_v56 = vcombine.low %v571_v41, %v579_v43  ;;  %v5105_v57 = vcombine.low %v827_v44, %v835_v45  ;;  %v5122_v60 = vcombine.high %v843_v54, %v851_v55  ;;  %v428_v43 = vld [vmem:[%s6012_s4 + $0x120] sm:$0xff] }
 0x1a6   : > { %3761 = vmatprep.subr.bf16.mxu1 %v5010_v58  ;;  %v4866_v58 = vcombine.high %v587_v50, %v595_v53  ;;  %v436_v44 = vld [vmem:[%s6012_s4 + $0x160] sm:$0xff] }
 0x1a7   : > { %v684_v45 = vld [vmem:[%s6012_s4 + $0x920] sm:$0xff] }
 0x1a8   : > { %3721 = vmatpush1.bf16.msra.mxu0 %v4753_v0  ;;  %v867_v0 = vld [vmem:[%s6012_s4 + $0xed8] sm:$0xff] }
 0x1a9   : > { %3762 = vmatpush1.bf16.msra.mxu1 %v5009_v1  ;;  %3722 = vmatprep.subr.bf16.mxu0 %v4770_v2  ;;  %v4865_v1 = vcombine.low %v587_v50, %v595_v53  ;;  %v5121_v2 = vcombine.low %v843_v54, %v851_v55  ;;  %v5138_v5 = vcombine.high %v859_v63, %v867_v0  ;;  %v444_v53 = vld [vmem:[%s6012_s4 + $0x1a0] sm:$0xff] }
 0x1aa   : > { %3763 = vmatprep.subr.bf16.mxu1 %v5026_v3  ;;  %v4882_v3 = vcombine.high %v603_v61, %v611_v62  ;;  %v452_v54 = vld [vmem:[%s6012_s4 + $0x1e0] sm:$0xff] }
 0x1ab   : > { %v700_v55 = vld [vmem:[%s6012_s4 + $0x9a0] sm:$0xff] }
 0x1ac   : > { %3723 = vmatpush1.bf16.msra.mxu0 %v4769_v10  ;;  %v883_v10 = vld [vmem:[%s6012_s4 + $0xf58] sm:$0xff] }
 0x1ad   : > { %3764 = vmatpush1.bf16.msra.mxu1 %v5025_v11  ;;  %3724 = vmatprep.subr.bf16.mxu0 %v4786_v14  ;;  %v4881_v11 = vcombine.low %v603_v61, %v611_v62  ;;  %v5137_v14 = vcombine.low %v859_v63, %v867_v0  ;;  %v5154_v16 = vcombine.high %v875_v9, %v883_v10  ;;  %v460_v62 = vld [vmem:[%s6012_s4 + $0x220] sm:$0xff] }
 0x1ae   : > { %3765 = vmatprep.subr.bf16.mxu1 %v5042_v15  ;;  %v4898_v15 = vcombine.high %v619_v7, %v627_v8  ;;  %v468_v63 = vld [vmem:[%s6012_s4 + $0x260] sm:$0xff] }
 0x1af   : > { %v716_v0 = vld [vmem:[%s6012_s4 + $0xa20] sm:$0xff] }
 0x1b0   : > { %3725 = vmatpush1.bf16.msra.mxu0 %v4785_v20  ;;  %v899_v20 = vld [vmem:[%s6012_s4 + $0xfd8] sm:$0xff] }
 0x1b1   : > { %3766 = vmatpush1.bf16.msra.mxu1 %v5041_v21  ;;  %3726 = vmatprep.subr.bf16.mxu0 %v4802_v22  ;;  %v4897_v21 = vcombine.low %v619_v7, %v627_v8  ;;  %v5153_v22 = vcombine.low %v875_v9, %v883_v10  ;;  %v5170_v24 = vcombine.high %v891_v19, %v899_v20  ;;  %v476_v8 = vld [vmem:[%s6012_s4 + $0x2a0] sm:$0xff] }
 0x1b2   : > { %3767 = vmatprep.subr.bf16.mxu1 %v5058_v23  ;;  %v4914_v23 = vcombine.high %v635_v17, %v643_v18  ;;  %v484_v9 = vld [vmem:[%s6012_s4 + $0x2e0] sm:$0xff] }
 0x1b3   : > { %v732_v10 = vld [vmem:[%s6012_s4 + $0xaa0] sm:$0xff] }
 0x1b4   : > { %3727 = vmatpush1.bf16.msra.mxu0 %v4801_v28  ;;  %v660_v28 = vld [vmem:[%s6012_s4 + $0x860] sm:$0xff] }
 0x1b5   : > { %3768 = vmatpush1.bf16.msra.mxu1 %v5057_v29  ;;  %3728 = vmatprep.subr.bf16.mxu0 %v4818_v30  ;;  %v4913_v29 = vcombine.low %v635_v17, %v643_v18  ;;  %v5169_v30 = vcombine.low %v891_v19, %v899_v20  ;;  %v4932_v31 = vcombine.high %v652_v27, %v660_v28  ;;  %v492_v18 = vld [vmem:[%s6012_s4 + $0x320] sm:$0xff] }
 0x1b6   : > { %3769 = vmatprep.subr.bf16.mxu1 %v5074_v59  ;;  %v4676_v59 = vcombine.high %v396_v25, %v404_v26  ;;  %v500_v19 = vld [vmem:[%s6012_s4 + $0x360] sm:$0xff] }
 0x1b7   : > { %v748_v20 = vld [vmem:[%s6012_s4 + $0xb20] sm:$0xff] }
 0x1b8   : > { %3729 = vmatpush1.bf16.msra.mxu0 %v4817_v36  ;;  %v676_v36 = vld [vmem:[%s6012_s4 + $0x8e0] sm:$0xff] }
 0x1b9   : > { %3770 = vmatpush1.bf16.msra.mxu1 %v5073_v37  ;;  %3730 = vmatprep.subr.bf16.mxu0 %v4834_v39  ;;  %v4675_v37 = vcombine.low %v396_v25, %v404_v26  ;;  %v4931_v39 = vcombine.low %v652_v27, %v660_v28  ;;  %v4948_v41 = vcombine.high %v668_v34, %v676_v36  ;;  %v508_v27 = vld [vmem:[%s6012_s4 + $0x3a0] sm:$0xff] }
 0x1ba   : > { %3771 = vmatprep.subr.bf16.mxu1 %v5090_v40  ;;  %v4692_v40 = vcombine.high %v412_v32, %v420_v33  ;;  %v516_v28 = vld [vmem:[%s6012_s4 + $0x3e0] sm:$0xff] }
 0x1bc   : > { %3731 = vmatpush1.bf16.msra.mxu0 %v4833_v46  ;;  %v692_v46 = vld [vmem:[%s6012_s4 + $0x960] sm:$0xff] }
 0x1bd   : > { %3772 = vmatpush1.bf16.msra.mxu1 %v5089_v47  ;;  %3732 = vmatprep.subr.bf16.mxu0 %v4850_v48  ;;  %v4691_v47 = vcombine.low %v412_v32, %v420_v33  ;;  %v4947_v48 = vcombine.low %v668_v34, %v676_v36  ;;  %v4964_v50 = vcombine.high %v684_v45, %v692_v46  ;;  %v772_v32 = vld [vmem:[%s6012_s4 + $0xbe0] sm:$0xff]  ;;  %v377_v34 = vld [vmem:[#allocation2 + $0x8] sm:$0xff] }
 0x1be   : > { %3773 = vmatprep.subr.bf16.mxu1 %v5106_v49  ;;  %v4708_v49 = vcombine.high %v428_v43, %v436_v44 }
 0x1c0   : > { %3733 = vmatpush1.bf16.msra.mxu0 %v4849_v56  ;;  %v708_v56 = vld [vmem:[%s6012_s4 + $0x9e0] sm:$0xff] }
 0x1c1   : > { %3774 = vmatpush1.bf16.msra.mxu1 %v5105_v57  ;;  %3734 = vmatprep.subr.bf16.mxu0 %v4866_v58  ;;  %v4707_v57 = vcombine.low %v428_v43, %v436_v44  ;;  %v4963_v58 = vcombine.low %v684_v45, %v692_v46  ;;  %v4980_v61 = vcombine.high %v700_v55, %v708_v56 }
 0x1c2   : > { %3775 = vmatprep.subr.bf16.mxu1 %v5122_v60  ;;  %v4724_v60 = vcombine.high %v444_v53, %v452_v54  ;;  %v4788_v45 = vcombine.high %v508_v27, %v516_v28 }
 0x1c4   : > { %3735 = vmatpush1.bf16.msra.mxu0 %v4865_v1  ;;  %v724_v1 = vld [vmem:[%s6012_s4 + $0xa60] sm:$0xff] }
 0x1c5   : > { %3776 = vmatpush1.bf16.msra.mxu1 %v5121_v2  ;;  %3736 = vmatprep.subr.bf16.mxu0 %v4882_v3  ;;  %v4723_v2 = vcombine.low %v444_v53, %v452_v54  ;;  %v4979_v3 = vcombine.low %v700_v55, %v708_v56  ;;  %v4996_v7 = vcombine.high %v716_v0, %v724_v1  ;;  %v780_v54 = vld [vmem:[%s6012_s4 + $0xc20] sm:$0xff] }
 0x1c6   : > { %3777 = vmatprep.subr.bf16.mxu1 %v5138_v5  ;;  %v4740_v5 = vcombine.high %v460_v62, %v468_v63  ;;  %v788_v55 = vld [vmem:[%s6012_s4 + $0xc60] sm:$0xff]  ;;  %v4787_v56 = vcombine.low %v508_v27, %v516_v28 }
 0x1c7   : > { %v844_v27 = vld [vmem:[%s6012_s4 + $0xe20] sm:$0xff] }
 0x1c8   : > { %3737 = vmatpush1.bf16.msra.mxu0 %v4881_v11  ;;  %v740_v11 = vld [vmem:[%s6012_s4 + $0xae0] sm:$0xff] }
 0x1c9   : > { %3778 = vmatpush1.bf16.msra.mxu1 %v5137_v14  ;;  %3738 = vmatprep.subr.bf16.mxu0 %v4898_v15  ;;  %v4739_v14 = vcombine.low %v460_v62, %v468_v63  ;;  %v4995_v15 = vcombine.low %v716_v0, %v724_v1  ;;  %v5012_v17 = vcombine.high %v732_v10, %v740_v11  ;;  %v548_v62 = vld [vmem:[%s6012_s4 + $0x4e0] sm:$0xff] }
 0x1ca   : > { %3779 = vmatprep.subr.bf16.mxu1 %v5154_v16  ;;  %v4756_v16 = vcombine.high %v476_v8, %v484_v9  ;;  %v796_v63 = vld [vmem:[%s6012_s4 + $0xca0] sm:$0xff] }
 0x1cb   : > { %v804_v0 = vld [vmem:[%s6012_s4 + $0xce0] sm:$0xff] }
 0x1cc   : > { %3739 = vmatpush1.bf16.msra.mxu0 %v4897_v21  ;;  %v756_v21 = vld [vmem:[%s6012_s4 + $0xb60] sm:$0xff] }
 0x1cd   : > { %3780 = vmatpush1.bf16.msra.mxu1 %v5153_v22  ;;  %3740 = vmatprep.subr.bf16.mxu0 %v4914_v23  ;;  %v4755_v22 = vcombine.low %v476_v8, %v484_v9  ;;  %v5011_v23 = vcombine.low %v732_v10, %v740_v11  ;;  %v5028_v26 = vcombine.high %v748_v20, %v756_v21  ;;  %v564_v8 = vld [vmem:[%s6012_s4 + $0x560] sm:$0xff] }
 0x1ce   : > { %3781 = vmatprep.subr.bf16.mxu1 %v5170_v24  ;;  %v4772_v24 = vcombine.high %v492_v18, %v500_v19  ;;  %v5027_v44 = vcombine.low %v748_v20, %v756_v21  ;;  %v812_v9 = vld [vmem:[%s6012_s4 + $0xd20] sm:$0xff] }
 0x1cf   : > { %v820_v10 = vld [vmem:[%s6012_s4 + $0xd60] sm:$0xff] }
 0x1d0   : > { %3741 = vmatpush1.bf16.msra.mxu0 %v4913_v29  ;;  %v376_v29 = vld [vmem:[#allocation2] sm:$0xff] }
 0x1d1   : > { %3782 = vmatpush1.bf16.msra.mxu1 %v5169_v30  ;;  %3792 = vmatprep.subr.bf16.mxu0 %v4676_v59  ;;  %v836_v20 = vld [vmem:[%s6012_s4 + $0xde0] sm:$0xff] }
 0x1d2   : > { %3833 = vmatprep.subr.bf16.mxu1 %v4932_v31  ;;  %v764_v31 = vld [vmem:[%s6012_s4 + $0xba0] sm:$0xff] }
 0x1d3   : > { %3743 = vmatmul.mubr.bf16.vlgmr.msra.gmra.mrb[12].mxu0 %v6137_v35  ;;  %v852_v28 = vld [vmem:[%s6012_s4 + $0xe60] sm:$0xff] }
 0x1d4   : > { %3784 = vmatmul.mubr.bf16.vlgmr.msra.gmra.mrb[12].mxu1 %v6141_v38  ;;  %3793 = vmatpush1.bf16.msra.mxu0 %v4675_v37 }
 0x1d5   : > { %3834 = vmatpush1.bf16.msra.mxu1 %v4931_v39  ;;  %3794 = vmatprep.subr.bf16.mxu0 %v4692_v40  ;;  %v4771_v39 = vcombine.low %v492_v18, %v500_v19  ;;  %v580_v18 = vld [vmem:[%s6012_s4 + $0x5e0] sm:$0xff] }
 0x1d6   : > { %3835 = vmatprep.subr.bf16.mxu1 %v4948_v41  ;;  %3824 = vmatprep.mubr.bf16.mxu0 %v6083_v12  ;;  %v828_v19 = vld [vmem:[%s6012_s4 + $0xda0] sm:$0xff] }
 0x1d7   : > { %3865 = vmatprep.mubr.bf16.mxu1 %v6085_v13 }
 0x1d8   : > { %3795 = vmatpush1.bf16.msra.mxu0 %v4691_v47 }
 0x1d9   : > { %3836 = vmatpush1.bf16.msra.mxu1 %v4947_v48  ;;  %3796 = vmatprep.subr.bf16.mxu0 %v4708_v49  ;;  %v5044_v48 = vcombine.high %v764_v31, %v772_v32  ;;  %v524_v49 = vld [vmem:[%s6012_s4 + $0x420] sm:$0xff] }
 0x1da   : > { %3837 = vmatprep.subr.bf16.mxu1 %v4964_v50  ;;  %v532_v50 = vld [vmem:[%s6012_s4 + $0x460] sm:$0xff] }
 0x1db   : > { %v4803_v1 = vcombine.low %v524_v49, %v532_v50 }
 0x1dc   : > { %3797 = vmatpush1.bf16.msra.mxu0 %v4707_v57  ;;  %v5043_v57 = vcombine.low %v764_v31, %v772_v32  ;;  %v5124_v31 = vcombine.high %v844_v27, %v852_v28  ;;  %v604_v32 = vld [vmem:[%s6012_s4 + $0x6a0] sm:$0xff] }
 0x1dd   : > { %3838 = vmatpush1.bf16.msra.mxu1 %v4963_v58  ;;  %3798 = vmatprep.subr.bf16.mxu0 %v4724_v60  ;;  %v4804_v58 = vcombine.high %v524_v49, %v532_v50  ;;  %v5060_v60 = vcombine.high %v780_v54, %v788_v55 }
 0x1de   : > { %3839 = vmatprep.subr.bf16.mxu1 %v4980_v61  ;;  %v540_v61 = vld [vmem:[%s6012_s4 + $0x4a0] sm:$0xff] }
 0x1df   : > { %v4819_v11 = vcombine.low %v540_v61, %v548_v62 }
 0x1e0   : > { %3799 = vmatpush1.bf16.msra.mxu0 %v4723_v2  ;;  %v5059_v2 = vcombine.low %v780_v54, %v788_v55  ;;  %v644_v54 = vld [vmem:[%s6012_s4 + $0x7e0] sm:$0xff] }
 0x1e1   : > { %3840 = vmatpush1.bf16.msra.mxu1 %v4979_v3  ;;  %3800 = vmatprep.subr.bf16.mxu0 %v4740_v5  ;;  %v4820_v3 = vcombine.high %v540_v61, %v548_v62  ;;  %v5076_v5 = vcombine.high %v796_v63, %v804_v0  ;;  %v892_v55 = vld [vmem:[%s6012_s4 + $0xfa0] sm:$0xff]  ;;  %v397_v62 = vld [vmem:[%s6012_s4 + $0x28] sm:$0xff] }
 0x1e2   : > { %3841 = vmatprep.subr.bf16.mxu1 %v4996_v7  ;;  %v556_v7 = vld [vmem:[%s6012_s4 + $0x520] sm:$0xff] }
 0x1e3   : > { %v4835_v21 = vcombine.low %v556_v7, %v564_v8 }
 0x1e4   : > { %3801 = vmatpush1.bf16.msra.mxu0 %v4739_v14  ;;  %v5075_v14 = vcombine.low %v796_v63, %v804_v0  ;;  %v405_v63 = vld [vmem:[%s6012_s4 + $0x68] sm:$0xff] }
 0x1e5   : > { %3842 = vmatpush1.bf16.msra.mxu1 %v4995_v15  ;;  %3802 = vmatprep.subr.bf16.mxu0 %v4756_v16  ;;  %v4836_v15 = vcombine.high %v556_v7, %v564_v8  ;;  %v5092_v16 = vcombine.high %v812_v9, %v820_v10  ;;  %v653_v0 = vld [vmem:[%s6012_s4 + $0x828] sm:$0xff] }
 0x1e6   : > { %v3498_v25 = vpop.f32.mrb[0].mxu0  ;;  %3843 = vmatprep.subr.bf16.mxu1 %v5012_v17  ;;  %v572_v17 = vld [vmem:[%s6012_s4 + $0x5a0] sm:$0xff]  ;;  %v413_v8 = vld [vmem:[%s6012_s4 + $0xa8] sm:$0xff] }
 0x1e7   : > { %v3539_v30 = vpop.f32.mrb[0].mxu1  ;;  %v3500_v59 = vpop.f32.mrb[1].mxu0 }
 0x1e8   : > { %v3540_v33 = vadd.f32 %v3539_v30, %v3498_v25  ;;  %v3541_v36 = vpop.f32.mrb[1].mxu1  ;;  %v3502_v37 = vpop.f32.mrb[2].mxu0  ;;  %3803 = vmatpush1.bf16.msra.mxu0 %v4755_v22  ;;  %v5091_v22 = vcombine.low %v812_v9, %v820_v10  ;;  %v588_v25 = vld [vmem:[%s6012_s4 + $0x620] sm:$0xff]  ;;  %v5107_v30 = vcombine.low %v828_v19, %v836_v20  ;;  %v421_v9 = vld [vmem:[%s6012_s4 + $0xe8] sm:$0xff] }
 0x1e9   : > { %v3542_v40 = vadd.f32 %v3541_v36, %v3500_v59  ;;  %v3543_v41 = vpop.f32.mrb[2].mxu1  ;;  %3844 = vmatpush1.bf16.msra.mxu1 %v5011_v23  ;;  %v3503_v43 = vpop.f32.mrb[3].mxu0  ;;  %3804 = vmatprep.subr.bf16.mxu0 %v4772_v24  ;;  %v4852_v23 = vcombine.high %v572_v17, %v580_v18  ;;  %v5108_v24 = vcombine.high %v828_v19, %v836_v20  ;;  %v868_v36 = vld [vmem:[%s6012_s4 + $0xee0] sm:$0xff]  ;;  %v669_v10 = vld [vmem:[%s6012_s4 + $0x8a8] sm:$0xff] }
 0x1ea   : > { %v4120_v46 = vadd.f32 %v3540_v33, %v376_v29  ;;  %v3544_v47 = vpop.f32.mrb[3].mxu1  ;;  %3845 = vmatprep.subr.bf16.mxu1 %v5028_v26  ;;  %v596_v26 = vld [vmem:[%s6012_s4 + $0x660] sm:$0xff]  ;;  %v4851_v29 = vcombine.low %v572_v17, %v580_v18  ;;  %v429_v18 = vld [vmem:[%s6012_s4 + $0x128] sm:$0xff] }
 0x1eb   : > { %v4121_v53 = vadd.f32 %v3542_v40, %v377_v34  ;;  %v4868_v59 = vcombine.high %v588_v25, %v596_v26  ;;  %v612_v33 = vld [vmem:[%s6012_s4 + $0x6e0] sm:$0xff]  ;;  %v4867_v37 = vcombine.low %v588_v25, %v596_v26  ;;  %v437_v19 = vld [vmem:[%s6012_s4 + $0x168] sm:$0xff] }
 0x1ec   : > { %4136 = vst [vmem:[#allocation2] sm:$0xff] %v4120_v46  ;;  %3805 = vmatpush1.bf16.msra.mxu0 %v4771_v39  ;;  %v860_v34 = vld [vmem:[%s6012_s4 + $0xea0] sm:$0xff]  ;;  %v5123_v39 = vcombine.low %v844_v27, %v852_v28  ;;  %v4884_v40 = vcombine.high %v604_v32, %v612_v33  ;;  %v4883_v47 = vcombine.low %v604_v32, %v612_v33  ;;  %v685_v20 = vld [vmem:[%s6012_s4 + $0x928] sm:$0xff] }
 0x1ed   : > { %4137 = vst [vmem:[#allocation2 + $0x8] sm:$0xff] %v4121_v53  ;;  %3846 = vmatpush1.bf16.msra.mxu1 %v5027_v44  ;;  %3806 = vmatprep.subr.bf16.mxu0 %v4788_v45  ;;  %v5140_v41 = vcombine.high %v860_v34, %v868_v36  ;;  %v620_v43 = vld [vmem:[%s6012_s4 + $0x720] sm:$0xff]  ;;  %v445_v26 = vld [vmem:[%s6012_s4 + $0x1a8] sm:$0xff] }
 0x1ee   : > { %3847 = vmatprep.subr.bf16.mxu1 %v5044_v48  ;;  %v628_v44 = vld [vmem:[%s6012_s4 + $0x760] sm:$0xff]  ;;  %v5139_v48 = vcombine.low %v860_v34, %v868_v36  ;;  %v453_v27 = vld [vmem:[%s6012_s4 + $0x1e8] sm:$0xff] }
 0x1ef   : > { %v876_v45 = vld [vmem:[%s6012_s4 + $0xf20] sm:$0xff]  ;;  %v4900_v49 = vcombine.high %v620_v43, %v628_v44  ;;  %v701_v28 = vld [vmem:[%s6012_s4 + $0x9a8] sm:$0xff] }
 0x1f0   : > { %3807 = vmatpush1.bf16.msra.mxu0 %v4787_v56  ;;  %v884_v46 = vld [vmem:[%s6012_s4 + $0xf60] sm:$0xff]  ;;  %v461_v33 = vld [vmem:[%s6012_s4 + $0x228] sm:$0xff] }
 0x1f1   : > { %3848 = vmatpush1.bf16.msra.mxu1 %v5043_v57  ;;  %3808 = vmatprep.subr.bf16.mxu0 %v4804_v58  ;;  %v5156_v50 = vcombine.high %v876_v45, %v884_v46  ;;  %v636_v53 = vld [vmem:[%s6012_s4 + $0x7a0] sm:$0xff]  ;;  %v4899_v57 = vcombine.low %v620_v43, %v628_v44  ;;  %v5155_v58 = vcombine.low %v876_v45, %v884_v46  ;;  %v469_v34 = vld [vmem:[%s6012_s4 + $0x268] sm:$0xff] }
 0x1f2   : > { %3849 = vmatprep.subr.bf16.mxu1 %v5060_v60  ;;  %v900_v56 = vld [vmem:[%s6012_s4 + $0xfe0] sm:$0xff]  ;;  %v4916_v60 = vcombine.high %v636_v53, %v644_v54  ;;  %v717_v36 = vld [vmem:[%s6012_s4 + $0xa28] sm:$0xff] }
 0x1f3   : > { %v5172_v61 = vcombine.high %v892_v55, %v900_v56  ;;  %v477_v44 = vld [vmem:[%s6012_s4 + $0x2a8] sm:$0xff] }
 0x1f4   : > { %3809 = vmatpush1.bf16.msra.mxu0 %v4803_v1  ;;  %v661_v1 = vld [vmem:[%s6012_s4 + $0x868] sm:$0xff] }
 0x1f5   : > { %3850 = vmatpush1.bf16.msra.mxu1 %v5059_v2  ;;  %3810 = vmatprep.subr.bf16.mxu0 %v4820_v3  ;;  %v4915_v2 = vcombine.low %v636_v53, %v644_v54  ;;  %v5171_v3 = vcombine.low %v892_v55, %v900_v56  ;;  %v4934_v7 = vcombine.high %v653_v0, %v661_v1  ;;  %v485_v45 = vld [vmem:[%s6012_s4 + $0x2e8] sm:$0xff] }
 0x1f6   : > { %3851 = vmatprep.subr.bf16.mxu1 %v5076_v5  ;;  %v4678_v5 = vcombine.high %v397_v62, %v405_v63  ;;  %v733_v46 = vld [vmem:[%s6012_s4 + $0xaa8] sm:$0xff] }
 0x1f7   : > { %v493_v54 = vld [vmem:[%s6012_s4 + $0x328] sm:$0xff] }
 0x1f8   : > { %3811 = vmatpush1.bf16.msra.mxu0 %v4819_v11  ;;  %v677_v11 = vld [vmem:[%s6012_s4 + $0x8e8] sm:$0xff] }
 0x1f9   : > { %3852 = vmatpush1.bf16.msra.mxu1 %v5075_v14  ;;  %3812 = vmatprep.subr.bf16.mxu0 %v4836_v15  ;;  %v4677_v14 = vcombine.low %v397_v62, %v405_v63  ;;  %v4933_v15 = vcombine.low %v653_v0, %v661_v1  ;;  %v4950_v17 = vcombine.high %v669_v10, %v677_v11  ;;  %v501_v55 = vld [vmem:[%s6012_s4 + $0x368] sm:$0xff] }
 0x1fa   : > { %3853 = vmatprep.subr.bf16.mxu1 %v5092_v16  ;;  %v4694_v16 = vcombine.high %v413_v8, %v421_v9  ;;  %v749_v56 = vld [vmem:[%s6012_s4 + $0xb28] sm:$0xff] }
 0x1fb   : > { %v509_v0 = vld [vmem:[%s6012_s4 + $0x3a8] sm:$0xff] }
 0x1fc   : > { %3813 = vmatpush1.bf16.msra.mxu0 %v4835_v21  ;;  %v693_v21 = vld [vmem:[%s6012_s4 + $0x968] sm:$0xff] }
 0x1fd   : > { %3854 = vmatpush1.bf16.msra.mxu1 %v5091_v22  ;;  %3814 = vmatprep.subr.bf16.mxu0 %v4852_v23  ;;  %v4693_v22 = vcombine.low %v413_v8, %v421_v9  ;;  %v4949_v23 = vcombine.low %v669_v10, %v677_v11  ;;  %v4966_v25 = vcombine.high %v685_v20, %v693_v21  ;;  %v517_v1 = vld [vmem:[%s6012_s4 + $0x3e8] sm:$0xff]  ;;  %v379_v10 = vld [vmem:[#allocation2 + $0x18] sm:$0xff] }
 0x1fe   : > { %3855 = vmatprep.subr.bf16.mxu1 %v5108_v24  ;;  %v4710_v24 = vcombine.high %v429_v18, %v437_v19  ;;  %v773_v8 = vld [vmem:[%s6012_s4 + $0xbe8] sm:$0xff] }
 0x200   : > { %3815 = vmatpush1.bf16.msra.mxu0 %v4851_v29  ;;  %v709_v29 = vld [vmem:[%s6012_s4 + $0x9e8] sm:$0xff] }
 0x201   : > { %3856 = vmatpush1.bf16.msra.mxu1 %v5107_v30  ;;  %3816 = vmatprep.subr.bf16.mxu0 %v4868_v59  ;;  %v4709_v30 = vcombine.low %v429_v18, %v437_v19  ;;  %v4965_v59 = vcombine.low %v685_v20, %v693_v21  ;;  %v4982_v32 = vcombine.high %v701_v28, %v709_v29 }
 0x202   : > { %3857 = vmatprep.subr.bf16.mxu1 %v5124_v31  ;;  %v4726_v31 = vcombine.high %v445_v26, %v453_v27  ;;  %v4790_v20 = vcombine.high %v509_v0, %v517_v1 }
 0x204   : > { %3817 = vmatpush1.bf16.msra.mxu0 %v4867_v37  ;;  %v725_v37 = vld [vmem:[%s6012_s4 + $0xa68] sm:$0xff] }
 0x205   : > { %3858 = vmatpush1.bf16.msra.mxu1 %v5123_v39  ;;  %3818 = vmatprep.subr.bf16.mxu0 %v4884_v40  ;;  %v4725_v39 = vcombine.low %v445_v26, %v453_v27  ;;  %v4981_v40 = vcombine.low %v701_v28, %v709_v29  ;;  %v4998_v43 = vcombine.high %v717_v36, %v725_v37  ;;  %v781_v27 = vld [vmem:[%s6012_s4 + $0xc28] sm:$0xff] }
 0x206   : > { %3859 = vmatprep.subr.bf16.mxu1 %v5140_v41  ;;  %v4742_v41 = vcombine.high %v461_v33, %v469_v34  ;;  %v789_v28 = vld [vmem:[%s6012_s4 + $0xc68] sm:$0xff]  ;;  %v4789_v29 = vcombine.low %v509_v0, %v517_v1 }
 0x207   : > { %v845_v0 = vld [vmem:[%s6012_s4 + $0xe28] sm:$0xff] }
 0x208   : > { %3819 = vmatpush1.bf16.msra.mxu0 %v4883_v47  ;;  %v741_v47 = vld [vmem:[%s6012_s4 + $0xae8] sm:$0xff] }
 0x209   : > { %3860 = vmatpush1.bf16.msra.mxu1 %v5139_v48  ;;  %3820 = vmatprep.subr.bf16.mxu0 %v4900_v49  ;;  %v4741_v48 = vcombine.low %v461_v33, %v469_v34  ;;  %v4997_v49 = vcombine.low %v717_v36, %v725_v37  ;;  %v5014_v53 = vcombine.high %v733_v46, %v741_v47  ;;  %v549_v33 = vld [vmem:[%s6012_s4 + $0x4e8] sm:$0xff] }
 0x20a   : > { %3861 = vmatprep.subr.bf16.mxu1 %v5156_v50  ;;  %v4758_v50 = vcombine.high %v477_v44, %v485_v45  ;;  %v797_v34 = vld [vmem:[%s6012_s4 + $0xca8] sm:$0xff] }
 0x20b   : > { %v805_v36 = vld [vmem:[%s6012_s4 + $0xce8] sm:$0xff] }
 0x20c   : > { %3821 = vmatpush1.bf16.msra.mxu0 %v4899_v57  ;;  %v757_v57 = vld [vmem:[%s6012_s4 + $0xb68] sm:$0xff] }
 0x20d   : > { %3862 = vmatpush1.bf16.msra.mxu1 %v5155_v58  ;;  %3822 = vmatprep.subr.bf16.mxu0 %v4916_v60  ;;  %v4757_v58 = vcombine.low %v477_v44, %v485_v45  ;;  %v5013_v60 = vcombine.low %v733_v46, %v741_v47  ;;  %v5030_v63 = vcombine.high %v749_v56, %v757_v57  ;;  %v565_v44 = vld [vmem:[%s6012_s4 + $0x568] sm:$0xff] }
 0x20e   : > { %3863 = vmatprep.subr.bf16.mxu1 %v5172_v61  ;;  %v4774_v61 = vcombine.high %v493_v54, %v501_v55  ;;  %v5029_v19 = vcombine.low %v749_v56, %v757_v57  ;;  %v813_v45 = vld [vmem:[%s6012_s4 + $0xd28] sm:$0xff] }
 0x20f   : > { %v821_v46 = vld [vmem:[%s6012_s4 + $0xd68] sm:$0xff] }
 0x210   : > { %3823 = vmatpush1.bf16.msra.mxu0 %v4915_v2  ;;  %v378_v2 = vld [vmem:[#allocation2 + $0x10] sm:$0xff]  ;;  %v837_v56 = vld [vmem:[%s6012_s4 + $0xde8] sm:$0xff] }
 0x211   : > { %3864 = vmatpush1.bf16.msra.mxu1 %v5171_v3  ;;  %3874 = vmatprep.subr.bf16.mxu0 %v4678_v5  ;;  %v853_v1 = vld [vmem:[%s6012_s4 + $0xe68] sm:$0xff] }
 0x212   : > { %3915 = vmatprep.subr.bf16.mxu1 %v4934_v7  ;;  %v765_v7 = vld [vmem:[%s6012_s4 + $0xba8] sm:$0xff] }
 0x213   : > { %3825 = vmatmul.mubr.bf16.vlgmr.msra.gmra.mrb[16].mxu0 %v6137_v35 }
 0x214   : > { %3866 = vmatmul.mubr.bf16.vlgmr.msra.gmra.mrb[16].mxu1 %v6141_v38  ;;  %3875 = vmatpush1.bf16.msra.mxu0 %v4677_v14 }
 0x215   : > { %3916 = vmatpush1.bf16.msra.mxu1 %v4933_v15  ;;  %3876 = vmatprep.subr.bf16.mxu0 %v4694_v16  ;;  %v4773_v15 = vcombine.low %v493_v54, %v501_v55  ;;  %v581_v54 = vld [vmem:[%s6012_s4 + $0x5e8] sm:$0xff] }
 0x216   : > { %3917 = vmatprep.subr.bf16.mxu1 %v4950_v17  ;;  %3906 = vmatprep.mubr.bf16.mxu0 %v6083_v12  ;;  %v829_v55 = vld [vmem:[%s6012_s4 + $0xda8] sm:$0xff] }
 0x217   : > { %3947 = vmatprep.mubr.bf16.mxu1 %v6085_v13 }
 0x218   : > { %3877 = vmatpush1.bf16.msra.mxu0 %v4693_v22 }
 0x219   : > { %3918 = vmatpush1.bf16.msra.mxu1 %v4949_v23  ;;  %3878 = vmatprep.subr.bf16.mxu0 %v4710_v24  ;;  %v5046_v23 = vcombine.high %v765_v7, %v773_v8  ;;  %v525_v24 = vld [vmem:[%s6012_s4 + $0x428] sm:$0xff] }
 0x21a   : > { %3919 = vmatprep.subr.bf16.mxu1 %v4966_v25  ;;  %v533_v25 = vld [vmem:[%s6012_s4 + $0x468] sm:$0xff] }
 0x21b   : > { %v4805_v37 = vcombine.low %v525_v24, %v533_v25 }
 0x21c   : > { %3879 = vmatpush1.bf16.msra.mxu0 %v4709_v30  ;;  %v5045_v30 = vcombine.low %v765_v7, %v773_v8  ;;  %v5126_v7 = vcombine.high %v845_v0, %v853_v1  ;;  %v605_v8 = vld [vmem:[%s6012_s4 + $0x6a8] sm:$0xff] }
 0x21d   : > { %3920 = vmatpush1.bf16.msra.mxu1 %v4965_v59  ;;  %3880 = vmatprep.subr.bf16.mxu0 %v4726_v31  ;;  %v4806_v59 = vcombine.high %v525_v24, %v533_v25  ;;  %v5062_v31 = vcombine.high %v781_v27, %v789_v28 }
 0x21e   : > { %3921 = vmatprep.subr.bf16.mxu1 %v4982_v32  ;;  %v541_v32 = vld [vmem:[%s6012_s4 + $0x4a8] sm:$0xff] }
 0x21f   : > { %v4821_v47 = vcombine.low %v541_v32, %v549_v33 }
 0x220   : > { %3881 = vmatpush1.bf16.msra.mxu0 %v4725_v39  ;;  %v5061_v39 = vcombine.low %v781_v27, %v789_v28  ;;  %v645_v27 = vld [vmem:[%s6012_s4 + $0x7e8] sm:$0xff] }
 0x221   : > { %3922 = vmatpush1.bf16.msra.mxu1 %v4981_v40  ;;  %3882 = vmatprep.subr.bf16.mxu0 %v4742_v41  ;;  %v4822_v40 = vcombine.high %v541_v32, %v549_v33  ;;  %v5078_v41 = vcombine.high %v797_v34, %v805_v36  ;;  %v893_v28 = vld [vmem:[%s6012_s4 + $0xfa8] sm:$0xff]  ;;  %v398_v33 = vld [vmem:[%s6012_s4 + $0x30] sm:$0xff] }
 0x222   : > { %3923 = vmatprep.subr.bf16.mxu1 %v4998_v43  ;;  %v557_v43 = vld [vmem:[%s6012_s4 + $0x528] sm:$0xff] }
 0x223   : > { %v4837_v57 = vcombine.low %v557_v43, %v565_v44 }
 0x224   : > { %3883 = vmatpush1.bf16.msra.mxu0 %v4741_v48  ;;  %v5077_v48 = vcombine.low %v797_v34, %v805_v36  ;;  %v406_v34 = vld [vmem:[%s6012_s4 + $0x70] sm:$0xff] }
 0x225   : > { %3924 = vmatpush1.bf16.msra.mxu1 %v4997_v49  ;;  %3884 = vmatprep.subr.bf16.mxu0 %v4758_v50  ;;  %v4838_v49 = vcombine.high %v557_v43, %v565_v44  ;;  %v5094_v50 = vcombine.high %v813_v45, %v821_v46  ;;  %v654_v36 = vld [vmem:[%s6012_s4 + $0x830] sm:$0xff] }
 0x226   : > { %v3580_v62 = vpop.f32.mrb[4].mxu0  ;;  %3925 = vmatprep.subr.bf16.mxu1 %v5014_v53  ;;  %v573_v53 = vld [vmem:[%s6012_s4 + $0x5a8] sm:$0xff]  ;;  %v414_v44 = vld [vmem:[%s6012_s4 + $0xb0] sm:$0xff] }
 0x227   : > { %v3621_v3 = vpop.f32.mrb[4].mxu1  ;;  %v3582_v5 = vpop.f32.mrb[5].mxu0 }
 0x228   : > { %v3622_v9 = vadd.f32 %v3621_v3, %v3580_v62  ;;  %v3623_v11 = vpop.f32.mrb[5].mxu1  ;;  %v3584_v14 = vpop.f32.mrb[6].mxu0  ;;  %3885 = vmatpush1.bf16.msra.mxu0 %v4757_v58  ;;  %v5093_v58 = vcombine.low %v813_v45, %v821_v46  ;;  %v589_v62 = vld [vmem:[%s6012_s4 + $0x628] sm:$0xff]  ;;  %v5109_v3 = vcombine.low %v829_v55, %v837_v56  ;;  %v422_v45 = vld [vmem:[%s6012_s4 + $0xf0] sm:$0xff] }
 0x229   : > { %v3624_v16 = vadd.f32 %v3623_v11, %v3582_v5  ;;  %v3625_v17 = vpop.f32.mrb[6].mxu1  ;;  %3926 = vmatpush1.bf16.msra.mxu1 %v5013_v60  ;;  %v3585_v18 = vpop.f32.mrb[7].mxu0  ;;  %3886 = vmatprep.subr.bf16.mxu0 %v4774_v61  ;;  %v4854_v60 = vcombine.high %v573_v53, %v581_v54  ;;  %v5110_v61 = vcombine.high %v829_v55, %v837_v56  ;;  %v869_v11 = vld [vmem:[%s6012_s4 + $0xee8] sm:$0xff]  ;;  %v670_v46 = vld [vmem:[%s6012_s4 + $0x8b0] sm:$0xff] }
 0x22a   : > { %v4122_v21 = vadd.f32 %v3622_v9, %v378_v2  ;;  %v3626_v22 = vpop.f32.mrb[7].mxu1  ;;  %3927 = vmatprep.subr.bf16.mxu1 %v5030_v63  ;;  %v597_v63 = vld [vmem:[%s6012_s4 + $0x668] sm:$0xff]  ;;  %v4853_v2 = vcombine.low %v573_v53, %v581_v54  ;;  %v430_v54 = vld [vmem:[%s6012_s4 + $0x130] sm:$0xff] }
 0x22b   : > { %v4123_v26 = vadd.f32 %v3624_v16, %v379_v10  ;;  %v4870_v5 = vcombine.high %v589_v62, %v597_v63  ;;  %v613_v9 = vld [vmem:[%s6012_s4 + $0x6e8] sm:$0xff]  ;;  %v4869_v14 = vcombine.low %v589_v62, %v597_v63  ;;  %v438_v55 = vld [vmem:[%s6012_s4 + $0x170] sm:$0xff] }
 0x22c   : > { %4138 = vst [vmem:[#allocation2 + $0x10] sm:$0xff] %v4122_v21  ;;  %3887 = vmatpush1.bf16.msra.mxu0 %v4773_v15  ;;  %v861_v10 = vld [vmem:[%s6012_s4 + $0xea8] sm:$0xff]  ;;  %v5125_v15 = vcombine.low %v845_v0, %v853_v1  ;;  %v4886_v16 = vcombine.high %v605_v8, %v613_v9  ;;  %v4885_v22 = vcombine.low %v605_v8, %v613_v9  ;;  %v686_v56 = vld [vmem:[%s6012_s4 + $0x930] sm:$0xff] }
 0x22d   : > { %4139 = vst [vmem:[#allocation2 + $0x18] sm:$0xff] %v4123_v26  ;;  %3928 = vmatpush1.bf16.msra.mxu1 %v5029_v19  ;;  %3888 = vmatprep.subr.bf16.mxu0 %v4790_v20  ;;  %v5142_v17 = vcombine.high %v861_v10, %v869_v11  ;;  %v621_v18 = vld [vmem:[%s6012_s4 + $0x728] sm:$0xff]  ;;  %v446_v63 = vld [vmem:[%s6012_s4 + $0x1b0] sm:$0xff] }
 0x22e   : > { %3929 = vmatprep.subr.bf16.mxu1 %v5046_v23  ;;  %v629_v19 = vld [vmem:[%s6012_s4 + $0x768] sm:$0xff]  ;;  %v5141_v23 = vcombine.low %v861_v10, %v869_v11  ;;  %v454_v0 = vld [vmem:[%s6012_s4 + $0x1f0] sm:$0xff] }
 0x22f   : > { %v877_v20 = vld [vmem:[%s6012_s4 + $0xf28] sm:$0xff]  ;;  %v4902_v24 = vcombine.high %v621_v18, %v629_v19  ;;  %v702_v1 = vld [vmem:[%s6012_s4 + $0x9b0] sm:$0xff] }
 0x230   : > { %3889 = vmatpush1.bf16.msra.mxu0 %v4789_v29  ;;  %v885_v21 = vld [vmem:[%s6012_s4 + $0xf68] sm:$0xff]  ;;  %v462_v9 = vld [vmem:[%s6012_s4 + $0x230] sm:$0xff] }
 0x231   : > { %3930 = vmatpush1.bf16.msra.mxu1 %v5045_v30  ;;  %3890 = vmatprep.subr.bf16.mxu0 %v4806_v59  ;;  %v5158_v25 = vcombine.high %v877_v20, %v885_v21  ;;  %v637_v26 = vld [vmem:[%s6012_s4 + $0x7a8] sm:$0xff]  ;;  %v4901_v30 = vcombine.low %v621_v18, %v629_v19  ;;  %v5157_v59 = vcombine.low %v877_v20, %v885_v21  ;;  %v470_v10 = vld [vmem:[%s6012_s4 + $0x270] sm:$0xff] }
 0x232   : > { %3931 = vmatprep.subr.bf16.mxu1 %v5062_v31  ;;  %v901_v29 = vld [vmem:[%s6012_s4 + $0xfe8] sm:$0xff]  ;;  %v4918_v31 = vcombine.high %v637_v26, %v645_v27  ;;  %v718_v11 = vld [vmem:[%s6012_s4 + $0xa30] sm:$0xff] }
 0x233   : > { %v5174_v32 = vcombine.high %v893_v28, %v901_v29  ;;  %v478_v19 = vld [vmem:[%s6012_s4 + $0x2b0] sm:$0xff] }
 0x234   : > { %3891 = vmatpush1.bf16.msra.mxu0 %v4805_v37  ;;  %v662_v37 = vld [vmem:[%s6012_s4 + $0x870] sm:$0xff] }
 0x235   : > { %3932 = vmatpush1.bf16.msra.mxu1 %v5061_v39  ;;  %3892 = vmatprep.subr.bf16.mxu0 %v4822_v40  ;;  %v4917_v39 = vcombine.low %v637_v26, %v645_v27  ;;  %v5173_v40 = vcombine.low %v893_v28, %v901_v29  ;;  %v4936_v43 = vcombine.high %v654_v36, %v662_v37  ;;  %v486_v20 = vld [vmem:[%s6012_s4 + $0x2f0] sm:$0xff] }
 0x236   : > { %3933 = vmatprep.subr.bf16.mxu1 %v5078_v41  ;;  %v4680_v41 = vcombine.high %v398_v33, %v406_v34  ;;  %v734_v21 = vld [vmem:[%s6012_s4 + $0xab0] sm:$0xff] }
 0x237   : > { %v494_v27 = vld [vmem:[%s6012_s4 + $0x330] sm:$0xff] }
 0x238   : > { %3893 = vmatpush1.bf16.msra.mxu0 %v4821_v47  ;;  %v678_v47 = vld [vmem:[%s6012_s4 + $0x8f0] sm:$0xff] }
 0x239   : > { %3934 = vmatpush1.bf16.msra.mxu1 %v5077_v48  ;;  %3894 = vmatprep.subr.bf16.mxu0 %v4838_v49  ;;  %v4679_v48 = vcombine.low %v398_v33, %v406_v34  ;;  %v4935_v49 = vcombine.low %v654_v36, %v662_v37  ;;  %v4952_v53 = vcombine.high %v670_v46, %v678_v47  ;;  %v502_v28 = vld [vmem:[%s6012_s4 + $0x370] sm:$0xff] }
 0x23a   : > { %3935 = vmatprep.subr.bf16.mxu1 %v5094_v50  ;;  %v4696_v50 = vcombine.high %v414_v44, %v422_v45  ;;  %v750_v29 = vld [vmem:[%s6012_s4 + $0xb30] sm:$0xff] }
 0x23b   : > { %v510_v36 = vld [vmem:[%s6012_s4 + $0x3b0] sm:$0xff] }
 0x23c   : > { %3895 = vmatpush1.bf16.msra.mxu0 %v4837_v57  ;;  %v694_v57 = vld [vmem:[%s6012_s4 + $0x970] sm:$0xff] }
 0x23d   : > { %3936 = vmatpush1.bf16.msra.mxu1 %v5093_v58  ;;  %3896 = vmatprep.subr.bf16.mxu0 %v4854_v60  ;;  %v4695_v58 = vcombine.low %v414_v44, %v422_v45  ;;  %v4951_v60 = vcombine.low %v670_v46, %v678_v47  ;;  %v4968_v62 = vcombine.high %v686_v56, %v694_v57  ;;  %v518_v37 = vld [vmem:[%s6012_s4 + $0x3f0] sm:$0xff]  ;;  %v381_v46 = vld [vmem:[#allocation2 + $0x28] sm:$0xff] }
 0x23e   : > { %3937 = vmatprep.subr.bf16.mxu1 %v5110_v61  ;;  %v4712_v61 = vcombine.high %v430_v54, %v438_v55  ;;  %v774_v44 = vld [vmem:[%s6012_s4 + $0xbf0] sm:$0xff] }
 0x240   : > { %3897 = vmatpush1.bf16.msra.mxu0 %v4853_v2  ;;  %v710_v2 = vld [vmem:[%s6012_s4 + $0x9f0] sm:$0xff] }
 0x241   : > { %3938 = vmatpush1.bf16.msra.mxu1 %v5109_v3  ;;  %3898 = vmatprep.subr.bf16.mxu0 %v4870_v5  ;;  %v4711_v3 = vcombine.low %v430_v54, %v438_v55  ;;  %v4967_v5 = vcombine.low %v686_v56, %v694_v57  ;;  %v4984_v8 = vcombine.high %v702_v1, %v710_v2 }
 0x242   : > { %3939 = vmatprep.subr.bf16.mxu1 %v5126_v7  ;;  %v4728_v7 = vcombine.high %v446_v63, %v454_v0  ;;  %v4792_v56 = vcombine.high %v510_v36, %v518_v37 }
 0x244   : > { %3899 = vmatpush1.bf16.msra.mxu0 %v4869_v14  ;;  %v726_v14 = vld [vmem:[%s6012_s4 + $0xa70] sm:$0xff] }
 0x245   : > { %3940 = vmatpush1.bf16.msra.mxu1 %v5125_v15  ;;  %3900 = vmatprep.subr.bf16.mxu0 %v4886_v16  ;;  %v4727_v15 = vcombine.low %v446_v63, %v454_v0  ;;  %v4983_v16 = vcombine.low %v702_v1, %v710_v2  ;;  %v5000_v18 = vcombine.high %v718_v11, %v726_v14  ;;  %v782_v0 = vld [vmem:[%s6012_s4 + $0xc30] sm:$0xff] }
 0x246   : > { %3941 = vmatprep.subr.bf16.mxu1 %v5142_v17  ;;  %v4744_v17 = vcombine.high %v462_v9, %v470_v10  ;;  %v790_v1 = vld [vmem:[%s6012_s4 + $0xc70] sm:$0xff]  ;;  %v4791_v2 = vcombine.low %v510_v36, %v518_v37 }
 0x247   : > { %v846_v36 = vld [vmem:[%s6012_s4 + $0xe30] sm:$0xff] }
 0x248   : > { %3901 = vmatpush1.bf16.msra.mxu0 %v4885_v22  ;;  %v742_v22 = vld [vmem:[%s6012_s4 + $0xaf0] sm:$0xff] }
 0x249   : > { %3942 = vmatpush1.bf16.msra.mxu1 %v5141_v23  ;;  %3902 = vmatprep.subr.bf16.mxu0 %v4902_v24  ;;  %v4743_v23 = vcombine.low %v462_v9, %v470_v10  ;;  %v4999_v24 = vcombine.low %v718_v11, %v726_v14  ;;  %v5016_v26 = vcombine.high %v734_v21, %v742_v22  ;;  %v550_v9 = vld [vmem:[%s6012_s4 + $0x4f0] sm:$0xff] }
 0x24a   : > { %3943 = vmatprep.subr.bf16.mxu1 %v5158_v25  ;;  %v4760_v25 = vcombine.high %v478_v19, %v486_v20  ;;  %v798_v10 = vld [vmem:[%s6012_s4 + $0xcb0] sm:$0xff] }
 0x24b   : > { %v806_v11 = vld [vmem:[%s6012_s4 + $0xcf0] sm:$0xff] }
 0x24c   : > { %3903 = vmatpush1.bf16.msra.mxu0 %v4901_v30  ;;  %v758_v30 = vld [vmem:[%s6012_s4 + $0xb70] sm:$0xff] }
 0x24d   : > { %3944 = vmatpush1.bf16.msra.mxu1 %v5157_v59  ;;  %3904 = vmatprep.subr.bf16.mxu0 %v4918_v31  ;;  %v4759_v59 = vcombine.low %v478_v19, %v486_v20  ;;  %v5015_v31 = vcombine.low %v734_v21, %v742_v22  ;;  %v5032_v34 = vcombine.high %v750_v29, %v758_v30  ;;  %v566_v19 = vld [vmem:[%s6012_s4 + $0x570] sm:$0xff] }
 0x24e   : > { %3945 = vmatprep.subr.bf16.mxu1 %v5174_v32  ;;  %v4776_v32 = vcombine.high %v494_v27, %v502_v28  ;;  %v5031_v55 = vcombine.low %v750_v29, %v758_v30  ;;  %v814_v20 = vld [vmem:[%s6012_s4 + $0xd30] sm:$0xff] }
 0x24f   : > { %v822_v21 = vld [vmem:[%s6012_s4 + $0xd70] sm:$0xff] }
 0x250   : > { %3905 = vmatpush1.bf16.msra.mxu0 %v4917_v39  ;;  %v380_v39 = vld [vmem:[#allocation2 + $0x20] sm:$0xff]  ;;  %v838_v29 = vld [vmem:[%s6012_s4 + $0xdf0] sm:$0xff] }
 0x251   : > { %3946 = vmatpush1.bf16.msra.mxu1 %v5173_v40  ;;  %3956 = vmatprep.subr.bf16.mxu0 %v4680_v41  ;;  %v854_v37 = vld [vmem:[%s6012_s4 + $0xe70] sm:$0xff] }
 0x252   : > { %3997 = vmatprep.subr.bf16.mxu1 %v4936_v43  ;;  %v766_v43 = vld [vmem:[%s6012_s4 + $0xbb0] sm:$0xff] }
 0x253   : > { %3907 = vmatmul.mubr.bf16.vlgmr.msra.gmra.mrb[20].mxu0 %v6137_v35 }
 0x254   : > { %3948 = vmatmul.mubr.bf16.vlgmr.msra.gmra.mrb[20].mxu1 %v6141_v38  ;;  %3957 = vmatpush1.bf16.msra.mxu0 %v4679_v48 }
 0x255   : > { %3998 = vmatpush1.bf16.msra.mxu1 %v4935_v49  ;;  %3958 = vmatprep.subr.bf16.mxu0 %v4696_v50  ;;  %v4775_v49 = vcombine.low %v494_v27, %v502_v28  ;;  %v582_v27 = vld [vmem:[%s6012_s4 + $0x5f0] sm:$0xff] }
 0x256   : > { %3999 = vmatprep.subr.bf16.mxu1 %v4952_v53  ;;  %3988 = vmatprep.mubr.bf16.mxu0 %v6083_v12  ;;  %v830_v28 = vld [vmem:[%s6012_s4 + $0xdb0] sm:$0xff] }
 0x257   : > { %4029 = vmatprep.mubr.bf16.mxu1 %v6085_v13 }
 0x258   : > { %3959 = vmatpush1.bf16.msra.mxu0 %v4695_v58 }
 0x259   : > { %4000 = vmatpush1.bf16.msra.mxu1 %v4951_v60  ;;  %3960 = vmatprep.subr.bf16.mxu0 %v4712_v61  ;;  %v5048_v60 = vcombine.high %v766_v43, %v774_v44  ;;  %v526_v61 = vld [vmem:[%s6012_s4 + $0x430] sm:$0xff] }
 0x25a   : > { %4001 = vmatprep.subr.bf16.mxu1 %v4968_v62  ;;  %v534_v62 = vld [vmem:[%s6012_s4 + $0x470] sm:$0xff] }
 0x25b   : > { %v4807_v14 = vcombine.low %v526_v61, %v534_v62 }
 0x25c   : > { %3961 = vmatpush1.bf16.msra.mxu0 %v4711_v3  ;;  %v5047_v3 = vcombine.low %v766_v43, %v774_v44  ;;  %v5128_v43 = vcombine.high %v846_v36, %v854_v37  ;;  %v606_v44 = vld [vmem:[%s6012_s4 + $0x6b0] sm:$0xff] }
 0x25d   : > { %4002 = vmatpush1.bf16.msra.mxu1 %v4967_v5  ;;  %3962 = vmatprep.subr.bf16.mxu0 %v4728_v7  ;;  %v4808_v5 = vcombine.high %v526_v61, %v534_v62  ;;  %v5064_v7 = vcombine.high %v782_v0, %v790_v1 }
 0x25e   : > { %4003 = vmatprep.subr.bf16.mxu1 %v4984_v8  ;;  %v542_v8 = vld [vmem:[%s6012_s4 + $0x4b0] sm:$0xff] }
 0x25f   : > { %v4823_v22 = vcombine.low %v542_v8, %v550_v9 }
 0x260   : > { %3963 = vmatpush1.bf16.msra.mxu0 %v4727_v15  ;;  %v5063_v15 = vcombine.low %v782_v0, %v790_v1  ;;  %v646_v0 = vld [vmem:[%s6012_s4 + $0x7f0] sm:$0xff] }
 0x261   : > { %4004 = vmatpush1.bf16.msra.mxu1 %v4983_v16  ;;  %3964 = vmatprep.subr.bf16.mxu0 %v4744_v17  ;;  %v4824_v16 = vcombine.high %v542_v8, %v550_v9  ;;  %v5080_v17 = vcombine.high %v798_v10, %v806_v11  ;;  %v894_v1 = vld [vmem:[%s6012_s4 + $0xfb0] sm:$0xff]  ;;  %v399_v9 = vld [vmem:[%s6012_s4 + $0x38] sm:$0xff] }
 0x262   : > { %4005 = vmatprep.subr.bf16.mxu1 %v5000_v18  ;;  %v558_v18 = vld [vmem:[%s6012_s4 + $0x530] sm:$0xff] }
 0x263   : > { %v4839_v30 = vcombine.low %v558_v18, %v566_v19 }
 0x264   : > { %3965 = vmatpush1.bf16.msra.mxu0 %v4743_v23  ;;  %v5079_v23 = vcombine.low %v798_v10, %v806_v11  ;;  %v407_v10 = vld [vmem:[%s6012_s4 + $0x78] sm:$0xff] }
 0x265   : > { %4006 = vmatpush1.bf16.msra.mxu1 %v4999_v24  ;;  %3966 = vmatprep.subr.bf16.mxu0 %v4760_v25  ;;  %v4840_v24 = vcombine.high %v558_v18, %v566_v19  ;;  %v5096_v25 = vcombine.high %v814_v20, %v822_v21  ;;  %v655_v11 = vld [vmem:[%s6012_s4 + $0x838] sm:$0xff] }
 0x266   : > { %v3662_v33 = vpop.f32.mrb[8].mxu0  ;;  %4007 = vmatprep.subr.bf16.mxu1 %v5016_v26  ;;  %v574_v26 = vld [vmem:[%s6012_s4 + $0x5b0] sm:$0xff]  ;;  %v415_v19 = vld [vmem:[%s6012_s4 + $0xb8] sm:$0xff] }
 0x267   : > { %v3703_v40 = vpop.f32.mrb[8].mxu1  ;;  %v3664_v41 = vpop.f32.mrb[9].mxu0 }
 0x268   : > { %v3704_v45 = vadd.f32 %v3703_v40, %v3662_v33  ;;  %v3705_v47 = vpop.f32.mrb[9].mxu1  ;;  %v3666_v48 = vpop.f32.mrb[10].mxu0  ;;  %3967 = vmatpush1.bf16.msra.mxu0 %v4759_v59  ;;  %v5095_v59 = vcombine.low %v814_v20, %v822_v21  ;;  %v590_v33 = vld [vmem:[%s6012_s4 + $0x630] sm:$0xff]  ;;  %v5111_v40 = vcombine.low %v830_v28, %v838_v29  ;;  %v423_v20 = vld [vmem:[%s6012_s4 + $0xf8] sm:$0xff] }
 0x269   : > { %v3706_v50 = vadd.f32 %v3705_v47, %v3664_v41  ;;  %v3707_v53 = vpop.f32.mrb[10].mxu1  ;;  %4008 = vmatpush1.bf16.msra.mxu1 %v5015_v31  ;;  %v3667_v54 = vpop.f32.mrb[11].mxu0  ;;  %3968 = vmatprep.subr.bf16.mxu0 %v4776_v32  ;;  %v4856_v31 = vcombine.high %v574_v26, %v582_v27  ;;  %v5112_v32 = vcombine.high %v830_v28, %v838_v29  ;;  %v870_v47 = vld [vmem:[%s6012_s4 + $0xef0] sm:$0xff]  ;;  %v671_v21 = vld [vmem:[%s6012_s4 + $0x8b8] sm:$0xff] }
 0x26a   : > { %v4124_v57 = vadd.f32 %v3704_v45, %v380_v39  ;;  %v3708_v58 = vpop.f32.mrb[11].mxu1  ;;  %4009 = vmatprep.subr.bf16.mxu1 %v5032_v34  ;;  %v598_v34 = vld [vmem:[%s6012_s4 + $0x670] sm:$0xff]  ;;  %v4855_v39 = vcombine.low %v574_v26, %v582_v27  ;;  %v431_v27 = vld [vmem:[%s6012_s4 + $0x138] sm:$0xff] }
 0x26b   : > { %v4125_v63 = vadd.f32 %v3706_v50, %v381_v46  ;;  %v4872_v41 = vcombine.high %v590_v33, %v598_v34  ;;  %v614_v45 = vld [vmem:[%s6012_s4 + $0x6f0] sm:$0xff]  ;;  %v4871_v48 = vcombine.low %v590_v33, %v598_v34  ;;  %v439_v28 = vld [vmem:[%s6012_s4 + $0x178] sm:$0xff] }
 0x26c   : > { %4140 = vst [vmem:[#allocation2 + $0x20] sm:$0xff] %v4124_v57  ;;  %3969 = vmatpush1.bf16.msra.mxu0 %v4775_v49  ;;  %v862_v46 = vld [vmem:[%s6012_s4 + $0xeb0] sm:$0xff]  ;;  %v5127_v49 = vcombine.low %v846_v36, %v854_v37  ;;  %v4888_v50 = vcombine.high %v606_v44, %v614_v45  ;;  %v4887_v58 = vcombine.low %v606_v44, %v614_v45  ;;  %v687_v29 = vld [vmem:[%s6012_s4 + $0x938] sm:$0xff] }
 0x26d   : > { %4141 = vst [vmem:[#allocation2 + $0x28] sm:$0xff] %v4125_v63  ;;  %4010 = vmatpush1.bf16.msra.mxu1 %v5031_v55  ;;  %3970 = vmatprep.subr.bf16.mxu0 %v4792_v56  ;;  %v5144_v53 = vcombine.high %v862_v46, %v870_v47  ;;  %v622_v54 = vld [vmem:[%s6012_s4 + $0x730] sm:$0xff]  ;;  %v447_v34 = vld [vmem:[%s6012_s4 + $0x1b8] sm:$0xff] }
 0x26e   : > { %4011 = vmatprep.subr.bf16.mxu1 %v5048_v60  ;;  %v630_v55 = vld [vmem:[%s6012_s4 + $0x770] sm:$0xff]  ;;  %v5143_v60 = vcombine.low %v862_v46, %v870_v47  ;;  %v455_v36 = vld [vmem:[%s6012_s4 + $0x1f8] sm:$0xff] }
 0x26f   : > { %v878_v56 = vld [vmem:[%s6012_s4 + $0xf30] sm:$0xff]  ;;  %v4904_v61 = vcombine.high %v622_v54, %v630_v55  ;;  %v703_v37 = vld [vmem:[%s6012_s4 + $0x9b8] sm:$0xff] }
 0x270   : > { %3971 = vmatpush1.bf16.msra.mxu0 %v4791_v2  ;;  %v886_v57 = vld [vmem:[%s6012_s4 + $0xf70] sm:$0xff]  ;;  %v463_v45 = vld [vmem:[%s6012_s4 + $0x238] sm:$0xff] }
 0x271   : > { %4012 = vmatpush1.bf16.msra.mxu1 %v5047_v3  ;;  %3972 = vmatprep.subr.bf16.mxu0 %v4808_v5  ;;  %v5160_v62 = vcombine.high %v878_v56, %v886_v57  ;;  %v638_v63 = vld [vmem:[%s6012_s4 + $0x7b0] sm:$0xff]  ;;  %v4903_v3 = vcombine.low %v622_v54, %v630_v55  ;;  %v5159_v5 = vcombine.low %v878_v56, %v886_v57  ;;  %v471_v46 = vld [vmem:[%s6012_s4 + $0x278] sm:$0xff] }
 0x272   : > { %4013 = vmatprep.subr.bf16.mxu1 %v5064_v7  ;;  %v902_v2 = vld [vmem:[%s6012_s4 + $0xff0] sm:$0xff]  ;;  %v4920_v7 = vcombine.high %v638_v63, %v646_v0  ;;  %v719_v47 = vld [vmem:[%s6012_s4 + $0xa38] sm:$0xff]  ;;  %v4745_v57 = vcombine.low %v463_v45, %v471_v46 }
 0x273   : > { %v5176_v8 = vcombine.high %v894_v1, %v902_v2  ;;  %v487_v54 = vld [vmem:[%s6012_s4 + $0x2f8] sm:$0xff] }
 0x274   : > { %3973 = vmatpush1.bf16.msra.mxu0 %v4807_v14  ;;  %v663_v14 = vld [vmem:[%s6012_s4 + $0x878] sm:$0xff] }
 0x275   : > { %4014 = vmatpush1.bf16.msra.mxu1 %v5063_v15  ;;  %3974 = vmatprep.subr.bf16.mxu0 %v4824_v16  ;;  %v4919_v15 = vcombine.low %v638_v63, %v646_v0  ;;  %v5175_v16 = vcombine.low %v894_v1, %v902_v2  ;;  %v4938_v18 = vcombine.high %v655_v11, %v663_v14  ;;  %v735_v55 = vld [vmem:[%s6012_s4 + $0xab8] sm:$0xff] }
 0x276   : > { %4015 = vmatprep.subr.bf16.mxu1 %v5080_v17  ;;  %v4682_v17 = vcombine.high %v399_v9, %v407_v10  ;;  %v743_v56 = vld [vmem:[%s6012_s4 + $0xaf8] sm:$0xff] }
 0x277   : > { %v503_v63 = vld [vmem:[%s6012_s4 + $0x378] sm:$0xff] }
 0x278   : > { %3975 = vmatpush1.bf16.msra.mxu0 %v4823_v22  ;;  %v679_v22 = vld [vmem:[%s6012_s4 + $0x8f8] sm:$0xff] }
 0x279   : > { %4016 = vmatpush1.bf16.msra.mxu1 %v5079_v23  ;;  %3976 = vmatprep.subr.bf16.mxu0 %v4840_v24  ;;  %v4681_v23 = vcombine.low %v399_v9, %v407_v10  ;;  %v4937_v24 = vcombine.low %v655_v11, %v663_v14  ;;  %v4954_v26 = vcombine.high %v671_v21, %v679_v22  ;;  %v751_v0 = vld [vmem:[%s6012_s4 + $0xb38] sm:$0xff]  ;;  %v382_v11 = vld [vmem:[#allocation2 + $0x30] sm:$0xff] }
 0x27a   : > { %4017 = vmatprep.subr.bf16.mxu1 %v5096_v25  ;;  %v4698_v25 = vcombine.high %v415_v19, %v423_v20  ;;  %v759_v1 = vld [vmem:[%s6012_s4 + $0xb78] sm:$0xff] }
 0x27b   : > { %v511_v9 = vld [vmem:[%s6012_s4 + $0x3b8] sm:$0xff] }
 0x27c   : > { %3977 = vmatpush1.bf16.msra.mxu0 %v4839_v30  ;;  %v695_v30 = vld [vmem:[%s6012_s4 + $0x978] sm:$0xff] }
 0x27d   : > { %4018 = vmatpush1.bf16.msra.mxu1 %v5095_v59  ;;  %3978 = vmatprep.subr.bf16.mxu0 %v4856_v31  ;;  %v4697_v59 = vcombine.low %v415_v19, %v423_v20  ;;  %v4953_v31 = vcombine.low %v671_v21, %v679_v22  ;;  %v4970_v33 = vcombine.high %v687_v29, %v695_v30  ;;  %v519_v10 = vld [vmem:[%s6012_s4 + $0x3f8] sm:$0xff] }
 0x27e   : > { %4019 = vmatprep.subr.bf16.mxu1 %v5112_v32  ;;  %v4714_v32 = vcombine.high %v431_v27, %v439_v28  ;;  %v383_v19 = vld [vmem:[#allocation2 + $0x38] sm:$0xff] }
 0x280   : > { %3979 = vmatpush1.bf16.msra.mxu0 %v4855_v39  ;;  %v711_v39 = vld [vmem:[%s6012_s4 + $0x9f8] sm:$0xff] }
 0x281   : > { %4020 = vmatpush1.bf16.msra.mxu1 %v5111_v40  ;;  %3980 = vmatprep.subr.bf16.mxu0 %v4872_v41  ;;  %v4713_v40 = vcombine.low %v431_v27, %v439_v28  ;;  %v4969_v41 = vcombine.low %v687_v29, %v695_v30  ;;  %v4986_v44 = vcombine.high %v703_v37, %v711_v39 }
 0x282   : > { %4021 = vmatprep.subr.bf16.mxu1 %v5128_v43  ;;  %v4730_v43 = vcombine.high %v447_v34, %v455_v36  ;;  %v4794_v27 = vcombine.high %v511_v9, %v519_v10 }
 0x284   : > { %3981 = vmatpush1.bf16.msra.mxu0 %v4871_v48  ;;  %v4729_v48 = vcombine.low %v447_v34, %v455_v36  ;;  %v791_v34 = vld [vmem:[%s6012_s4 + $0xc78] sm:$0xff]  ;;  %v4793_v36 = vcombine.low %v511_v9, %v519_v10 }
 0x285   : > { %4022 = vmatpush1.bf16.msra.mxu1 %v5127_v49  ;;  %3982 = vmatprep.subr.bf16.mxu0 %v4888_v50  ;;  %v4746_v49 = vcombine.high %v463_v45, %v471_v46  ;;  %v807_v45 = vld [vmem:[%s6012_s4 + $0xcf8] sm:$0xff] }
 0x286   : > { %4023 = vmatprep.subr.bf16.mxu1 %v5144_v53  ;;  %v479_v53 = vld [vmem:[%s6012_s4 + $0x2b8] sm:$0xff] }
 0x287   : > { %v4761_v2 = vcombine.low %v479_v53, %v487_v54 }
 0x288   : > { %3983 = vmatpush1.bf16.msra.mxu0 %v4887_v58 }
 0x289   : > { %4024 = vmatpush1.bf16.msra.mxu1 %v5143_v60  ;;  %3984 = vmatprep.subr.bf16.mxu0 %v4904_v61  ;;  %v4762_v60 = vcombine.high %v479_v53, %v487_v54  ;;  %v5018_v61 = vcombine.high %v735_v55, %v743_v56  ;;  %v823_v53 = vld [vmem:[%s6012_s4 + $0xd78] sm:$0xff] }
 0x28a   : > { %4025 = vmatprep.subr.bf16.mxu1 %v5160_v62  ;;  %v495_v62 = vld [vmem:[%s6012_s4 + $0x338] sm:$0xff] }
 0x28b   : > { %v4777_v22 = vcombine.low %v495_v62, %v503_v63 }
 0x28c   : > { %3985 = vmatpush1.bf16.msra.mxu0 %v4903_v3  ;;  %v5017_v3 = vcombine.low %v735_v55, %v743_v56 }
 0x28d   : > { %4026 = vmatpush1.bf16.msra.mxu1 %v5159_v5  ;;  %3986 = vmatprep.subr.bf16.mxu0 %v4920_v7  ;;  %v4778_v5 = vcombine.high %v495_v62, %v503_v63  ;;  %v839_v62 = vld [vmem:[%s6012_s4 + $0xdf8] sm:$0xff] }
 0x28e   : > { %4027 = vmatprep.subr.bf16.mxu1 %v5176_v8  ;;  %v5034_v8 = vcombine.high %v751_v0, %v759_v1 }
 0x290   : > { %3987 = vmatpush1.bf16.msra.mxu0 %v4919_v15 }
 0x291   : > { %4028 = vmatpush1.bf16.msra.mxu1 %v5175_v16  ;;  %4038 = vmatprep.subr.bf16.mxu0 %v4682_v17  ;;  %v767_v16 = vld [vmem:[%s6012_s4 + $0xbb8] sm:$0xff] }
 0x292   : > { %4079 = vmatprep.subr.bf16.mxu1 %v4938_v18  ;;  %v775_v17 = vld [vmem:[%s6012_s4 + $0xbf8] sm:$0xff] }
 0x293   : > { %3989 = vmatmul.mubr.bf16.vlgmr.msra.gmra.mrb[24].mxu0 %v6137_v35  ;;  %v5050_v30 = vcombine.high %v767_v16, %v775_v17 }
 0x294   : > { %4030 = vmatmul.mubr.bf16.vlgmr.msra.gmra.mrb[24].mxu1 %v6141_v38  ;;  %4039 = vmatpush1.bf16.msra.mxu0 %v4681_v23 }
 0x295   : > { %4080 = vmatpush1.bf16.msra.mxu1 %v4937_v24  ;;  %4040 = vmatprep.subr.bf16.mxu0 %v4698_v25 }
 0x296   : > { %4081 = vmatprep.subr.bf16.mxu1 %v4954_v26  ;;  %4070 = vmatprep.mubr.bf16.mxu0 %v6083_v12  ;;  %v727_v12 = vld [vmem:[%s6012_s4 + $0xa78] sm:$0xff]  ;;  %v5033_v26 = vcombine.low %v751_v0, %v759_v1 }
 0x297   : > { %4111 = vmatprep.mubr.bf16.mxu1 %v6085_v13  ;;  %v4985_v13 = vcombine.low %v703_v37, %v711_v39  ;;  %v5002_v50 = vcombine.high %v719_v47, %v727_v12  ;;  %v5001_v58 = vcombine.low %v719_v47, %v727_v12  ;;  %v5049_v37 = vcombine.low %v767_v16, %v775_v17  ;;  %v615_v16 = vld [vmem:[%s6012_s4 + $0x6f8] sm:$0xff] }
 0x298   : > { %4041 = vmatpush1.bf16.msra.mxu0 %v4697_v59  ;;  %v527_v59 = vld [vmem:[%s6012_s4 + $0x438] sm:$0xff] }
 0x299   : > { %4082 = vmatpush1.bf16.msra.mxu1 %v4953_v31  ;;  %4042 = vmatprep.subr.bf16.mxu0 %v4714_v32  ;;  %v535_v31 = vld [vmem:[%s6012_s4 + $0x478] sm:$0xff] }
 0x29a   : > { %4083 = vmatprep.subr.bf16.mxu1 %v4970_v33  ;;  %v783_v33 = vld [vmem:[%s6012_s4 + $0xc38] sm:$0xff]  ;;  %v4810_v39 = vcombine.high %v527_v59, %v535_v31  ;;  %v4809_v46 = vcombine.low %v527_v59, %v535_v31 }
 0x29b   : > { %v5065_v47 = vcombine.low %v783_v33, %v791_v34  ;;  %v863_v17 = vld [vmem:[%s6012_s4 + $0xeb8] sm:$0xff] }
 0x29c   : > { %4043 = vmatpush1.bf16.msra.mxu0 %v4713_v40  ;;  %v5066_v40 = vcombine.high %v783_v33, %v791_v34  ;;  %v639_v59 = vld [vmem:[%s6012_s4 + $0x7b8] sm:$0xff] }
 0x29d   : > { %4084 = vmatpush1.bf16.msra.mxu1 %v4969_v41  ;;  %4044 = vmatprep.subr.bf16.mxu0 %v4730_v43  ;;  %v543_v41 = vld [vmem:[%s6012_s4 + $0x4b8] sm:$0xff] }
 0x29e   : > { %4085 = vmatprep.subr.bf16.mxu1 %v4986_v44  ;;  %v551_v43 = vld [vmem:[%s6012_s4 + $0x4f8] sm:$0xff] }
 0x29f   : > { %v799_v44 = vld [vmem:[%s6012_s4 + $0xcb8] sm:$0xff]  ;;  %v4826_v12 = vcombine.high %v543_v41, %v551_v43  ;;  %v4825_v54 = vcombine.low %v543_v41, %v551_v43 }
 0x2a0   : > { %4045 = vmatpush1.bf16.msra.mxu0 %v4729_v48  ;;  %v5082_v48 = vcombine.high %v799_v44, %v807_v45  ;;  %v5081_v55 = vcombine.low %v799_v44, %v807_v45  ;;  %v647_v31 = vld [vmem:[%s6012_s4 + $0x7f8] sm:$0xff]  ;;  %v384_v44 = vld [vmem:[#allocation2 + $0x40] sm:$0xff] }
 0x2a1   : > { %4086 = vmatpush1.bf16.msra.mxu1 %v4985_v13  ;;  %4046 = vmatprep.subr.bf16.mxu0 %v4746_v49  ;;  %v559_v13 = vld [vmem:[%s6012_s4 + $0x538] sm:$0xff] }
 0x2a2   : > { %4087 = vmatprep.subr.bf16.mxu1 %v5002_v50  ;;  %v567_v49 = vld [vmem:[%s6012_s4 + $0x578] sm:$0xff] }
 0x2a3   : > { %v815_v50 = vld [vmem:[%s6012_s4 + $0xd38] sm:$0xff]  ;;  %v4842_v56 = vcombine.high %v559_v13, %v567_v49  ;;  %v4841_v63 = vcombine.low %v559_v13, %v567_v49 }
 0x2a4   : > { %4047 = vmatpush1.bf16.msra.mxu0 %v4745_v57  ;;  %v5098_v57 = vcombine.high %v815_v50, %v823_v53  ;;  %v5097_v0 = vcombine.low %v815_v50, %v823_v53  ;;  %v903_v33 = vld [vmem:[%s6012_s4 + $0xff8] sm:$0xff] }
 0x2a5   : > { %4088 = vmatpush1.bf16.msra.mxu1 %v5001_v58  ;;  %4048 = vmatprep.subr.bf16.mxu0 %v4762_v60  ;;  %v575_v58 = vld [vmem:[%s6012_s4 + $0x5b8] sm:$0xff] }
 0x2a6   : > { %v3744_v7 = vpop.f32.mrb[12].mxu0  ;;  %4089 = vmatprep.subr.bf16.mxu1 %v5018_v61  ;;  %v583_v60 = vld [vmem:[%s6012_s4 + $0x5f8] sm:$0xff] }
 0x2a7   : > { %v3785_v14 = vpop.f32.mrb[12].mxu1  ;;  %v3746_v15 = vpop.f32.mrb[13].mxu0  ;;  %v831_v61 = vld [vmem:[%s6012_s4 + $0xdb8] sm:$0xff]  ;;  %v4858_v1 = vcombine.high %v575_v58, %v583_v60  ;;  %v4857_v9 = vcombine.low %v575_v58, %v583_v60 }
 0x2a8   : > { %v3786_v18 = vadd.f32 %v3785_v14, %v3744_v7  ;;  %v3787_v20 = vpop.f32.mrb[13].mxu1  ;;  %v3748_v21 = vpop.f32.mrb[14].mxu0  ;;  %4049 = vmatpush1.bf16.msra.mxu0 %v4761_v2  ;;  %v5114_v2 = vcombine.high %v831_v61, %v839_v62  ;;  %v847_v7 = vld [vmem:[%s6012_s4 + $0xe38] sm:$0xff]  ;;  %v5113_v10 = vcombine.low %v831_v61, %v839_v62 }
 0x2a9   : > { %v3788_v23 = vadd.f32 %v3787_v20, %v3746_v15  ;;  %v3789_v24 = vpop.f32.mrb[14].mxu1  ;;  %4090 = vmatpush1.bf16.msra.mxu1 %v5017_v3  ;;  %v3749_v25 = vpop.f32.mrb[15].mxu0  ;;  %4050 = vmatprep.subr.bf16.mxu0 %v4778_v5  ;;  %v591_v3 = vld [vmem:[%s6012_s4 + $0x638] sm:$0xff] }
 0x2aa   : > { %v4126_v28 = vadd.f32 %v3786_v18, %v382_v11  ;;  %v3790_v29 = vpop.f32.mrb[15].mxu1  ;;  %4091 = vmatprep.subr.bf16.mxu1 %v5034_v8  ;;  %v599_v5 = vld [vmem:[%s6012_s4 + $0x678] sm:$0xff] }
 0x2ab   : > { %v4127_v32 = vadd.f32 %v3788_v23, %v383_v19  ;;  %v855_v8 = vld [vmem:[%s6012_s4 + $0xe78] sm:$0xff]  ;;  %v4874_v11 = vcombine.high %v591_v3, %v599_v5  ;;  %v4873_v19 = vcombine.low %v591_v3, %v599_v5 }
 0x2ac   : > { %4142 = vst [vmem:[#allocation2 + $0x30] sm:$0xff] %v4126_v28  ;;  %4051 = vmatpush1.bf16.msra.mxu0 %v4777_v22  ;;  %v5130_v14 = vcombine.high %v847_v7, %v855_v8  ;;  %v607_v15 = vld [vmem:[%s6012_s4 + $0x6b8] sm:$0xff]  ;;  %v5129_v20 = vcombine.low %v847_v7, %v855_v8 }
 0x2ad   : > { %4143 = vst [vmem:[#allocation2 + $0x38] sm:$0xff] %v4127_v32  ;;  %4092 = vmatpush1.bf16.msra.mxu1 %v5033_v26  ;;  %4052 = vmatprep.subr.bf16.mxu0 %v4794_v27  ;;  %v871_v18 = vld [vmem:[%s6012_s4 + $0xef8] sm:$0xff]  ;;  %v4890_v21 = vcombine.high %v607_v15, %v615_v16  ;;  %v4889_v27 = vcombine.low %v607_v15, %v615_v16  ;;  %v389_v15 = vld [vmem:[#allocation2 + $0x68] sm:$0xff] }
 0x2ae   : > { %4093 = vmatprep.subr.bf16.mxu1 %v5050_v30  ;;  %v5146_v22 = vcombine.high %v863_v17, %v871_v18  ;;  %v623_v23 = vld [vmem:[%s6012_s4 + $0x738] sm:$0xff]  ;;  %v5145_v28 = vcombine.low %v863_v17, %v871_v18 }
 0x2af   : > { %v631_v24 = vld [vmem:[%s6012_s4 + $0x778] sm:$0xff] }
 0x2b0   : > { %4053 = vmatpush1.bf16.msra.mxu0 %v4793_v36  ;;  %v879_v25 = vld [vmem:[%s6012_s4 + $0xf38] sm:$0xff]  ;;  %v4906_v29 = vcombine.high %v623_v23, %v631_v24  ;;  %v4905_v34 = vcombine.low %v623_v23, %v631_v24 }
 0x2b1   : > { %4094 = vmatpush1.bf16.msra.mxu1 %v5049_v37  ;;  %4054 = vmatprep.subr.bf16.mxu0 %v4810_v39  ;;  %v887_v26 = vld [vmem:[%s6012_s4 + $0xf78] sm:$0xff]  ;;  %v4922_v37 = vcombine.high %v639_v59, %v647_v31 }
 0x2b2   : > { %4095 = vmatprep.subr.bf16.mxu1 %v5066_v40  ;;  %v5162_v30 = vcombine.high %v879_v25, %v887_v26  ;;  %v895_v32 = vld [vmem:[%s6012_s4 + $0xfb8] sm:$0xff]  ;;  %v5161_v36 = vcombine.low %v879_v25, %v887_v26  ;;  %v4921_v40 = vcombine.low %v639_v59, %v647_v31  ;;  %v390_v25 = vld [vmem:[#allocation2 + $0x70] sm:$0xff] }
 0x2b3   : > { %v5178_v39 = vcombine.high %v895_v32, %v903_v33  ;;  %v5177_v41 = vcombine.low %v895_v32, %v903_v33  ;;  %v387_v61 = vld [vmem:[#allocation2 + $0x58] sm:$0xff] }
 0x2b4   : > { %4055 = vmatpush1.bf16.msra.mxu0 %v4809_v46 }
 0x2b5   : > { %4096 = vmatpush1.bf16.msra.mxu1 %v5065_v47  ;;  %4056 = vmatprep.subr.bf16.mxu0 %v4826_v12  ;;  %v385_v12 = vld [vmem:[#allocation2 + $0x48] sm:$0xff] }
 0x2b6   : > { %4097 = vmatprep.subr.bf16.mxu1 %v5082_v48 }
 0x2b8   : > { %4057 = vmatpush1.bf16.msra.mxu0 %v4825_v54 }
 0x2b9   : > { %4098 = vmatpush1.bf16.msra.mxu1 %v5081_v55  ;;  %4058 = vmatprep.subr.bf16.mxu0 %v4842_v56 }
 0x2ba   : > { %4099 = vmatprep.subr.bf16.mxu1 %v5098_v57 }
 0x2bc   : > { %4059 = vmatpush1.bf16.msra.mxu0 %v4841_v63 }
 0x2bd   : > { %4100 = vmatpush1.bf16.msra.mxu1 %v5097_v0  ;;  %4060 = vmatprep.subr.bf16.mxu0 %v4858_v1 }
 0x2be   : > { %4101 = vmatprep.subr.bf16.mxu1 %v5114_v2 }
 0x2c0   : > { %4061 = vmatpush1.bf16.msra.mxu0 %v4857_v9  ;;  %v388_v9 = vld [vmem:[#allocation2 + $0x60] sm:$0xff] }
 0x2c1   : > { %4102 = vmatpush1.bf16.msra.mxu1 %v5113_v10  ;;  %4062 = vmatprep.subr.bf16.mxu0 %v4874_v11 }
 0x2c2   : > { %4103 = vmatprep.subr.bf16.mxu1 %v5130_v14 }
 0x2c4   : > { %4063 = vmatpush1.bf16.msra.mxu0 %v4873_v19 }
 0x2c5   : > { %4104 = vmatpush1.bf16.msra.mxu1 %v5129_v20  ;;  %4064 = vmatprep.subr.bf16.mxu0 %v4890_v21 }
 0x2c6   : > { %4105 = vmatprep.subr.bf16.mxu1 %v5146_v22 }
 0x2c8   : > { %4065 = vmatpush1.bf16.msra.mxu0 %v4889_v27 }
 0x2c9   : > { %4106 = vmatpush1.bf16.msra.mxu1 %v5145_v28  ;;  %4066 = vmatprep.subr.bf16.mxu0 %v4906_v29  ;;  %v391_v29 = vld [vmem:[#allocation2 + $0x78] sm:$0xff] }
 0x2ca   : > { %4107 = vmatprep.subr.bf16.mxu1 %v5162_v30 }
 0x2cc   : > { %4067 = vmatpush1.bf16.msra.mxu0 %v4905_v34 }
 0x2cd   : > { %4108 = vmatpush1.bf16.msra.mxu1 %v5161_v36  ;;  %4068 = vmatprep.subr.bf16.mxu0 %v4922_v37 }
 0x2ce   : > { %4109 = vmatprep.subr.bf16.mxu1 %v5178_v39 }
 0x2d0   : > { %4069 = vmatpush1.bf16.msra.mxu0 %v4921_v40 }
 0x2d1   : > { %4110 = vmatpush1.bf16.msra.mxu1 %v5177_v41 }
 0x2d3   : > { %4071 = vmatmul.mubr.bf16.vlgmr.msra.gmra.mrb[28].mxu0 %v6137_v35  ;;  %v386_v35 = vld [vmem:[#allocation2 + $0x50] sm:$0xff] }
 0x2d4   : > { %4112 = vmatmul.mubr.bf16.vlgmr.msra.gmra.mrb[28].mxu1 %v6141_v38 }
 0x2e6   : > { %v3826_v43 = vpop.f32.mrb[16].mxu0 }
 0x2e7   : > { %v3867_v45 = vpop.f32.mrb[16].mxu1  ;;  %v3828_v46 = vpop.f32.mrb[17].mxu0 }
 0x2e8   : > { %v3868_v47 = vadd.f32 %v3867_v45, %v3826_v43  ;;  %v3869_v48 = vpop.f32.mrb[17].mxu1  ;;  %v3830_v13 = vpop.f32.mrb[18].mxu0 }
 0x2e9   : > { %v3870_v49 = vadd.f32 %v3869_v48, %v3828_v46  ;;  %v3871_v50 = vpop.f32.mrb[18].mxu1  ;;  %v3831_v53 = vpop.f32.mrb[19].mxu0 }
 0x2ea   : > { %v4128_v54 = vadd.f32 %v3868_v47, %v384_v44  ;;  %v3872_v55 = vpop.f32.mrb[19].mxu1 }
 0x2eb   : > { %v4129_v56 = vadd.f32 %v3870_v49, %v385_v12 }
 0x2ec   : > { %4144 = vst [vmem:[#allocation2 + $0x40] sm:$0xff] %v4128_v54 }
 0x2ed   : > { %4145 = vst [vmem:[#allocation2 + $0x48] sm:$0xff] %v4129_v56 }
 0x326   : > { %v3908_v57 = vpop.f32.mrb[20].mxu0 }
 0x327   : > { %v3949_v58 = vpop.f32.mrb[20].mxu1  ;;  %v3910_v38 = vpop.f32.mrb[21].mxu0 }
 0x328   : > { %v3950_v60 = vadd.f32 %v3949_v58, %v3908_v57  ;;  %v3951_v62 = vpop.f32.mrb[21].mxu1  ;;  %v3912_v63 = vpop.f32.mrb[22].mxu0 }
 0x329   : > { %v3952_v0 = vadd.f32 %v3951_v62, %v3910_v38  ;;  %v3953_v1 = vpop.f32.mrb[22].mxu1  ;;  %v3913_v2 = vpop.f32.mrb[23].mxu0 }
 0x32a   : > { %v4130_v3 = vadd.f32 %v3950_v60, %v386_v35  ;;  %v3954_v5 = vpop.f32.mrb[23].mxu1 }
 0x32b   : > { %v4131_v7 = vadd.f32 %v3952_v0, %v387_v61 }
 0x32c   : > { %4146 = vst [vmem:[#allocation2 + $0x50] sm:$0xff] %v4130_v3 }
 0x32d   : > { %4147 = vst [vmem:[#allocation2 + $0x58] sm:$0xff] %v4131_v7 }
 0x366   : > { %v3990_v8 = vpop.f32.mrb[24].mxu0 }
 0x367   : > { %v4031_v10 = vpop.f32.mrb[24].mxu1  ;;  %v3992_v11 = vpop.f32.mrb[25].mxu0 }
 0x368   : > { %v4032_v14 = vadd.f32 %v4031_v10, %v3990_v8  ;;  %v4033_v16 = vpop.f32.mrb[25].mxu1  ;;  %v3994_v17 = vpop.f32.mrb[26].mxu0 }
 0x369   : > { %v4034_v18 = vadd.f32 %v4033_v16, %v3992_v11  ;;  %v4035_v19 = vpop.f32.mrb[26].mxu1  ;;  %v3995_v20 = vpop.f32.mrb[27].mxu0 }
 0x36a   : > { %v4132_v21 = vadd.f32 %v4032_v14, %v388_v9  ;;  %v4036_v22 = vpop.f32.mrb[27].mxu1 }
 0x36b   : > { %v4133_v23 = vadd.f32 %v4034_v18, %v389_v15 }
 0x36c   : > { %4148 = vst [vmem:[#allocation2 + $0x60] sm:$0xff] %v4132_v21 }
 0x36d   : > { %4149 = vst [vmem:[#allocation2 + $0x68] sm:$0xff] %v4133_v23 }
 0x3a6   : > { %v4072_v24 = vpop.f32.mrb[28].mxu0 }
 0x3a7   : > { %v4113_v26 = vpop.f32.mrb[28].mxu1  ;;  %v4074_v27 = vpop.f32.mrb[29].mxu0  ;;  %4155 = sbr.rel (%p5179_p10) target bundleno = 1159 (0x487), region = 60 }
 0x3a8   : > { %v4114_v28 = vadd.f32 %v4113_v26, %v4072_v24  ;;  %v4115_v30 = vpop.f32.mrb[29].mxu1  ;;  %v4076_v59 = vpop.f32.mrb[30].mxu0 }
 0x3a9   : > { %v4116_v31 = vadd.f32 %v4115_v30, %v4074_v27  ;;  %v4117_v32 = vpop.f32.mrb[30].mxu1  ;;  %v4077_v33 = vpop.f32.mrb[31].mxu0 }
 0x3aa   : > { %v4134_v34 = vadd.f32 %v4114_v28, %v390_v25  ;;  %v4118_v36 = vpop.f32.mrb[31].mxu1 }
 0x3ab   : > { %v4135_v37 = vadd.f32 %v4116_v31, %v391_v29 }
 0x3ac   : > { %4150 = vst [vmem:[#allocation2 + $0x70] sm:$0xff] %v4134_v34 }
 0x3ad   : > { %4151 = vst [vmem:[#allocation2 + $0x78] sm:$0xff] %v4135_v37 }
 0x3ae   : > { %v4156_v39 = vld [vmem:[#allocation9] sm:$0xff]  ;;  %v4157_v40 = vld [vmem:[#allocation9 + $0x8] sm:$0xff]  ;;  %v4197_v41 = vsub.s32 4, %v6053_v42  ;;  %v4201_v43 = vsub.s32 5, %v6053_v42  ;;  %v4205_v44 = vsub.s32 6, %v6053_v42  ;;  %v4161_v45 = vld [vmem:[#allocation2] sm:$0xff] }
 0x3af   : > { %v4162_v46 = vld [vmem:[#allocation2 + $0x8] sm:$0xff]  ;;  %v4182_v47 = vrot.slane %v4156_v39, %v6116_v4  ;;  %v4186_v12 = vrot.slane %v4156_v39, %v6060_v51  ;;  %v4190_v48 = vrot.slane %v4156_v39, %v6119_v6  ;;  %v4163_v13 = vld [vmem:[#allocation2 + $0x10] sm:$0xff]  ;;  %v4164_v49 = vld [vmem:[#allocation2 + $0x18] sm:$0xff]  ;;  %v4194_v53 = vrot.slane %v4156_v39, %v6063_v52  ;;  %s6726_s8 = smov 0  }
 0x3b0   : > { %v4165_v50 = vld [vmem:[#allocation2 + $0x20] sm:$0xff]  ;;  %v4198_v54 = vrot.slane %v4156_v39, %v4197_v41  ;;  %v4202_v55 = vrot.slane %v4156_v39, %v4201_v43  ;;  %v4209_v56 = vsub.s32 7, %v6053_v42  ;;  %v4166_v57 = vld [vmem:[#allocation2 + $0x28] sm:$0xff]  ;;  %v4167_v35 = vld [vmem:[#allocation2 + $0x30] sm:$0xff]  ;;  %v4206_v38 = vrot.slane %v4156_v39, %v4205_v44 }
 0x3b1   : > { %v4168_v58 = vld [vmem:[#allocation2 + $0x38] sm:$0xff]  ;;  %v4214_v60 = vrot.slane %v4157_v40, %v6116_v4  ;;  %v4218_v61 = vrot.slane %v4157_v40, %v6060_v51  ;;  %v4222_v62 = vrot.slane %v4157_v40, %v6119_v6  ;;  %v4169_v63 = vld [vmem:[#allocation2 + $0x40] sm:$0xff]  ;;  %v4170_v0 = vld [vmem:[#allocation2 + $0x48] sm:$0xff]  ;;  %v4226_v3 = vrot.slane %v4157_v40, %v6063_v52 }
 0x3b2   : > { %v4171_v1 = vld [vmem:[#allocation2 + $0x50] sm:$0xff]  ;;  %v4210_v2 = vrot.slane %v4156_v39, %v4209_v56  ;;  %v4230_v5 = vrot.slane %v4157_v40, %v4197_v41  ;;  %v4234_v7 = vrot.slane %v4157_v40, %v4201_v43  ;;  %v4172_v8 = vld [vmem:[#allocation2 + $0x58] sm:$0xff]  ;;  %v4173_v42 = vld [vmem:[#allocation2 + $0x60] sm:$0xff]  ;;  %v4238_v10 = vrot.slane %v4157_v40, %v4205_v44 }
 0x3b3   : > { %v4174_v9 = vld [vmem:[#allocation2 + $0x68] sm:$0xff]  ;;  %v4242_v11 = vrot.slane %v4157_v40, %v4209_v56  ;;  %v6626_v14 = vadd.f32 %v4182_v47, %v4161_v45  ;;  %v6628_v4 = vadd.f32 %v4186_v12, %v4162_v46  ;;  %v4175_v51 = vld [vmem:[#allocation2 + $0x70] sm:$0xff]  ;;  %v6630_v6 = vadd.f32 %v4190_v48, %v4163_v13 }
 0x3b4   : > { %v4176_v15 = vld [vmem:[#allocation2 + $0x78] sm:$0xff]  ;;  %v6632_v16 = vadd.f32 %v4194_v53, %v4164_v49  ;;  %v6634_v17 = vadd.f32 %v4198_v54, %v4165_v50  ;;  %v6636_v52 = vadd.f32 %v4202_v55, %v4166_v57  ;;  %v6638_v18 = vadd.f32 %v4206_v38, %v4167_v35 }
 0x3b5   : > { %v6640_v19 = vadd.f32 %v4210_v2, %v4168_v58  ;;  %v6642_v20 = vadd.f32 %v4214_v60, %v4169_v63  ;;  %v6644_v21 = vadd.f32 %v4218_v61, %v4170_v0  ;;  %v6646_v22 = vadd.f32 %v4222_v62, %v4171_v1 }
 0x3b6   : > { %v6648_v23 = vadd.f32 %v4226_v3, %v4172_v8  ;;  %v6650_v24 = vadd.f32 %v4230_v5, %v4173_v42  ;;  %v6652_v25 = vadd.f32 %v4234_v7, %v4174_v9  ;;  %v6654_v26 = vadd.f32 %v4238_v10, %v4175_v51 }
 0x3b7   : > { %v6656_v27 = vadd.f32 %v4242_v11, %v4176_v15  ;;  %v4291_v28 = vshra.s32 %v6626_v14, 31  ;;  %v4292_v29 = vshra.s32 %v6628_v4, 31  ;;  %v4293_v30 = vshra.s32 %v6630_v6, 31 }
 0x3b8   : > { %7026 = vst [vmem:[#allocation28_spill] sm:$0xff] %v6654_v26  ;;  %v4294_v59 = vshra.s32 %v6632_v16, 31  ;;  %v4295_v31 = vshra.s32 %v6634_v17, 31  ;;  %v4296_v32 = vshra.s32 %v6636_v52, 31  ;;  %v4297_v33 = vshra.s32 %v6638_v18, 31 }
 0x3b9   : > { %7027 = vst [vmem:[#allocation29_spill] sm:$0xff] %v6656_v27  ;;  %v4298_v34 = vshra.s32 %v6640_v19, 31  ;;  %v4299_v36 = vshra.s32 %v6642_v20, 31  ;;  %v4300_v37 = vshra.s32 %v6644_v21, 31  ;;  %v4301_v39 = vshra.s32 %v6646_v22, 31 }
 0x3ba   : > { %v4302_v40 = vshra.s32 %v6648_v23, 31  ;;  %v4303_v41 = vshra.s32 %v6650_v24, 31  ;;  %v4304_v43 = vshra.s32 %v6652_v25, 31  ;;  %v4305_v44 = vshra.s32 %v6654_v26, 31 }
 0x3bb   : > { %v4306_v45 = vshra.s32 %v6656_v27, 31  ;;  %v4307_v46 = vand.u32 2147483647, %v4291_v28  ;;  %v4308_v47 = vand.u32 2147483647, %v4292_v29  ;;  %v6724_v29 = vmov 2147483648  }
 0x3bc   : > { %v4309_v12 = vand.u32 2147483647, %v4293_v30  ;;  %v4310_v48 = vand.u32 2147483647, %v4294_v59  ;;  %v4311_v13 = vand.u32 2147483647, %v4295_v31 }
 0x3bd   : > { %v4312_v49 = vand.u32 2147483647, %v4296_v32  ;;  %v4313_v50 = vand.u32 2147483647, %v4297_v33  ;;  %v4314_v53 = vand.u32 2147483647, %v4298_v34  ;;  %v6675_v54 = vxor.u32 %v4307_v46, %v6626_v14 }
 0x3be   : > { %v4315_v55 = vand.u32 2147483647, %v4299_v36  ;;  %v4316_v56 = vand.u32 2147483647, %v4300_v37  ;;  %v4317_v57 = vand.u32 2147483647, %v4301_v39  ;;  %v6678_v35 = vxor.u32 %v4308_v47, %v6628_v4 }
 0x3bf   : > { %v4318_v58 = vand.u32 2147483647, %v4302_v40  ;;  %v4319_v38 = vand.u32 2147483647, %v4303_v41  ;;  %v4320_v60 = vand.u32 2147483647, %v4304_v43  ;;  %v6681_v61 = vxor.u32 %v4309_v12, %v6630_v6 }
 0x3c0   : > { %v4321_v62 = vand.u32 2147483647, %v4305_v44  ;;  %v4322_v63 = vand.u32 2147483647, %v4306_v45  ;;  %v6684_v0 = vxor.u32 %v4310_v48, %v6632_v16  ;;  %v6687_v1 = vxor.u32 %v4311_v13, %v6634_v17 }
 0x3c1   : > { %v6690_v2 = vxor.u32 %v4312_v49, %v6636_v52  ;;  %v6693_v3 = vxor.u32 %v4313_v50, %v6638_v18  ;;  %v6696_v5 = vxor.u32 %v4314_v53, %v6640_v19  ;;  %v6699_v7 = vxor.u32 %v4315_v55, %v6642_v20 }
 0x3c2   : > { %v6702_v8 = vxor.u32 %v4316_v56, %v6644_v21  ;;  %v6705_v42 = vxor.u32 %v4317_v57, %v6646_v22  ;;  %v6708_v9 = vxor.u32 %v4318_v58, %v6648_v23  ;;  %v6711_v10 = vxor.u32 %v4319_v38, %v6650_v24 }
 0x3c3   : > { %v6714_v11 = vxor.u32 %v4320_v60, %v6652_v25  ;;  %v6717_v51 = vxor.u32 %v4321_v62, %v6654_v26  ;;  %v6720_v15 = vxor.u32 %v4322_v63, %v6656_v27  ;;  %v6722_v28 = vmov 2147483647  }
 0x3c5   : > { %7028 = vst [vmem:[#allocation30_spill] sm:$0xff] %v6717_v51  ;;  %7029 = vst [vmem:[#allocation31_spill] sm:$0xff] %v6720_v15 }
 0x3c6 LB: >> { %v4347_v30 = vshra.s32 %v5656_v29, 1  ;;  %v4348_v59 = vshra.s32 %v5652_v28, 1  ;;  %v4350_v31 = vand.u32 %v5652_v28, %v5656_v29  ;;  %v5669_v36 = vmov 0   ;;  %s4344_s8 = sadd.s32 1, %s5660_s8   ;;  %s5660_s8 = sphi %s6726_s8, %s4344_s8   ;;  %v5656_v29 = vphi %v6724_v29, %v7033_v29   ;;  %v5652_v28 = vphi %v6722_v28, %v4414_v28  }
 0x3c7   : >> { %p4341_p0 = scmp.ge.s32.totalorder %s4344_s8, 32  }
 0x3c8   : >> { %v4349_v32 = vadd.s32 %v4348_v59, %v4347_v30  ;;  %v4351_v33 = vand.u32 1, %v4350_v31 }
 0x3ca   : >> { %v6741_v34 = vadd.s32 %v4351_v33, %v4349_v32 }
 0x3cc   : >> { %vm4353_vm0 = vcmp.ge.s32.totalorder %v6675_v54, %v6741_v34  ;;  %vm4354_vm1 = vcmp.ge.s32.totalorder %v6678_v35, %v6741_v34  ;;  %vm4355_vm2 = vcmp.ge.s32.totalorder %v6681_v61, %v6741_v34  ;;  %vm4356_vm3 = vcmp.ge.s32.totalorder %v6684_v0, %v6741_v34  ;;  %v7030_v51 = vld [vmem:[#allocation30_spill] sm:$0xff]  ;;  %v7031_v15 = vld [vmem:[#allocation31_spill] sm:$0xff] }
 0x3cd   : >> { %vm4357_vm4 = vcmp.ge.s32.totalorder %v6687_v1, %v6741_v34  ;;  %vm4358_vm5 = vcmp.ge.s32.totalorder %v6690_v2, %v6741_v34  ;;  %vm4359_vm6 = vcmp.ge.s32.totalorder %v6693_v3, %v6741_v34  ;;  %vm4360_vm7 = vcmp.ge.s32.totalorder %v6696_v5, %v6741_v34 }
 0x3ce   : >> { %vm4361_vm8 = vcmp.ge.s32.totalorder %v6699_v7, %v6741_v34  ;;  %vm4362_vm9 = vcmp.ge.s32.totalorder %v6702_v8, %v6741_v34  ;;  %vm4363_vm10 = vcmp.ge.s32.totalorder %v6705_v42, %v6741_v34  ;;  %vm4364_vm11 = vcmp.ge.s32.totalorder %v6708_v9, %v6741_v34 }
 0x3cf   : >> { %v4369_v37 = vsel %vm4353_vm0, 1, %v5669_v36  ;;  %v4370_v39 = vsel %vm4354_vm1, 1, %v5669_v36  ;;  %v4371_v40 = vsel %vm4355_vm2, 1, %v5669_v36  ;;  %v4372_v41 = vsel %vm4356_vm3, 1, %v5669_v36 }
 0x3d0   : >> { %v4373_v43 = vsel %vm4357_vm4, 1, %v5669_v36  ;;  %v4374_v44 = vsel %vm4358_vm5, 1, %v5669_v36  ;;  %v4375_v45 = vsel %vm4359_vm6, 1, %v5669_v36  ;;  %v4376_v46 = vsel %vm4360_vm7, 1, %v5669_v36 }
 0x3d1   : >> { %vm4365_vm12 = vcmp.ge.s32.totalorder %v6711_v10, %v6741_v34  ;;  %vm4366_vm13 = vcmp.ge.s32.totalorder %v6714_v11, %v6741_v34  ;;  %vm4367_vm14 = vcmp.ge.s32.totalorder %v7030_v51, %v6741_v34  ;;  %vm4368_vm15 = vcmp.ge.s32.totalorder %v7031_v15, %v6741_v34 }
 0x3d2   : >> { %v4377_v47 = vsel %vm4361_vm8, 1, %v5669_v36  ;;  %v4378_v12 = vsel %vm4362_vm9, 1, %v5669_v36  ;;  %v4379_v48 = vsel %vm4363_vm10, 1, %v5669_v36  ;;  %v4380_v13 = vsel %vm4364_vm11, 1, %v5669_v36 }
 0x3d3   : >> { %v4385_v49 = vadd.s32 %v4373_v43, %v4369_v37  ;;  %v4386_v50 = vadd.s32 %v4374_v44, %v4370_v39  ;;  %v4387_v53 = vadd.s32 %v4375_v45, %v4371_v40  ;;  %v4388_v55 = vadd.s32 %v4376_v46, %v4372_v41 }
 0x3d4   : >> { %v4381_v56 = vsel %vm4365_vm12, 1, %v5669_v36  ;;  %v4382_v57 = vsel %vm4366_vm13, 1, %v5669_v36  ;;  %v4383_v58 = vsel %vm4367_vm14, 1, %v5669_v36  ;;  %v4384_v38 = vsel %vm4368_vm15, 1, %v5669_v36 }
 0x3d5   : >> { %v4389_v60 = vadd.s32 %v4385_v49, %v4377_v47  ;;  %v4390_v62 = vadd.s32 %v4386_v50, %v4378_v12  ;;  %v4391_v63 = vadd.s32 %v4387_v53, %v4379_v48  ;;  %v4392_v30 = vadd.s32 %v4388_v55, %v4380_v13 }
 0x3d7   : >> { %v4393_v59 = vadd.s32 %v4389_v60, %v4381_v56  ;;  %v4394_v31 = vadd.s32 %v4390_v62, %v4382_v57  ;;  %v4395_v32 = vadd.s32 %v4391_v63, %v4383_v58  ;;  %v4396_v33 = vadd.s32 %v4392_v30, %v4384_v38 }
 0x3d9   : >> { %v4397_v27 = vadd.s32 %v4394_v31, %v4393_v59  ;;  %v4398_v15 = vadd.s32 %v4396_v33, %v4395_v32 }
 0x3db   : >> { %v4399_v26 = vadd.s32 %v4398_v15, %v4397_v27  ;;  %v4432_v27 = vmax.f32 (%p4341_p0), %v6628_v4, 0.0  ;;  %v4434_v15 = vmax.f32 (%p4341_p0), %v6632_v16, 0.0 }
 0x3dd   : >> { %v4401_v51 = vshrl.u32 %v4399_v26, 16  ;;  %v4400_v37 = vand.u32 65535, %v4399_v26  ;;  %v4431_v26 = vmax.f32 (%p4341_p0), %v6626_v14, 0.0 }
 0x3df   : >> { %v4403_v39 = vcvt.s32.f32 %v4401_v51  ;;  %v4402_v40 = vcvt.s32.f32 %v4400_v37  ;;  %v4433_v51 = vmax.f32 (%p4341_p0), %v6630_v6, 0.0  ;;  %v4436_v6 = vmax.f32 (%p4341_p0), %v6636_v52, 0.0 }
 0x3e0   : > { %v4439_v52 = vmax.f32 (%p4341_p0), %v6642_v20, 0.0 }
 0x3e1   : >> { %4406 = vadd.xlane.f32.xlu0 %v4403_v39 }
 0x3e5   : >> { %4404 = vadd.xlane.f32.xlu0 %v4402_v40 }
 0x46e   : >> { %v4407_v41 = vpop.xlane.xlu0 %4406 }
 0x46f   : >> { %v4409_v43 = vcvt.f32.s32 %v4407_v41 }
 0x471   : >> { %v4410_v44 = vshll.u32 %v4409_v43, 16 }
 0x472   : >> { %v4405_v36 = vpop.xlane.xlu0 %4404 }
 0x473   : >> { %v4408_v45 = vcvt.f32.s32 %v4405_v36 }
 0x474   : > { %4343 = sbr.rel (!%p4341_p0) target bundleno = 966 (0x3c6), region = 126 }
 0x475   : >> { %v4411_v46 = vadd.s32 %v4410_v44, %v4408_v45 }
 0x477   : >> { %vm4412_vm0 = vcmp.ge.s32.totalorder %v4411_v46, 64 }
 0x478   : >> { %v6789_v29 = vsel %vm4412_vm0, %v6741_v34, %v5656_v29   ;;  %v4414_v28 = vsel %vm4412_vm0, %v5652_v28, %v6741_v34   ;;  %v7037_v34 = vld [vmem:[#allocation29_spill] sm:$0xff] (%p4341_p0) }
 0x479   : >> { %v7032_v47 = vmov %v6789_v29  ;;  %v7035_v28 = vld [vmem:[#allocation28_spill] sm:$0xff] (%p4341_p0)  ;;  %v4446_v12 = vmax.f32 (%p4341_p0), %v7037_v34, 0.0 }
 0x47a   : >> { %v7033_v29 = vmov %v7032_v47  ;;  %vm4415_vm1 = vcmp.ge.s32.totalorder (%p4341_p0), %v6675_v54, %v7032_v47  ;;  %vm4416_vm2 = vcmp.ge.s32.totalorder (%p4341_p0), %v6678_v35, %v7032_v47  ;;  %vm4417_vm3 = vcmp.ge.s32.totalorder (%p4341_p0), %v6681_v61, %v7032_v47 }
 0x47b   : > { %vm4418_vm4 = vcmp.ge.s32.totalorder %v6684_v0, %v7032_v47  ;;  %v4447_v54 = vsel %vm4415_vm1, %v4431_v26, 0.0  ;;  %v4448_v14 = vsel %vm4416_vm2, %v4432_v27, 0.0  ;;  %vm4419_vm5 = vcmp.ge.s32.totalorder %v6687_v1, %v7032_v47  ;;  %v7036_v29 = vld [vmem:[#allocation31_spill] sm:$0xff] }
 0x47c   : > { %v4435_v35 = vmax.f32 %v6634_v17, 0.0  ;;  %4465 = vst [vmem:[%s6028_s24] sm:$0xff] %v4447_v54  ;;  %4466 = vst [vmem:[%s6028_s24 + $0x8] sm:$0xff] %v4448_v14  ;;  %v4449_v4 = vsel %vm4417_vm3, %v4433_v51, 0.0  ;;  %v4450_v61 = vsel %vm4418_vm4, %v4434_v15, 0.0  ;;  %vm4420_vm6 = vcmp.ge.s32.totalorder %v6690_v2, %v7032_v47 }
 0x47d   : > { %4467 = vst [vmem:[%s6028_s24 + $0x10] sm:$0xff] %v4449_v4  ;;  %4468 = vst [vmem:[%s6028_s24 + $0x18] sm:$0xff] %v4450_v61  ;;  %vm4421_vm7 = vcmp.ge.s32.totalorder %v6693_v3, %v7032_v47  ;;  %v4437_v0 = vmax.f32 %v6638_v18, 0.0  ;;  %vm4422_vm8 = vcmp.ge.s32.totalorder %v6696_v5, %v7032_v47  ;;  %v4452_v17 = vsel %vm4420_vm6, %v4436_v6, 0.0 }
 0x47e   : > { %v4451_v16 = vsel %vm4419_vm5, %v4435_v35, 0.0  ;;  %v4438_v1 = vmax.f32 %v6640_v19, 0.0  ;;  %vm4423_vm9 = vcmp.ge.s32.totalorder %v6699_v7, %v7032_v47  ;;  %4470 = vst [vmem:[%s6028_s24 + $0x28] sm:$0xff] %v4452_v17  ;;  %vm4424_vm10 = vcmp.ge.s32.totalorder %v6702_v8, %v7032_v47 }
 0x47f   : > { %4469 = vst [vmem:[%s6028_s24 + $0x20] sm:$0xff] %v4451_v16  ;;  %v4453_v2 = vsel %vm4421_vm7, %v4437_v0, 0.0  ;;  %v4440_v18 = vmax.f32 %v6644_v21, 0.0  ;;  %vm4425_vm11 = vcmp.ge.s32.totalorder %v6705_v42, %v7032_v47  ;;  %v4455_v19 = vsel %vm4423_vm9, %v4439_v52, 0.0  ;;  %v7034_v42 = vld [vmem:[#allocation30_spill] sm:$0xff] }
 0x480   : > { %4471 = vst [vmem:[%s6028_s24 + $0x30] sm:$0xff] %v4453_v2  ;;  %v4454_v3 = vsel %vm4422_vm8, %v4438_v1, 0.0  ;;  %v4441_v5 = vmax.f32 %v6646_v22, 0.0  ;;  %vm4426_vm12 = vcmp.ge.s32.totalorder %v6708_v9, %v7032_v47  ;;  %4473 = vst [vmem:[%s6028_s24 + $0x40] sm:$0xff] %v4455_v19  ;;  %v4442_v7 = vmax.f32 %v6648_v23, 0.0 }
 0x481   : > { %4472 = vst [vmem:[%s6028_s24 + $0x38] sm:$0xff] %v4454_v3  ;;  %v4456_v20 = vsel %vm4424_vm10, %v4440_v18, 0.0  ;;  %vm4427_vm13 = vcmp.ge.s32.totalorder %v6711_v10, %v7032_v47  ;;  %v4443_v21 = vmax.f32 %v6650_v24, 0.0  ;;  %vm4428_vm14 = vcmp.ge.s32.totalorder %v6714_v11, %v7032_v47 }
 0x482   : > { %4474 = vst [vmem:[%s6028_s24 + $0x48] sm:$0xff] %v4456_v20  ;;  %v4457_v8 = vsel %vm4425_vm11, %v4441_v5, 0.0  ;;  %v4444_v22 = vmax.f32 %v6652_v25, 0.0  ;;  %vm4429_vm15 = vcmp.ge.s32.totalorder %v7034_v42, %v7032_v47  ;;  %v4458_v23 = vsel %vm4426_vm12, %v4442_v7, 0.0 }
 0x483   : > { %4475 = vst [vmem:[%s6028_s24 + $0x50] sm:$0xff] %v4457_v8  ;;  %v4459_v9 = vsel %vm4427_vm13, %v4443_v21, 0.0  ;;  %v4445_v10 = vmax.f32 %v7035_v28, 0.0  ;;  %vm4430_vm0 = vcmp.ge.s32.totalorder %v7036_v29, %v7032_v47  ;;  %4476 = vst [vmem:[%s6028_s24 + $0x58] sm:$0xff] %v4458_v23 }
 0x484   : > { %4477 = vst [vmem:[%s6028_s24 + $0x60] sm:$0xff] %v4459_v9  ;;  %v4460_v24 = vsel %vm4428_vm14, %v4444_v22, 0.0  ;;  %v4462_v25 = vsel %vm4430_vm0, %v4446_v12, 0.0 }
 0x485   : > { %4478 = vst [vmem:[%s6028_s24 + $0x68] sm:$0xff] %v4460_v24  ;;  %v4461_v11 = vsel %vm4429_vm15, %v4445_v10, 0.0  ;;  %4480 = vst [vmem:[%s6028_s24 + $0x78] sm:$0xff] %v4462_v25 }
 0x486   : > { %4479 = vst [vmem:[%s6028_s24 + $0x70] sm:$0xff] %v4461_v11 }
 0x487 PF: > { %s7038_s12 = sld [smem:[#allocation20_spill]]  ;;  %s7040_s19 = sld [smem:[#allocation24_spill]] }
 0x488   : > { %s7041_s14 = sld [smem:[#allocation34_spill]]  ;;  %s4496_s13 = sshll.u32 %s6028_s24, 4  ;;  %s4497_s13 = int_to_ptr.vmem [resolvable:$true] %s4496_s13 }
 0x489   : > { %s4482_s4 = scalar_lea.sflag [#allocation5], %s316_s9  ;;  %s5482_s6 = scalar_lea.vmem %s4497_s13, 2048 }
 0x48a   : > { %p5483_p4 = scmp.ne.s32.totalorder %s4497_s13, %s5482_s6  ;;  %s5670_s29 = smov [#allocation11]  }
 0x48b   : > { %s5486_s10 = sshll.u32 %s5670_s29, 4  ;;  %s5487_s10 = int_to_ptr.vmem [resolvable:$false] %s5486_s10 }
 0x48c   : > { %s5488_s15 = scalar_lea.vmem %s5487_s10, 4096  ;;  %p5489_p6 = scmp.lt.s32.totalorder %s4497_s13, %s5487_s10 }
 0x48d   : > { %s5188_s11 = sshll.u32 %s7038_s12, 11  ;;  %p7042_p9 = scmp.ne.s32.totalorder %s7040_s19, 0 }
 0x48e   : > { %s6869_s18 = scalar_lea.hbm %s7041_s14, %s5188_s11  ;;  %p5490_p11 = scmp.lt.s32.totalorder %s5488_s15, %s5482_s6 }
 0x48f   : > { %p5484_p8 = pnand %p5483_p4, %p7042_p9 }
 0x490   : > { %p5491_p3 = por %p5490_p11, %p5489_p6 }
 0x491   : > { %p5485_p1 = pneg %p5484_p8 }
 0x493   : > { %p5492_p2 = pnand %p5491_p3, %p5485_p1 }
 0x495   : > { %5495 = shalt.err (!%p5492_p2)
}
 0x496   : > { %s5496_s9 = scalar_lea.hbm %s6869_s18, 2048  ;;  %s5500_s30 = scalar_lea.hbm %s7041_s14, 4096 }
 0x497   : > { %p5497_p12 = scmp.ne.s32.totalorder %s6869_s18, %s5496_s9  ;;  %p5501_p7 = scmp.lt.u32.totalorder %s6869_s18, %s7041_s14 }
 0x498   : > { %p5502_p10 = scmp.lt.u32.totalorder %s5500_s30, %s5496_s9  ;;  %p5504_p4 = scmp.lt.u32.totalorder %s5496_s9, %s6869_s18 }
 0x499   : > { %p5498_p13 = pnand %p5497_p12, %p7042_p9 }
 0x49a   : > { %p5503_p0 = por %p5502_p10, %p5501_p7 }
 0x49b   : > { %p5499_p5 = pneg %p5498_p13 }
 0x49c   : > { %p5505_p8 = por %p5504_p4, %p5503_p0 }
 0x49e   : > { %p5506_p1 = pnand %p5505_p8, %p5499_p5 }
 0x4a0   : > { %5509 = shalt.err (!%p5506_p1)
}
 0x4a1   : > { %5199 = dma.vmem_to_hbm [thread:$0]  (%p7042_p9), %s4497_s13, 2048, %s6869_s18, %s4482_s4  }
 0x4a2 PF: > { %s7043_s25 = sld [smem:[#allocation16_spill]]  ;;  %s7044_s11 = sld [smem:[#allocation25_spill]] }
 0x4a3   : > { %p5222_p6 = scmp.ge.s32.totalorder %s5648_s28, 2 }
 0x4a8   : > { %s4508_s21 = sand.u32 1, %s7043_s25   ;;  %p7045_p11 = scmp.ne.s32.totalorder %s7044_s11, 0 }
 0x4a9   : > { %s4509_s5 = scalar_lea.sflag [#allocation5], %s4508_s21 }
 0x4aa   : > { %p5216_p3 = pnand %p5222_p6, %p7045_p11 }
 0x4ac   : > { %5591 = dma.done.wait (!%p5216_p3), %s4509_s5, 2048  }
 0x4ad   : > { %5593 = vsyncadd (!%p5216_p3), %s4509_s5, 4294965248  ;;  %s24_s28 = sadd.s32 1, %s5648_s28   ;;  %s7047_s15 = sld [smem:[#allocation17_spill]] }
 0x4ae   : > { %p6896_p2 = scmp.ge.s32.totalorder %s24_s28, 6   ;;  %s7048_s18 = sld [smem:[#allocation18_spill]] }
 0x4af   : > { %s7049_s13 = sld [smem:[#allocation26_spill]]  ;;  %s7050_s4 = sld [smem:[#allocation27_spill]] }
 0x4b0   : > { %s7051_s16 = smov %s5604_s17  ;;  %s7052_s17 = smov %s5924_s3 }
 0x4b1   : > { %s7053_s19 = smov %s5616_s20  ;;  %s7054_s20 = smov %s5916_s7 }
 0x4b2   : > { %s7055_s21 = smov %s5624_s22  ;;  %s7056_s22 = smov %s5628_s23 }
 0x4b3   : > { %s7057_s23 = smov %s5919_s1  ;;  %s7058_s24 = smov %s5640_s26 }
 0x4b4   : > { %s7059_s25 = smov %s5644_s27  ;;  %23 = sbr.rel (!%p6896_p2) target bundleno = 17 (0x11), region = 137 }
 0x4b5   : > { %s7060_s26 = smov %s7049_s13  ;;  %s7061_s27 = smov %s7050_s4 }
 0x4bb   :  { %4514 = vsyncpa [#allocation4], 1 }
 0x4bc   :  { %4516 = vsyncpa [#allocation4 + $0x1], 1 }
 0x4bd   :  { %4517 = vsyncpa [#allocation7], 1 }
 0x4be   :  { %4519 = vsyncpa [#allocation7 + $0x1], 1 }
 0x4bf   :  { %4520 = vsyncpa [#allocation10], 1 }
 0x4c0   :  { %4521 = vsyncpa [#allocation5], 1 }
 0x4c1   :  { %4523 = vsyncpa [#allocation5 + $0x1], 1 }

</bundles_post_ra>
